<compile_context>
chip_gen: v7x
topology: tpu7x:2x2x1
jax: 0.10.0
libtpu: 0.0.40
codegen_flags: <defaults>
</compile_context>

<pallas_src>
import functools

import jax
import jax.numpy as jnp
from jax.experimental import pallas as pl
from jax.experimental.pallas import tpu as pltpu

_LANE = 128
_SUB = 8


def _round_up(x, m):
    return ((x + m - 1) // m) * m


# ----------------------------------------------------------------------------
# Fused kernel: GRU stack (wavefront over layers, unrolled over time) + MLP head.
# Gate ordering follows PyTorch: [r, z, n]; each gate occupies its own 128-lane
# aligned column block of width HP.
# ----------------------------------------------------------------------------
def _textnet_kernel(L, T, Bp, HP, RW, PF,
                    x_ref, h0_ref, gru_ref, fc_ref,
                    p_ref, hn_ref, y_ref):
    G = 3 * HP

    # Per-layer weights / biases, read once; bias broadcasts hoisted out of the
    # time loop (JAX does not CSE broadcast_in_dim).
    wih, whh, bih_b, bhh_b = [], [], [], []
    for l in range(L):
        in_rows = RW if l == 0 else HP
        wih.append(gru_ref[l, 0:in_rows, :])                    # (in_rows, 3HP)
        whh.append(gru_ref[l, RW:RW + HP, :])                   # (HP, 3HP)
        b_i = gru_ref[l, 2 * RW:2 * RW + 1, :]                  # (1, 3HP)
        b_h = gru_ref[l, 2 * RW + 1:2 * RW + 2, :]              # (1, 3HP)
        bih_b.append(None if l == 0 else jnp.broadcast_to(b_i, (Bp, G)))
        bhh_b.append(jnp.broadcast_to(b_h, (Bp, G)))

    # Hoisted layer-0 input projection for ALL timesteps: one matmul instead of
    # T tiny ones (bias folded in with a single broadcast).
    gi0_all = (jnp.dot(x_ref[...], wih[0], preferred_element_type=jnp.float32)
               + gru_ref[0, 2 * RW:2 * RW + 1, :])              # (T*Bp, 3HP)

    h = [h0_ref[l] for l in range(L)]                           # each (Bp, HP)

    # Wavefront over layers: at wave s, layer l computes timestep t = s - l.
    # Layer l consumes layer l-1's output produced at the previous wave, so the
    # L dependent chains in one wave are independent and can overlap.
    for s in range(T + L - 1):
        h_in = list(h)                       # snapshot: state after wave s-1
        for l in range(L):
            t = s - l
            if not (0 <= t < T):
                continue
            if l == 0:
                gi = gi0_all[t * Bp:(t + 1) * Bp, :]            # full-tile slice
            else:
                gi = (jnp.dot(h_in[l - 1], wih[l],
                              preferred_element_type=jnp.float32) + bih_b[l])
            h_prev = h_in[l]
            gh = (jnp.dot(h_prev, whh[l],
                          preferred_element_type=jnp.float32) + bhh_b[l])
            r = jax.nn.sigmoid(gi[:, 0:HP] + gh[:, 0:HP])
            z = jax.nn.sigmoid(gi[:, HP:2 * HP] + gh[:, HP:2 * HP])
            n = jnp.tanh(gi[:, 2 * HP:3 * HP] + r * gh[:, 2 * HP:3 * HP])
            h_new = n + z * (h_prev - n)     # == (1 - z) * n + z * h_prev
            h[l] = h_new
            if l == L - 1:
                y_ref[t * Bp:(t + 1) * Bp, :] = h_new           # full (8,128) store
        # TODO(synk): inter-layer GRU dropout omitted (eval-mode / identity).

    for l in range(L):
        hn_ref[l] = h[l]

    # MLP head: Linear -> LeakyReLU -> Linear -> LeakyReLU -> Linear -> Softmax.
    a = y_ref[...]                                              # (T*Bp, HP)
    w1 = fc_ref[0, 0:HP, :]
    b1 = fc_ref[0, PF:PF + 1, :]
    h1 = jnp.dot(a, w1, preferred_element_type=jnp.float32) + b1
    h1 = jnp.where(h1 > 0, h1, 0.01 * h1)                       # LeakyReLU(0.01)
    # TODO(synk): fc Dropout omitted (eval-mode / identity).
    w2 = fc_ref[1, 0:PF, :]
    b2 = fc_ref[1, PF:PF + 1, :]
    h2 = jnp.dot(h1, w2, preferred_element_type=jnp.float32) + b2
    h2 = jnp.where(h2 > 0, h2, 0.01 * h2)
    w3 = fc_ref[2, 0:PF, :]
    b3 = fc_ref[2, PF:PF + 1, :]                                # padded logits: -1e30
    h3 = jnp.dot(h2, w3, preferred_element_type=jnp.float32) + b3
    m = jnp.max(h3, axis=-1, keepdims=True)
    e = jnp.exp(h3 - m)                                         # padded cols -> 0
    p_ref[...] = e / jnp.sum(e, axis=-1, keepdims=True)         # exact normalize


def _full_spec(shape):
    nd = len(shape)
    return pl.BlockSpec(shape, lambda i, _nd=nd: (0,) * _nd)


# ----------------------------------------------------------------------------
# Forward wrapper: pad to TPU-friendly layout, one pallas_call, slice back.
# ----------------------------------------------------------------------------
def textnet_forward(packed, x, hn, *, output_size):
    T, B, Din = x.shape
    L, _, H = hn.shape
    gru_slab = packed["gru"]                  # (L, 2*RW + 8, 3*HP)
    fc_slab = packed["fc"]                    # (3, PF + 8,   PF)

    HP = gru_slab.shape[-1] // 3
    RW = (gru_slab.shape[1] - _SUB) // 2
    PF = fc_slab.shape[-1]
    Bp = _round_up(max(B, 1), _SUB)

    # Zero-pad batch to a full sublane tile and feature dims to full lane tiles.
    xp = jnp.pad(x, ((0, 0), (0, Bp - B), (0, RW - Din)))
    x2 = xp.reshape(T * Bp, RW)
    h0p = jnp.pad(hn, ((0, 0), (0, Bp - B), (0, HP - H)))

    kernel = functools.partial(_textnet_kernel, L, T, Bp, HP, RW, PF)

    p_flat, hn_out = pl.pallas_call(
        kernel,
        out_shape=(jax.ShapeDtypeStruct((T * Bp, PF), jnp.float32),
                   jax.ShapeDtypeStruct((L, Bp, HP), jnp.float32)),
        grid_spec=pltpu.PrefetchScalarGridSpec(
            num_scalar_prefetch=0,
            grid=(1,),
            in_specs=[_full_spec((T * Bp, RW)),
                      _full_spec((L, Bp, HP)),
                      _full_spec(gru_slab.shape),
                      _full_spec(fc_slab.shape)],
            out_specs=[_full_spec((T * Bp, PF)),
                       _full_spec((L, Bp, HP))],
            scratch_shapes=[pltpu.VMEM((T * Bp, HP), jnp.float32)],
        ),
        compiler_params=pltpu.CompilerParams(
            dimension_semantics=("arbitrary",),
            vmem_limit_bytes=32 * 1024 * 1024),
    )(x2, h0p, gru_slab, fc_slab)

    p = p_flat.reshape(T, Bp, PF)[:, :B, :output_size]
    hn_out = hn_out[:, :B, :H]
    return p, hn_out


# ----------------------------------------------------------------------------
# Parameter init (PyTorch-style layouts) and one-time packing into two slabs.
# ----------------------------------------------------------------------------
def init_params(key, input_size, output_size, hidden_size, num_layers, hc2fc):
    """Deterministic PyTorch-style uniform(-1/sqrt(fan), 1/sqrt(fan)) init."""
    params = {"gru": [], "fc": {}}
    k = 1.0 / jnp.sqrt(jnp.float32(hidden_size))
    keys = jax.random.split(key, num_layers * 4 + 6)
    ki = 0
    for l in range(num_layers):
        din = input_size if l == 0 else hidden_size
        w_ih = jax.random.uniform(keys[ki], (3 * hidden_size, din),
                                  minval=-k, maxval=k, dtype=jnp.float32); ki += 1
        w_hh = jax.random.uniform(keys[ki], (3 * hidden_size, hidden_size),
                                  minval=-k, maxval=k, dtype=jnp.float32); ki += 1
        b_ih = jax.random.uniform(keys[ki], (3 * hidden_size,),
                                  minval=-k, maxval=k, dtype=jnp.float32); ki += 1
        b_hh = jax.random.uniform(keys[ki], (3 * hidden_size,),
                                  minval=-k, maxval=k, dtype=jnp.float32); ki += 1
        params["gru"].append(dict(w_ih=w_ih, w_hh=w_hh, b_ih=b_ih, b_hh=b_hh))

    def lin(kw, kb, fan_in, fan_out):
        kk = 1.0 / jnp.sqrt(jnp.float32(fan_in))
        w = jax.random.uniform(kw, (fan_out, fan_in), minval=-kk, maxval=kk,
                               dtype=jnp.float32)
        b = jax.random.uniform(kb, (fan_out,), minval=-kk, maxval=kk,
                               dtype=jnp.float32)
        return w, b

    params["fc"]["w1"], params["fc"]["b1"] = lin(keys[ki], keys[ki + 1],
                                                 hidden_size, hc2fc); ki += 2
    params["fc"]["w2"], params["fc"]["b2"] = lin(keys[ki], keys[ki + 1],
                                                 hc2fc, hc2fc // 2); ki += 2
    params["fc"]["w3"], params["fc"]["b3"] = lin(keys[ki], keys[ki + 1],
                                                 hc2fc // 2, output_size); ki += 2
    return params


def pack_params(params):
    """One-time transpose / lane-pad / consolidation into two VMEM slabs.

    GRU slab (L, 2*RW+8, 3*HP):
      rows [0,RW)        : W_ih^T, gate g in cols [g*HP, g*HP+H)   (zero padded)
      rows [RW,2RW)      : W_hh^T, gate g in cols [g*HP, g*HP+H)
      row  2*RW          : b_ih    row 2*RW+1 : b_hh               (zero padded)
    FC slab (3, PF+8, PF):
      rows [0,PF) : W^T (zero padded), row PF : bias (logit layer padded -1e30).
    Padded weight rows/cols are zero so padded hidden lanes stay exactly 0.
    """
    gparams = params["gru"]
    L = len(gparams)
    H = gparams[0]["w_hh"].shape[-1]
    Din = gparams[0]["w_ih"].shape[-1]
    HP = _round_up(H, _LANE)
    RW = max(_round_up(Din, _LANE), HP)
    G = 3 * HP
    GR = 2 * RW + _SUB

    layers = []
    for p in gparams:
        din = p["w_ih"].shape[-1]
        blk = jnp.zeros((GR, G), jnp.float32)
        for g in range(3):
            blk = blk.at[0:din, g * HP:g * HP + H].set(p["w_ih"][g * H:(g + 1) * H, :].T)
            blk = blk.at[RW:RW + H, g * HP:g * HP + H].set(p["w_hh"][g * H:(g + 1) * H, :].T)
            blk = blk.at[2 * RW, g * HP:g * HP + H].set(p["b_ih"][g * H:(g + 1) * H])
            blk = blk.at[2 * RW + 1, g * HP:g * HP + H].set(p["b_hh"][g * H:(g + 1) * H])
        layers.append(blk)
    gru_slab = jnp.stack(layers, axis=0)

    fc = params["fc"]
    F1 = fc["w1"].shape[0]
    F2 = fc["w2"].shape[0]
    O = fc["w3"].shape[0]
    PF = max(HP, _round_up(F1, _LANE), _round_up(F2, _LANE), _round_up(O, _LANE))
    FR = PF + _SUB

    def fc_block(w, b, neg_pad=False):
        fan_out, fan_in = w.shape
        blk = jnp.zeros((FR, PF), jnp.float32)
        blk = blk.at[0:fan_in, 0:fan_out].set(w.T)
        if neg_pad:
            blk = blk.at[PF, :].set(-1e30)            # padded logits -> exp()==0
        blk = blk.at[PF, 0:fan_out].set(b)
        return blk

    fc_slab = jnp.stack([fc_block(fc["w1"], fc["b1"]),
                         fc_block(fc["w2"], fc["b2"]),
                         fc_block(fc["w3"], fc["b3"], neg_pad=True)], axis=0)
    return {"gru": gru_slab, "fc": fc_slab}


# ----------------------------------------------------------------------------
# Pure-JAX reference (PyTorch semantics) for correctness checking.
# ----------------------------------------------------------------------------
def _dot(a, b):
    return jnp.dot(a, b, precision=jax.lax.Precision.HIGHEST)


def textnet_reference(params, x, hn):
    T, B, _ = x.shape
    seq = x
    h_finals = []
    for l, p in enumerate(params["gru"]):
        H = p["w_hh"].shape[-1]
        h = hn[l]
        outs = []
        for t in range(T):
            gi = _dot(seq[t], p["w_ih"].T) + p["b_ih"]
            gh = _dot(h, p["w_hh"].T) + p["b_hh"]
            r = jax.nn.sigmoid(gi[:, :H] + gh[:, :H])
            z = jax.nn.sigmoid(gi[:, H:2 * H] + gh[:, H:2 * H])
            n = jnp.tanh(gi[:, 2 * H:] + r * gh[:, 2 * H:])
            h = (1.0 - z) * n + z * h
            outs.append(h)
        seq = jnp.stack(outs, axis=0)
        h_finals.append(h)
    hn_out = jnp.stack(h_finals, axis=0)
    fc = params["fc"]
    a = _dot(seq, fc["w1"].T) + fc["b1"]
    a = jnp.where(a > 0, a, 0.01 * a)
    a = _dot(a, fc["w2"].T) + fc["b2"]
    a = jnp.where(a > 0, a, 0.01 * a)
    a = _dot(a, fc["w3"].T) + fc["b3"]
    return jax.nn.softmax(a, axis=-1), hn_out


if __name__ == "__main__":
    # Small, module-consistent shapes.
    input_size, output_size, hidden_size = 16, 8, 32
    num_layers, hc2fc = 2, 32
    seq_len, batch = 8, 2

    key = jax.random.PRNGKey(0)
    kp, kx = jax.random.split(key)
    params = init_params(kp, input_size, output_size, hidden_size,
                         num_layers, hc2fc)
    packed = pack_params(params)

    x = jax.random.normal(kx, (seq_len, batch, input_size), dtype=jnp.float32)
    hn = jnp.zeros((num_layers, batch, hidden_size), dtype=jnp.float32)

    fwd = jax.jit(functools.partial(textnet_forward, output_size=output_size))
    p, hn_out = fwd(packed, x, hn)
    jax.block_until_ready((p, hn_out))

    assert p.shape == (seq_len, batch, output_size)
    assert hn_out.shape == (num_layers, batch, hidden_size)
    # Softmax rows sum to ~1 (exact divide now).
    assert jnp.allclose(jnp.sum(p, axis=-1), 1.0, atol=1e-3)

    # Numerical check against a pure-JAX reference of the PyTorch module.
    p_ref, hn_ref = textnet_reference(params, x, hn)
    assert jnp.allclose(p, p_ref, atol=2e-3), float(jnp.max(jnp.abs(p - p_ref)))
    assert jnp.allclose(hn_out, hn_ref, atol=2e-3), float(jnp.max(jnp.abs(hn_out - hn_ref)))

    print("KERNEL_OK")
</pallas_src>

<mosaic_0001>
module attributes {stable_mosaic.version = 11 : i64} {
  func.func @_textnet_kernel(%arg0: i32, %arg1: memref<64x128xf32, #tpu.memory_space<vmem>>, %arg2: memref<2x8x128xf32, #tpu.memory_space<vmem>>, %arg3: memref<2x264x384xf32, #tpu.memory_space<vmem>>, %arg4: memref<3x136x128xf32, #tpu.memory_space<vmem>>, %arg5: memref<64x128xf32, #tpu.memory_space<vmem>>, %arg6: memref<2x8x128xf32, #tpu.memory_space<vmem>>, %arg7: memref<64x128xf32, #tpu.memory_space<vmem>>) attributes {dimension_semantics = [#tpu.dimension_semantics<arbitrary>], iteration_bounds = array<i64: 1>, scalar_prefetch = 0 : i64, scratch_operands = 1 : i64, tpu.core_type = #tpu.core_type<tc>, window_params = [{pipeline_mode = #tpu.pipeline_mode<synchronous>, transform_indices = @transform_0, window_bounds = array<i64: 64, 128>}, {pipeline_mode = #tpu.pipeline_mode<synchronous>, transform_indices = @transform_1, window_bounds = array<i64: 2, 8, 128>}, {pipeline_mode = #tpu.pipeline_mode<synchronous>, transform_indices = @transform_2, window_bounds = array<i64: 2, 264, 384>}, {pipeline_mode = #tpu.pipeline_mode<synchronous>, transform_indices = @transform_3, window_bounds = array<i64: 3, 136, 128>}, {pipeline_mode = #tpu.pipeline_mode<synchronous>, transform_indices = @transform_4, window_bounds = array<i64: 64, 128>}, {pipeline_mode = #tpu.pipeline_mode<synchronous>, transform_indices = @transform_5, window_bounds = array<i64: 2, 8, 128>}]} {
    %c0 = arith.constant 0 : index
    %c0_0 = arith.constant 0 : index
    %c0_1 = arith.constant 0 : index
    %0 = vector.load %arg3[%c0, %c0_0, %c0_1] : memref<2x264x384xf32, #tpu.memory_space<vmem>>, vector<1x128x384xf32>
    %1 = vector.shape_cast %0 : vector<1x128x384xf32> to vector<128x384xf32>
    %c0_2 = arith.constant 0 : index
    %c128 = arith.constant 128 : index
    %c0_3 = arith.constant 0 : index
    %2 = vector.load %arg3[%c0_2, %c128, %c0_3] : memref<2x264x384xf32, #tpu.memory_space<vmem>>, vector<1x128x384xf32>
    %3 = vector.shape_cast %2 : vector<1x128x384xf32> to vector<128x384xf32>
    %c0_4 = arith.constant 0 : index
    %c257 = arith.constant 257 : index
    %c0_5 = arith.constant 0 : index
    %4 = vector.load %arg3[%c0_4, %c257, %c0_5] : memref<2x264x384xf32, #tpu.memory_space<vmem>>, vector<1x1x384xf32>
    %5 = vector.shape_cast %4 : vector<1x1x384xf32> to vector<1x384xf32>
    %6 = vector.shape_cast %5 : vector<1x384xf32> to vector<1x384xf32>
    %7 = vector.broadcast %6 : vector<1x384xf32> to vector<8x384xf32>
    %c1 = arith.constant 1 : index
    %c0_6 = arith.constant 0 : index
    %c0_7 = arith.constant 0 : index
    %8 = vector.load %arg3[%c1, %c0_6, %c0_7] : memref<2x264x384xf32, #tpu.memory_space<vmem>>, vector<1x128x384xf32>
    %9 = vector.shape_cast %8 : vector<1x128x384xf32> to vector<128x384xf32>
    %c1_8 = arith.constant 1 : index
    %c128_9 = arith.constant 128 : index
    %c0_10 = arith.constant 0 : index
    %10 = vector.load %arg3[%c1_8, %c128_9, %c0_10] : memref<2x264x384xf32, #tpu.memory_space<vmem>>, vector<1x128x384xf32>
    %11 = vector.shape_cast %10 : vector<1x128x384xf32> to vector<128x384xf32>
    %c1_11 = arith.constant 1 : index
    %c256 = arith.constant 256 : index
    %c0_12 = arith.constant 0 : index
    %12 = vector.load %arg3[%c1_11, %c256, %c0_12] : memref<2x264x384xf32, #tpu.memory_space<vmem>>, vector<1x1x384xf32>
    %13 = vector.shape_cast %12 : vector<1x1x384xf32> to vector<1x384xf32>
    %c1_13 = arith.constant 1 : index
    %c257_14 = arith.constant 257 : index
    %c0_15 = arith.constant 0 : index
    %14 = vector.load %arg3[%c1_13, %c257_14, %c0_15] : memref<2x264x384xf32, #tpu.memory_space<vmem>>, vector<1x1x384xf32>
    %15 = vector.shape_cast %14 : vector<1x1x384xf32> to vector<1x384xf32>
    %16 = vector.shape_cast %13 : vector<1x384xf32> to vector<1x384xf32>
    %17 = vector.broadcast %16 : vector<1x384xf32> to vector<8x384xf32>
    %18 = vector.shape_cast %15 : vector<1x384xf32> to vector<1x384xf32>
    %19 = vector.broadcast %18 : vector<1x384xf32> to vector<8x384xf32>
    %c0_16 = arith.constant 0 : index
    %c0_17 = arith.constant 0 : index
    %20 = vector.load %arg1[%c0_16, %c0_17] : memref<64x128xf32, #tpu.memory_space<vmem>>, vector<64x128xf32>
    %cst = arith.constant dense<0.000000e+00> : vector<64x384xf32>
    %21 = tpu.matmul %20, %1, %cst {dimension_numbers = #tpu.dot_dimension_numbers<[1], [0], [0], [1], [0, 0, 1, 1], [], []>} : vector<64x128xf32>, vector<128x384xf32>, vector<64x384xf32> -> vector<64x384xf32>
    %c0_18 = arith.constant 0 : index
    %c256_19 = arith.constant 256 : index
    %c0_20 = arith.constant 0 : index
    %22 = vector.load %arg3[%c0_18, %c256_19, %c0_20] : memref<2x264x384xf32, #tpu.memory_space<vmem>>, vector<1x1x384xf32>
    %23 = vector.shape_cast %22 : vector<1x1x384xf32> to vector<1x384xf32>
    %24 = vector.broadcast %23 : vector<1x384xf32> to vector<64x384xf32>
    %25 = arith.addf %21, %24 : vector<64x384xf32>
    %c0_21 = arith.constant 0 : index
    %c0_22 = arith.constant 0 : index
    %c0_23 = arith.constant 0 : index
    %26 = vector.load %arg2[%c0_21, %c0_22, %c0_23] : memref<2x8x128xf32, #tpu.memory_space<vmem>>, vector<1x8x128xf32>
    %27 = vector.shape_cast %26 : vector<1x8x128xf32> to vector<8x128xf32>
    %c1_24 = arith.constant 1 : index
    %c0_25 = arith.constant 0 : index
    %c0_26 = arith.constant 0 : index
    %28 = vector.load %arg2[%c1_24, %c0_25, %c0_26] : memref<2x8x128xf32, #tpu.memory_space<vmem>>, vector<1x8x128xf32>
    %29 = vector.shape_cast %28 : vector<1x8x128xf32> to vector<8x128xf32>
    %30 = vector.extract_strided_slice %25 {offsets = [0, 0], sizes = [8, 384], strides = [1, 1]} : vector<64x384xf32> to vector<8x384xf32>
    %cst_27 = arith.constant dense<0.000000e+00> : vector<8x384xf32>
    %31 = tpu.matmul %27, %3, %cst_27 {dimension_numbers = #tpu.dot_dimension_numbers<[1], [0], [0], [1], [0, 0, 1, 1], [], []>} : vector<8x128xf32>, vector<128x384xf32>, vector<8x384xf32> -> vector<8x384xf32>
    %32 = arith.addf %31, %7 : vector<8x384xf32>
    %33 = vector.extract_strided_slice %30 {offsets = [0, 0], sizes = [8, 128], strides = [1, 1]} : vector<8x384xf32> to vector<8x128xf32>
    %34 = vector.extract_strided_slice %32 {offsets = [0, 0], sizes = [8, 128], strides = [1, 1]} : vector<8x384xf32> to vector<8x128xf32>
    %35 = arith.addf %33, %34 : vector<8x128xf32>
    %36 = arith.negf %35 : vector<8x128xf32>
    %37 = math.exp %36 : vector<8x128xf32>
    %cst_28 = arith.constant 1.000000e+00 : f32
    %38 = vector.broadcast %cst_28 : f32 to vector<8x128xf32>
    %39 = arith.addf %38, %37 : vector<8x128xf32>
    %40 = arith.divf %38, %39 : vector<8x128xf32>
    %41 = vector.extract_strided_slice %30 {offsets = [0, 128], sizes = [8, 128], strides = [1, 1]} : vector<8x384xf32> to vector<8x128xf32>
    %42 = vector.extract_strided_slice %32 {offsets = [0, 128], sizes = [8, 128], strides = [1, 1]} : vector<8x384xf32> to vector<8x128xf32>
    %43 = arith.addf %41, %42 : vector<8x128xf32>
    %44 = arith.negf %43 : vector<8x128xf32>
    %45 = math.exp %44 : vector<8x128xf32>
    %cst_29 = arith.constant 1.000000e+00 : f32
    %46 = vector.broadcast %cst_29 : f32 to vector<8x128xf32>
    %47 = arith.addf %46, %45 : vector<8x128xf32>
    %48 = arith.divf %46, %47 : vector<8x128xf32>
    %49 = vector.extract_strided_slice %30 {offsets = [0, 256], sizes = [8, 128], strides = [1, 1]} : vector<8x384xf32> to vector<8x128xf32>
    %50 = vector.extract_strided_slice %32 {offsets = [0, 256], sizes = [8, 128], strides = [1, 1]} : vector<8x384xf32> to vector<8x128xf32>
    %51 = arith.mulf %40, %50 : vector<8x128xf32>
    %52 = arith.addf %49, %51 : vector<8x128xf32>
    %53 = math.tanh %52 : vector<8x128xf32>
    %54 = arith.subf %27, %53 : vector<8x128xf32>
    %55 = arith.mulf %48, %54 : vector<8x128xf32>
    %56 = arith.addf %53, %55 : vector<8x128xf32>
    %57 = vector.extract_strided_slice %25 {offsets = [8, 0], sizes = [8, 384], strides = [1, 1]} : vector<64x384xf32> to vector<8x384xf32>
    %cst_30 = arith.constant dense<0.000000e+00> : vector<8x384xf32>
    %58 = tpu.matmul %56, %3, %cst_30 {dimension_numbers = #tpu.dot_dimension_numbers<[1], [0], [0], [1], [0, 0, 1, 1], [], []>} : vector<8x128xf32>, vector<128x384xf32>, vector<8x384xf32> -> vector<8x384xf32>
    %59 = arith.addf %58, %7 : vector<8x384xf32>
    %60 = vector.extract_strided_slice %57 {offsets = [0, 0], sizes = [8, 128], strides = [1, 1]} : vector<8x384xf32> to vector<8x128xf32>
    %61 = vector.extract_strided_slice %59 {offsets = [0, 0], sizes = [8, 128], strides = [1, 1]} : vector<8x384xf32> to vector<8x128xf32>
    %62 = arith.addf %60, %61 : vector<8x128xf32>
    %63 = arith.negf %62 : vector<8x128xf32>
    %64 = math.exp %63 : vector<8x128xf32>
    %cst_31 = arith.constant 1.000000e+00 : f32
    %65 = vector.broadcast %cst_31 : f32 to vector<8x128xf32>
    %66 = arith.addf %65, %64 : vector<8x128xf32>
    %67 = arith.divf %65, %66 : vector<8x128xf32>
    %68 = vector.extract_strided_slice %57 {offsets = [0, 128], sizes = [8, 128], strides = [1, 1]} : vector<8x384xf32> to vector<8x128xf32>
    %69 = vector.extract_strided_slice %59 {offsets = [0, 128], sizes = [8, 128], strides = [1, 1]} : vector<8x384xf32> to vector<8x128xf32>
    %70 = arith.addf %68, %69 : vector<8x128xf32>
    %71 = arith.negf %70 : vector<8x128xf32>
    %72 = math.exp %71 : vector<8x128xf32>
    %cst_32 = arith.constant 1.000000e+00 : f32
    %73 = vector.broadcast %cst_32 : f32 to vector<8x128xf32>
    %74 = arith.addf %73, %72 : vector<8x128xf32>
    %75 = arith.divf %73, %74 : vector<8x128xf32>
    %76 = vector.extract_strided_slice %57 {offsets = [0, 256], sizes = [8, 128], strides = [1, 1]} : vector<8x384xf32> to vector<8x128xf32>
    %77 = vector.extract_strided_slice %59 {offsets = [0, 256], sizes = [8, 128], strides = [1, 1]} : vector<8x384xf32> to vector<8x128xf32>
    %78 = arith.mulf %67, %77 : vector<8x128xf32>
    %79 = arith.addf %76, %78 : vector<8x128xf32>
    %80 = math.tanh %79 : vector<8x128xf32>
    %81 = arith.subf %56, %80 : vector<8x128xf32>
    %82 = arith.mulf %75, %81 : vector<8x128xf32>
    %83 = arith.addf %80, %82 : vector<8x128xf32>
    %cst_33 = arith.constant dense<0.000000e+00> : vector<8x384xf32>
    %84 = tpu.matmul %56, %9, %cst_33 {dimension_numbers = #tpu.dot_dimension_numbers<[1], [0], [0], [1], [0, 0, 1, 1], [], []>} : vector<8x128xf32>, vector<128x384xf32>, vector<8x384xf32> -> vector<8x384xf32>
    %85 = arith.addf %84, %17 : vector<8x384xf32>
    %cst_34 = arith.constant dense<0.000000e+00> : vector<8x384xf32>
    %86 = tpu.matmul %29, %11, %cst_34 {dimension_numbers = #tpu.dot_dimension_numbers<[1], [0], [0], [1], [0, 0, 1, 1], [], []>} : vector<8x128xf32>, vector<128x384xf32>, vector<8x384xf32> -> vector<8x384xf32>
    %87 = arith.addf %86, %19 : vector<8x384xf32>
    %88 = vector.extract_strided_slice %85 {offsets = [0, 0], sizes = [8, 128], strides = [1, 1]} : vector<8x384xf32> to vector<8x128xf32>
    %89 = vector.extract_strided_slice %87 {offsets = [0, 0], sizes = [8, 128], strides = [1, 1]} : vector<8x384xf32> to vector<8x128xf32>
    %90 = arith.addf %88, %89 : vector<8x128xf32>
    %91 = arith.negf %90 : vector<8x128xf32>
    %92 = math.exp %91 : vector<8x128xf32>
    %cst_35 = arith.constant 1.000000e+00 : f32
    %93 = vector.broadcast %cst_35 : f32 to vector<8x128xf32>
    %94 = arith.addf %93, %92 : vector<8x128xf32>
    %95 = arith.divf %93, %94 : vector<8x128xf32>
    %96 = vector.extract_strided_slice %85 {offsets = [0, 128], sizes = [8, 128], strides = [1, 1]} : vector<8x384xf32> to vector<8x128xf32>
    %97 = vector.extract_strided_slice %87 {offsets = [0, 128], sizes = [8, 128], strides = [1, 1]} : vector<8x384xf32> to vector<8x128xf32>
    %98 = arith.addf %96, %97 : vector<8x128xf32>
    %99 = arith.negf %98 : vector<8x128xf32>
    %100 = math.exp %99 : vector<8x128xf32>
    %cst_36 = arith.constant 1.000000e+00 : f32
    %101 = vector.broadcast %cst_36 : f32 to vector<8x128xf32>
    %102 = arith.addf %101, %100 : vector<8x128xf32>
    %103 = arith.divf %101, %102 : vector<8x128xf32>
    %104 = vector.extract_strided_slice %85 {offsets = [0, 256], sizes = [8, 128], strides = [1, 1]} : vector<8x384xf32> to vector<8x128xf32>
    %105 = vector.extract_strided_slice %87 {offsets = [0, 256], sizes = [8, 128], strides = [1, 1]} : vector<8x384xf32> to vector<8x128xf32>
    %106 = arith.mulf %95, %105 : vector<8x128xf32>
    %107 = arith.addf %104, %106 : vector<8x128xf32>
    %108 = math.tanh %107 : vector<8x128xf32>
    %109 = arith.subf %29, %108 : vector<8x128xf32>
    %110 = arith.mulf %103, %109 : vector<8x128xf32>
    %111 = arith.addf %108, %110 : vector<8x128xf32>
    %c0_37 = arith.constant 0 : index
    %c0_38 = arith.constant 0 : index
    %112 = vector.load %arg7[%c0_37, %c0_38] : memref<64x128xf32, #tpu.memory_space<vmem>>, vector<8x128xf32>
    tpu.vector_store %arg7[%c0_37, %c0_38], %111 {strides = array<i32>} : memref<64x128xf32, #tpu.memory_space<vmem>>, vector<8x128xf32>,
    %113 = vector.extract_strided_slice %25 {offsets = [16, 0], sizes = [8, 384], strides = [1, 1]} : vector<64x384xf32> to vector<8x384xf32>
    %cst_39 = arith.constant dense<0.000000e+00> : vector<8x384xf32>
    %114 = tpu.matmul %83, %3, %cst_39 {dimension_numbers = #tpu.dot_dimension_numbers<[1], [0], [0], [1], [0, 0, 1, 1], [], []>} : vector<8x128xf32>, vector<128x384xf32>, vector<8x384xf32> -> vector<8x384xf32>
    %115 = arith.addf %114, %7 : vector<8x384xf32>
    %116 = vector.extract_strided_slice %113 {offsets = [0, 0], sizes = [8, 128], strides = [1, 1]} : vector<8x384xf32> to vector<8x128xf32>
    %117 = vector.extract_strided_slice %115 {offsets = [0, 0], sizes = [8, 128], strides = [1, 1]} : vector<8x384xf32> to vector<8x128xf32>
    %118 = arith.addf %116, %117 : vector<8x128xf32>
    %119 = arith.negf %118 : vector<8x128xf32>
    %120 = math.exp %119 : vector<8x128xf32>
    %cst_40 = arith.constant 1.000000e+00 : f32
    %121 = vector.broadcast %cst_40 : f32 to vector<8x128xf32>
    %122 = arith.addf %121, %120 : vector<8x128xf32>
    %123 = arith.divf %121, %122 : vector<8x128xf32>
    %124 = vector.extract_strided_slice %113 {offsets = [0, 128], sizes = [8, 128], strides = [1, 1]} : vector<8x384xf32> to vector<8x128xf32>
    %125 = vector.extract_strided_slice %115 {offsets = [0, 128], sizes = [8, 128], strides = [1, 1]} : vector<8x384xf32> to vector<8x128xf32>
    %126 = arith.addf %124, %125 : vector<8x128xf32>
    %127 = arith.negf %126 : vector<8x128xf32>
    %128 = math.exp %127 : vector<8x128xf32>
    %cst_41 = arith.constant 1.000000e+00 : f32
    %129 = vector.broadcast %cst_41 : f32 to vector<8x128xf32>
    %130 = arith.addf %129, %128 : vector<8x128xf32>
    %131 = arith.divf %129, %130 : vector<8x128xf32>
    %132 = vector.extract_strided_slice %113 {offsets = [0, 256], sizes = [8, 128], strides = [1, 1]} : vector<8x384xf32> to vector<8x128xf32>
    %133 = vector.extract_strided_slice %115 {offsets = [0, 256], sizes = [8, 128], strides = [1, 1]} : vector<8x384xf32> to vector<8x128xf32>
    %134 = arith.mulf %123, %133 : vector<8x128xf32>
    %135 = arith.addf %132, %134 : vector<8x128xf32>
    %136 = math.tanh %135 : vector<8x128xf32>
    %137 = arith.subf %83, %136 : vector<8x128xf32>
    %138 = arith.mulf %131, %137 : vector<8x128xf32>
    %139 = arith.addf %136, %138 : vector<8x128xf32>
    %cst_42 = arith.constant dense<0.000000e+00> : vector<8x384xf32>
    %140 = tpu.matmul %83, %9, %cst_42 {dimension_numbers = #tpu.dot_dimension_numbers<[1], [0], [0], [1], [0, 0, 1, 1], [], []>} : vector<8x128xf32>, vector<128x384xf32>, vector<8x384xf32> -> vector<8x384xf32>
    %141 = arith.addf %140, %17 : vector<8x384xf32>
    %cst_43 = arith.constant dense<0.000000e+00> : vector<8x384xf32>
    %142 = tpu.matmul %111, %11, %cst_43 {dimension_numbers = #tpu.dot_dimension_numbers<[1], [0], [0], [1], [0, 0, 1, 1], [], []>} : vector<8x128xf32>, vector<128x384xf32>, vector<8x384xf32> -> vector<8x384xf32>
    %143 = arith.addf %142, %19 : vector<8x384xf32>
    %144 = vector.extract_strided_slice %141 {offsets = [0, 0], sizes = [8, 128], strides = [1, 1]} : vector<8x384xf32> to vector<8x128xf32>
    %145 = vector.extract_strided_slice %143 {offsets = [0, 0], sizes = [8, 128], strides = [1, 1]} : vector<8x384xf32> to vector<8x128xf32>
    %146 = arith.addf %144, %145 : vector<8x128xf32>
    %147 = arith.negf %146 : vector<8x128xf32>
    %148 = math.exp %147 : vector<8x128xf32>
    %cst_44 = arith.constant 1.000000e+00 : f32
    %149 = vector.broadcast %cst_44 : f32 to vector<8x128xf32>
    %150 = arith.addf %149, %148 : vector<8x128xf32>
    %151 = arith.divf %149, %150 : vector<8x128xf32>
    %152 = vector.extract_strided_slice %141 {offsets = [0, 128], sizes = [8, 128], strides = [1, 1]} : vector<8x384xf32> to vector<8x128xf32>
    %153 = vector.extract_strided_slice %143 {offsets = [0, 128], sizes = [8, 128], strides = [1, 1]} : vector<8x384xf32> to vector<8x128xf32>
    %154 = arith.addf %152, %153 : vector<8x128xf32>
    %155 = arith.negf %154 : vector<8x128xf32>
    %156 = math.exp %155 : vector<8x128xf32>
    %cst_45 = arith.constant 1.000000e+00 : f32
    %157 = vector.broadcast %cst_45 : f32 to vector<8x128xf32>
    %158 = arith.addf %157, %156 : vector<8x128xf32>
    %159 = arith.divf %157, %158 : vector<8x128xf32>
    %160 = vector.extract_strided_slice %141 {offsets = [0, 256], sizes = [8, 128], strides = [1, 1]} : vector<8x384xf32> to vector<8x128xf32>
    %161 = vector.extract_strided_slice %143 {offsets = [0, 256], sizes = [8, 128], strides = [1, 1]} : vector<8x384xf32> to vector<8x128xf32>
    %162 = arith.mulf %151, %161 : vector<8x128xf32>
    %163 = arith.addf %160, %162 : vector<8x128xf32>
    %164 = math.tanh %163 : vector<8x128xf32>
    %165 = arith.subf %111, %164 : vector<8x128xf32>
    %166 = arith.mulf %159, %165 : vector<8x128xf32>
    %167 = arith.addf %164, %166 : vector<8x128xf32>
    %c8 = arith.constant 8 : index
    %c0_46 = arith.constant 0 : index
    %168 = vector.load %arg7[%c8, %c0_46] : memref<64x128xf32, #tpu.memory_space<vmem>>, vector<8x128xf32>
    tpu.vector_store %arg7[%c8, %c0_46], %167 {strides = array<i32>} : memref<64x128xf32, #tpu.memory_space<vmem>>, vector<8x128xf32>,
    %169 = vector.extract_strided_slice %25 {offsets = [24, 0], sizes = [8, 384], strides = [1, 1]} : vector<64x384xf32> to vector<8x384xf32>
    %cst_47 = arith.constant dense<0.000000e+00> : vector<8x384xf32>
    %170 = tpu.matmul %139, %3, %cst_47 {dimension_numbers = #tpu.dot_dimension_numbers<[1], [0], [0], [1], [0, 0, 1, 1], [], []>} : vector<8x128xf32>, vector<128x384xf32>, vector<8x384xf32> -> vector<8x384xf32>
    %171 = arith.addf %170, %7 : vector<8x384xf32>
    %172 = vector.extract_strided_slice %169 {offsets = [0, 0], sizes = [8, 128], strides = [1, 1]} : vector<8x384xf32> to vector<8x128xf32>
    %173 = vector.extract_strided_slice %171 {offsets = [0, 0], sizes = [8, 128], strides = [1, 1]} : vector<8x384xf32> to vector<8x128xf32>
    %174 = arith.addf %172, %173 : vector<8x128xf32>
    %175 = arith.negf %174 : vector<8x128xf32>
    %176 = math.exp %175 : vector<8x128xf32>
    %cst_48 = arith.constant 1.000000e+00 : f32
    %177 = vector.broadcast %cst_48 : f32 to vector<8x128xf32>
    %178 = arith.addf %177, %176 : vector<8x128xf32>
    %179 = arith.divf %177, %178 : vector<8x128xf32>
    %180 = vector.extract_strided_slice %169 {offsets = [0, 128], sizes = [8, 128], strides = [1, 1]} : vector<8x384xf32> to vector<8x128xf32>
    %181 = vector.extract_strided_slice %171 {offsets = [0, 128], sizes = [8, 128], strides = [1, 1]} : vector<8x384xf32> to vector<8x128xf32>
    %182 = arith.addf %180, %181 : vector<8x128xf32>
    %183 = arith.negf %182 : vector<8x128xf32>
    %184 = math.exp %183 : vector<8x128xf32>
    %cst_49 = arith.constant 1.000000e+00 : f32
    %185 = vector.broadcast %cst_49 : f32 to vector<8x128xf32>
    %186 = arith.addf %185, %184 : vector<8x128xf32>
    %187 = arith.divf %185, %186 : vector<8x128xf32>
    %188 = vector.extract_strided_slice %169 {offsets = [0, 256], sizes = [8, 128], strides = [1, 1]} : vector<8x384xf32> to vector<8x128xf32>
    %189 = vector.extract_strided_slice %171 {offsets = [0, 256], sizes = [8, 128], strides = [1, 1]} : vector<8x384xf32> to vector<8x128xf32>
    %190 = arith.mulf %179, %189 : vector<8x128xf32>
    %191 = arith.addf %188, %190 : vector<8x128xf32>
    %192 = math.tanh %191 : vector<8x128xf32>
    %193 = arith.subf %139, %192 : vector<8x128xf32>
    %194 = arith.mulf %187, %193 : vector<8x128xf32>
    %195 = arith.addf %192, %194 : vector<8x128xf32>
    %cst_50 = arith.constant dense<0.000000e+00> : vector<8x384xf32>
    %196 = tpu.matmul %139, %9, %cst_50 {dimension_numbers = #tpu.dot_dimension_numbers<[1], [0], [0], [1], [0, 0, 1, 1], [], []>} : vector<8x128xf32>, vector<128x384xf32>, vector<8x384xf32> -> vector<8x384xf32>
    %197 = arith.addf %196, %17 : vector<8x384xf32>
    %cst_51 = arith.constant dense<0.000000e+00> : vector<8x384xf32>
    %198 = tpu.matmul %167, %11, %cst_51 {dimension_numbers = #tpu.dot_dimension_numbers<[1], [0], [0], [1], [0, 0, 1, 1], [], []>} : vector<8x128xf32>, vector<128x384xf32>, vector<8x384xf32> -> vector<8x384xf32>
    %199 = arith.addf %198, %19 : vector<8x384xf32>
    %200 = vector.extract_strided_slice %197 {offsets = [0, 0], sizes = [8, 128], strides = [1, 1]} : vector<8x384xf32> to vector<8x128xf32>
    %201 = vector.extract_strided_slice %199 {offsets = [0, 0], sizes = [8, 128], strides = [1, 1]} : vector<8x384xf32> to vector<8x128xf32>
    %202 = arith.addf %200, %201 : vector<8x128xf32>
    %203 = arith.negf %202 : vector<8x128xf32>
    %204 = math.exp %203 : vector<8x128xf32>
    %cst_52 = arith.constant 1.000000e+00 : f32
    %205 = vector.broadcast %cst_52 : f32 to vector<8x128xf32>
    %206 = arith.addf %205, %204 : vector<8x128xf32>
    %207 = arith.divf %205, %206 : vector<8x128xf32>
    %208 = vector.extract_strided_slice %197 {offsets = [0, 128], sizes = [8, 128], strides = [1, 1]} : vector<8x384xf32> to vector<8x128xf32>
    %209 = vector.extract_strided_slice %199 {offsets = [0, 128], sizes = [8, 128], strides = [1, 1]} : vector<8x384xf32> to vector<8x128xf32>
    %210 = arith.addf %208, %209 : vector<8x128xf32>
    %211 = arith.negf %210 : vector<8x128xf32>
    %212 = math.exp %211 : vector<8x128xf32>
    %cst_53 = arith.constant 1.000000e+00 : f32
    %213 = vector.broadcast %cst_53 : f32 to vector<8x128xf32>
    %214 = arith.addf %213, %212 : vector<8x128xf32>
    %215 = arith.divf %213, %214 : vector<8x128xf32>
    %216 = vector.extract_strided_slice %197 {offsets = [0, 256], sizes = [8, 128], strides = [1, 1]} : vector<8x384xf32> to vector<8x128xf32>
    %217 = vector.extract_strided_slice %199 {offsets = [0, 256], sizes = [8, 128], strides = [1, 1]} : vector<8x384xf32> to vector<8x128xf32>
    %218 = arith.mulf %207, %217 : vector<8x128xf32>
    %219 = arith.addf %216, %218 : vector<8x128xf32>
    %220 = math.tanh %219 : vector<8x128xf32>
    %221 = arith.subf %167, %220 : vector<8x128xf32>
    %222 = arith.mulf %215, %221 : vector<8x128xf32>
    %223 = arith.addf %220, %222 : vector<8x128xf32>
    %c16 = arith.constant 16 : index
    %c0_54 = arith.constant 0 : index
    %224 = vector.load %arg7[%c16, %c0_54] : memref<64x128xf32, #tpu.memory_space<vmem>>, vector<8x128xf32>
    tpu.vector_store %arg7[%c16, %c0_54], %223 {strides = array<i32>} : memref<64x128xf32, #tpu.memory_space<vmem>>, vector<8x128xf32>,
    %225 = vector.extract_strided_slice %25 {offsets = [32, 0], sizes = [8, 384], strides = [1, 1]} : vector<64x384xf32> to vector<8x384xf32>
    %cst_55 = arith.constant dense<0.000000e+00> : vector<8x384xf32>
    %226 = tpu.matmul %195, %3, %cst_55 {dimension_numbers = #tpu.dot_dimension_numbers<[1], [0], [0], [1], [0, 0, 1, 1], [], []>} : vector<8x128xf32>, vector<128x384xf32>, vector<8x384xf32> -> vector<8x384xf32>
    %227 = arith.addf %226, %7 : vector<8x384xf32>
    %228 = vector.extract_strided_slice %225 {offsets = [0, 0], sizes = [8, 128], strides = [1, 1]} : vector<8x384xf32> to vector<8x128xf32>
    %229 = vector.extract_strided_slice %227 {offsets = [0, 0], sizes = [8, 128], strides = [1, 1]} : vector<8x384xf32> to vector<8x128xf32>
    %230 = arith.addf %228, %229 : vector<8x128xf32>
    %231 = arith.negf %230 : vector<8x128xf32>
    %232 = math.exp %231 : vector<8x128xf32>
    %cst_56 = arith.constant 1.000000e+00 : f32
    %233 = vector.broadcast %cst_56 : f32 to vector<8x128xf32>
    %234 = arith.addf %233, %232 : vector<8x128xf32>
    %235 = arith.divf %233, %234 : vector<8x128xf32>
    %236 = vector.extract_strided_slice %225 {offsets = [0, 128], sizes = [8, 128], strides = [1, 1]} : vector<8x384xf32> to vector<8x128xf32>
    %237 = vector.extract_strided_slice %227 {offsets = [0, 128], sizes = [8, 128], strides = [1, 1]} : vector<8x384xf32> to vector<8x128xf32>
    %238 = arith.addf %236, %237 : vector<8x128xf32>
    %239 = arith.negf %238 : vector<8x128xf32>
    %240 = math.exp %239 : vector<8x128xf32>
    %cst_57 = arith.constant 1.000000e+00 : f32
    %241 = vector.broadcast %cst_57 : f32 to vector<8x128xf32>
    %242 = arith.addf %241, %240 : vector<8x128xf32>
    %243 = arith.divf %241, %242 : vector<8x128xf32>
    %244 = vector.extract_strided_slice %225 {offsets = [0, 256], sizes = [8, 128], strides = [1, 1]} : vector<8x384xf32> to vector<8x128xf32>
    %245 = vector.extract_strided_slice %227 {offsets = [0, 256], sizes = [8, 128], strides = [1, 1]} : vector<8x384xf32> to vector<8x128xf32>
    %246 = arith.mulf %235, %245 : vector<8x128xf32>
    %247 = arith.addf %244, %246 : vector<8x128xf32>
    %248 = math.tanh %247 : vector<8x128xf32>
    %249 = arith.subf %195, %248 : vector<8x128xf32>
    %250 = arith.mulf %243, %249 : vector<8x128xf32>
    %251 = arith.addf %248, %250 : vector<8x128xf32>
    %cst_58 = arith.constant dense<0.000000e+00> : vector<8x384xf32>
    %252 = tpu.matmul %195, %9, %cst_58 {dimension_numbers = #tpu.dot_dimension_numbers<[1], [0], [0], [1], [0, 0, 1, 1], [], []>} : vector<8x128xf32>, vector<128x384xf32>, vector<8x384xf32> -> vector<8x384xf32>
    %253 = arith.addf %252, %17 : vector<8x384xf32>
    %cst_59 = arith.constant dense<0.000000e+00> : vector<8x384xf32>
    %254 = tpu.matmul %223, %11, %cst_59 {dimension_numbers = #tpu.dot_dimension_numbers<[1], [0], [0], [1], [0, 0, 1, 1], [], []>} : vector<8x128xf32>, vector<128x384xf32>, vector<8x384xf32> -> vector<8x384xf32>
    %255 = arith.addf %254, %19 : vector<8x384xf32>
    %256 = vector.extract_strided_slice %253 {offsets = [0, 0], sizes = [8, 128], strides = [1, 1]} : vector<8x384xf32> to vector<8x128xf32>
    %257 = vector.extract_strided_slice %255 {offsets = [0, 0], sizes = [8, 128], strides = [1, 1]} : vector<8x384xf32> to vector<8x128xf32>
    %258 = arith.addf %256, %257 : vector<8x128xf32>
    %259 = arith.negf %258 : vector<8x128xf32>
    %260 = math.exp %259 : vector<8x128xf32>
    %cst_60 = arith.constant 1.000000e+00 : f32
    %261 = vector.broadcast %cst_60 : f32 to vector<8x128xf32>
    %262 = arith.addf %261, %260 : vector<8x128xf32>
    %263 = arith.divf %261, %262 : vector<8x128xf32>
    %264 = vector.extract_strided_slice %253 {offsets = [0, 128], sizes = [8, 128], strides = [1, 1]} : vector<8x384xf32> to vector<8x128xf32>
    %265 = vector.extract_strided_slice %255 {offsets = [0, 128], sizes = [8, 128], strides = [1, 1]} : vector<8x384xf32> to vector<8x128xf32>
    %266 = arith.addf %264, %265 : vector<8x128xf32>
    %267 = arith.negf %266 : vector<8x128xf32>
    %268 = math.exp %267 : vector<8x128xf32>
    %cst_61 = arith.constant 1.000000e+00 : f32
    %269 = vector.broadcast %cst_61 : f32 to vector<8x128xf32>
    %270 = arith.addf %269, %268 : vector<8x128xf32>
    %271 = arith.divf %269, %270 : vector<8x128xf32>
    %272 = vector.extract_strided_slice %253 {offsets = [0, 256], sizes = [8, 128], strides = [1, 1]} : vector<8x384xf32> to vector<8x128xf32>
    %273 = vector.extract_strided_slice %255 {offsets = [0, 256], sizes = [8, 128], strides = [1, 1]} : vector<8x384xf32> to vector<8x128xf32>
    %274 = arith.mulf %263, %273 : vector<8x128xf32>
    %275 = arith.addf %272, %274 : vector<8x128xf32>
    %276 = math.tanh %275 : vector<8x128xf32>
    %277 = arith.subf %223, %276 : vector<8x128xf32>
    %278 = arith.mulf %271, %277 : vector<8x128xf32>
    %279 = arith.addf %276, %278 : vector<8x128xf32>
    %c24 = arith.constant 24 : index
    %c0_62 = arith.constant 0 : index
    %280 = vector.load %arg7[%c24, %c0_62] : memref<64x128xf32, #tpu.memory_space<vmem>>, vector<8x128xf32>
    tpu.vector_store %arg7[%c24, %c0_62], %279 {strides = array<i32>} : memref<64x128xf32, #tpu.memory_space<vmem>>, vector<8x128xf32>,
    %281 = vector.extract_strided_slice %25 {offsets = [40, 0], sizes = [8, 384], strides = [1, 1]} : vector<64x384xf32> to vector<8x384xf32>
    %cst_63 = arith.constant dense<0.000000e+00> : vector<8x384xf32>
    %282 = tpu.matmul %251, %3, %cst_63 {dimension_numbers = #tpu.dot_dimension_numbers<[1], [0], [0], [1], [0, 0, 1, 1], [], []>} : vector<8x128xf32>, vector<128x384xf32>, vector<8x384xf32> -> vector<8x384xf32>
    %283 = arith.addf %282, %7 : vector<8x384xf32>
    %284 = vector.extract_strided_slice %281 {offsets = [0, 0], sizes = [8, 128], strides = [1, 1]} : vector<8x384xf32> to vector<8x128xf32>
    %285 = vector.extract_strided_slice %283 {offsets = [0, 0], sizes = [8, 128], strides = [1, 1]} : vector<8x384xf32> to vector<8x128xf32>
    %286 = arith.addf %284, %285 : vector<8x128xf32>
    %287 = arith.negf %286 : vector<8x128xf32>
    %288 = math.exp %287 : vector<8x128xf32>
    %cst_64 = arith.constant 1.000000e+00 : f32
    %289 = vector.broadcast %cst_64 : f32 to vector<8x128xf32>
    %290 = arith.addf %289, %288 : vector<8x128xf32>
    %291 = arith.divf %289, %290 : vector<8x128xf32>
    %292 = vector.extract_strided_slice %281 {offsets = [0, 128], sizes = [8, 128], strides = [1, 1]} : vector<8x384xf32> to vector<8x128xf32>
    %293 = vector.extract_strided_slice %283 {offsets = [0, 128], sizes = [8, 128], strides = [1, 1]} : vector<8x384xf32> to vector<8x128xf32>
    %294 = arith.addf %292, %293 : vector<8x128xf32>
    %295 = arith.negf %294 : vector<8x128xf32>
    %296 = math.exp %295 : vector<8x128xf32>
    %cst_65 = arith.constant 1.000000e+00 : f32
    %297 = vector.broadcast %cst_65 : f32 to vector<8x128xf32>
    %298 = arith.addf %297, %296 : vector<8x128xf32>
    %299 = arith.divf %297, %298 : vector<8x128xf32>
    %300 = vector.extract_strided_slice %281 {offsets = [0, 256], sizes = [8, 128], strides = [1, 1]} : vector<8x384xf32> to vector<8x128xf32>
    %301 = vector.extract_strided_slice %283 {offsets = [0, 256], sizes = [8, 128], strides = [1, 1]} : vector<8x384xf32> to vector<8x128xf32>
    %302 = arith.mulf %291, %301 : vector<8x128xf32>
    %303 = arith.addf %300, %302 : vector<8x128xf32>
    %304 = math.tanh %303 : vector<8x128xf32>
    %305 = arith.subf %251, %304 : vector<8x128xf32>
    %306 = arith.mulf %299, %305 : vector<8x128xf32>
    %307 = arith.addf %304, %306 : vector<8x128xf32>
    %cst_66 = arith.constant dense<0.000000e+00> : vector<8x384xf32>
    %308 = tpu.matmul %251, %9, %cst_66 {dimension_numbers = #tpu.dot_dimension_numbers<[1], [0], [0], [1], [0, 0, 1, 1], [], []>} : vector<8x128xf32>, vector<128x384xf32>, vector<8x384xf32> -> vector<8x384xf32>
    %309 = arith.addf %308, %17 : vector<8x384xf32>
    %cst_67 = arith.constant dense<0.000000e+00> : vector<8x384xf32>
    %310 = tpu.matmul %279, %11, %cst_67 {dimension_numbers = #tpu.dot_dimension_numbers<[1], [0], [0], [1], [0, 0, 1, 1], [], []>} : vector<8x128xf32>, vector<128x384xf32>, vector<8x384xf32> -> vector<8x384xf32>
    %311 = arith.addf %310, %19 : vector<8x384xf32>
    %312 = vector.extract_strided_slice %309 {offsets = [0, 0], sizes = [8, 128], strides = [1, 1]} : vector<8x384xf32> to vector<8x128xf32>
    %313 = vector.extract_strided_slice %311 {offsets = [0, 0], sizes = [8, 128], strides = [1, 1]} : vector<8x384xf32> to vector<8x128xf32>
    %314 = arith.addf %312, %313 : vector<8x128xf32>
    %315 = arith.negf %314 : vector<8x128xf32>
    %316 = math.exp %315 : vector<8x128xf32>
    %cst_68 = arith.constant 1.000000e+00 : f32
    %317 = vector.broadcast %cst_68 : f32 to vector<8x128xf32>
    %318 = arith.addf %317, %316 : vector<8x128xf32>
    %319 = arith.divf %317, %318 : vector<8x128xf32>
    %320 = vector.extract_strided_slice %309 {offsets = [0, 128], sizes = [8, 128], strides = [1, 1]} : vector<8x384xf32> to vector<8x128xf32>
    %321 = vector.extract_strided_slice %311 {offsets = [0, 128], sizes = [8, 128], strides = [1, 1]} : vector<8x384xf32> to vector<8x128xf32>
    %322 = arith.addf %320, %321 : vector<8x128xf32>
    %323 = arith.negf %322 : vector<8x128xf32>
    %324 = math.exp %323 : vector<8x128xf32>
    %cst_69 = arith.constant 1.000000e+00 : f32
    %325 = vector.broadcast %cst_69 : f32 to vector<8x128xf32>
    %326 = arith.addf %325, %324 : vector<8x128xf32>
    %327 = arith.divf %325, %326 : vector<8x128xf32>
    %328 = vector.extract_strided_slice %309 {offsets = [0, 256], sizes = [8, 128], strides = [1, 1]} : vector<8x384xf32> to vector<8x128xf32>
    %329 = vector.extract_strided_slice %311 {offsets = [0, 256], sizes = [8, 128], strides = [1, 1]} : vector<8x384xf32> to vector<8x128xf32>
    %330 = arith.mulf %319, %329 : vector<8x128xf32>
    %331 = arith.addf %328, %330 : vector<8x128xf32>
    %332 = math.tanh %331 : vector<8x128xf32>
    %333 = arith.subf %279, %332 : vector<8x128xf32>
    %334 = arith.mulf %327, %333 : vector<8x128xf32>
    %335 = arith.addf %332, %334 : vector<8x128xf32>
    %c32 = arith.constant 32 : index
    %c0_70 = arith.constant 0 : index
    %336 = vector.load %arg7[%c32, %c0_70] : memref<64x128xf32, #tpu.memory_space<vmem>>, vector<8x128xf32>
    tpu.vector_store %arg7[%c32, %c0_70], %335 {strides = array<i32>} : memref<64x128xf32, #tpu.memory_space<vmem>>, vector<8x128xf32>,
    %337 = vector.extract_strided_slice %25 {offsets = [48, 0], sizes = [8, 384], strides = [1, 1]} : vector<64x384xf32> to vector<8x384xf32>
    %cst_71 = arith.constant dense<0.000000e+00> : vector<8x384xf32>
    %338 = tpu.matmul %307, %3, %cst_71 {dimension_numbers = #tpu.dot_dimension_numbers<[1], [0], [0], [1], [0, 0, 1, 1], [], []>} : vector<8x128xf32>, vector<128x384xf32>, vector<8x384xf32> -> vector<8x384xf32>
    %339 = arith.addf %338, %7 : vector<8x384xf32>
    %340 = vector.extract_strided_slice %337 {offsets = [0, 0], sizes = [8, 128], strides = [1, 1]} : vector<8x384xf32> to vector<8x128xf32>
    %341 = vector.extract_strided_slice %339 {offsets = [0, 0], sizes = [8, 128], strides = [1, 1]} : vector<8x384xf32> to vector<8x128xf32>
    %342 = arith.addf %340, %341 : vector<8x128xf32>
    %343 = arith.negf %342 : vector<8x128xf32>
    %344 = math.exp %343 : vector<8x128xf32>
    %cst_72 = arith.constant 1.000000e+00 : f32
    %345 = vector.broadcast %cst_72 : f32 to vector<8x128xf32>
    %346 = arith.addf %345, %344 : vector<8x128xf32>
    %347 = arith.divf %345, %346 : vector<8x128xf32>
    %348 = vector.extract_strided_slice %337 {offsets = [0, 128], sizes = [8, 128], strides = [1, 1]} : vector<8x384xf32> to vector<8x128xf32>
    %349 = vector.extract_strided_slice %339 {offsets = [0, 128], sizes = [8, 128], strides = [1, 1]} : vector<8x384xf32> to vector<8x128xf32>
    %350 = arith.addf %348, %349 : vector<8x128xf32>
    %351 = arith.negf %350 : vector<8x128xf32>
    %352 = math.exp %351 : vector<8x128xf32>
    %cst_73 = arith.constant 1.000000e+00 : f32
    %353 = vector.broadcast %cst_73 : f32 to vector<8x128xf32>
    %354 = arith.addf %353, %352 : vector<8x128xf32>
    %355 = arith.divf %353, %354 : vector<8x128xf32>
    %356 = vector.extract_strided_slice %337 {offsets = [0, 256], sizes = [8, 128], strides = [1, 1]} : vector<8x384xf32> to vector<8x128xf32>
    %357 = vector.extract_strided_slice %339 {offsets = [0, 256], sizes = [8, 128], strides = [1, 1]} : vector<8x384xf32> to vector<8x128xf32>
    %358 = arith.mulf %347, %357 : vector<8x128xf32>
    %359 = arith.addf %356, %358 : vector<8x128xf32>
    %360 = math.tanh %359 : vector<8x128xf32>
    %361 = arith.subf %307, %360 : vector<8x128xf32>
    %362 = arith.mulf %355, %361 : vector<8x128xf32>
    %363 = arith.addf %360, %362 : vector<8x128xf32>
    %cst_74 = arith.constant dense<0.000000e+00> : vector<8x384xf32>
    %364 = tpu.matmul %307, %9, %cst_74 {dimension_numbers = #tpu.dot_dimension_numbers<[1], [0], [0], [1], [0, 0, 1, 1], [], []>} : vector<8x128xf32>, vector<128x384xf32>, vector<8x384xf32> -> vector<8x384xf32>
    %365 = arith.addf %364, %17 : vector<8x384xf32>
    %cst_75 = arith.constant dense<0.000000e+00> : vector<8x384xf32>
    %366 = tpu.matmul %335, %11, %cst_75 {dimension_numbers = #tpu.dot_dimension_numbers<[1], [0], [0], [1], [0, 0, 1, 1], [], []>} : vector<8x128xf32>, vector<128x384xf32>, vector<8x384xf32> -> vector<8x384xf32>
    %367 = arith.addf %366, %19 : vector<8x384xf32>
    %368 = vector.extract_strided_slice %365 {offsets = [0, 0], sizes = [8, 128], strides = [1, 1]} : vector<8x384xf32> to vector<8x128xf32>
    %369 = vector.extract_strided_slice %367 {offsets = [0, 0], sizes = [8, 128], strides = [1, 1]} : vector<8x384xf32> to vector<8x128xf32>
    %370 = arith.addf %368, %369 : vector<8x128xf32>
    %371 = arith.negf %370 : vector<8x128xf32>
    %372 = math.exp %371 : vector<8x128xf32>
    %cst_76 = arith.constant 1.000000e+00 : f32
    %373 = vector.broadcast %cst_76 : f32 to vector<8x128xf32>
    %374 = arith.addf %373, %372 : vector<8x128xf32>
    %375 = arith.divf %373, %374 : vector<8x128xf32>
    %376 = vector.extract_strided_slice %365 {offsets = [0, 128], sizes = [8, 128], strides = [1, 1]} : vector<8x384xf32> to vector<8x128xf32>
    %377 = vector.extract_strided_slice %367 {offsets = [0, 128], sizes = [8, 128], strides = [1, 1]} : vector<8x384xf32> to vector<8x128xf32>
    %378 = arith.addf %376, %377 : vector<8x128xf32>
    %379 = arith.negf %378 : vector<8x128xf32>
    %380 = math.exp %379 : vector<8x128xf32>
    %cst_77 = arith.constant 1.000000e+00 : f32
    %381 = vector.broadcast %cst_77 : f32 to vector<8x128xf32>
    %382 = arith.addf %381, %380 : vector<8x128xf32>
    %383 = arith.divf %381, %382 : vector<8x128xf32>
    %384 = vector.extract_strided_slice %365 {offsets = [0, 256], sizes = [8, 128], strides = [1, 1]} : vector<8x384xf32> to vector<8x128xf32>
    %385 = vector.extract_strided_slice %367 {offsets = [0, 256], sizes = [8, 128], strides = [1, 1]} : vector<8x384xf32> to vector<8x128xf32>
    %386 = arith.mulf %375, %385 : vector<8x128xf32>
    %387 = arith.addf %384, %386 : vector<8x128xf32>
    %388 = math.tanh %387 : vector<8x128xf32>
    %389 = arith.subf %335, %388 : vector<8x128xf32>
    %390 = arith.mulf %383, %389 : vector<8x128xf32>
    %391 = arith.addf %388, %390 : vector<8x128xf32>
    %c40 = arith.constant 40 : index
    %c0_78 = arith.constant 0 : index
    %392 = vector.load %arg7[%c40, %c0_78] : memref<64x128xf32, #tpu.memory_space<vmem>>, vector<8x128xf32>
    tpu.vector_store %arg7[%c40, %c0_78], %391 {strides = array<i32>} : memref<64x128xf32, #tpu.memory_space<vmem>>, vector<8x128xf32>,
    %393 = vector.extract_strided_slice %25 {offsets = [56, 0], sizes = [8, 384], strides = [1, 1]} : vector<64x384xf32> to vector<8x384xf32>
    %cst_79 = arith.constant dense<0.000000e+00> : vector<8x384xf32>
    %394 = tpu.matmul %363, %3, %cst_79 {dimension_numbers = #tpu.dot_dimension_numbers<[1], [0], [0], [1], [0, 0, 1, 1], [], []>} : vector<8x128xf32>, vector<128x384xf32>, vector<8x384xf32> -> vector<8x384xf32>
    %395 = arith.addf %394, %7 : vector<8x384xf32>
    %396 = vector.extract_strided_slice %393 {offsets = [0, 0], sizes = [8, 128], strides = [1, 1]} : vector<8x384xf32> to vector<8x128xf32>
    %397 = vector.extract_strided_slice %395 {offsets = [0, 0], sizes = [8, 128], strides = [1, 1]} : vector<8x384xf32> to vector<8x128xf32>
    %398 = arith.addf %396, %397 : vector<8x128xf32>
    %399 = arith.negf %398 : vector<8x128xf32>
    %400 = math.exp %399 : vector<8x128xf32>
    %cst_80 = arith.constant 1.000000e+00 : f32
    %401 = vector.broadcast %cst_80 : f32 to vector<8x128xf32>
    %402 = arith.addf %401, %400 : vector<8x128xf32>
    %403 = arith.divf %401, %402 : vector<8x128xf32>
    %404 = vector.extract_strided_slice %393 {offsets = [0, 128], sizes = [8, 128], strides = [1, 1]} : vector<8x384xf32> to vector<8x128xf32>
    %405 = vector.extract_strided_slice %395 {offsets = [0, 128], sizes = [8, 128], strides = [1, 1]} : vector<8x384xf32> to vector<8x128xf32>
    %406 = arith.addf %404, %405 : vector<8x128xf32>
    %407 = arith.negf %406 : vector<8x128xf32>
    %408 = math.exp %407 : vector<8x128xf32>
    %cst_81 = arith.constant 1.000000e+00 : f32
    %409 = vector.broadcast %cst_81 : f32 to vector<8x128xf32>
    %410 = arith.addf %409, %408 : vector<8x128xf32>
    %411 = arith.divf %409, %410 : vector<8x128xf32>
    %412 = vector.extract_strided_slice %393 {offsets = [0, 256], sizes = [8, 128], strides = [1, 1]} : vector<8x384xf32> to vector<8x128xf32>
    %413 = vector.extract_strided_slice %395 {offsets = [0, 256], sizes = [8, 128], strides = [1, 1]} : vector<8x384xf32> to vector<8x128xf32>
    %414 = arith.mulf %403, %413 : vector<8x128xf32>
    %415 = arith.addf %412, %414 : vector<8x128xf32>
    %416 = math.tanh %415 : vector<8x128xf32>
    %417 = arith.subf %363, %416 : vector<8x128xf32>
    %418 = arith.mulf %411, %417 : vector<8x128xf32>
    %419 = arith.addf %416, %418 : vector<8x128xf32>
    %cst_82 = arith.constant dense<0.000000e+00> : vector<8x384xf32>
    %420 = tpu.matmul %363, %9, %cst_82 {dimension_numbers = #tpu.dot_dimension_numbers<[1], [0], [0], [1], [0, 0, 1, 1], [], []>} : vector<8x128xf32>, vector<128x384xf32>, vector<8x384xf32> -> vector<8x384xf32>
    %421 = arith.addf %420, %17 : vector<8x384xf32>
    %cst_83 = arith.constant dense<0.000000e+00> : vector<8x384xf32>
    %422 = tpu.matmul %391, %11, %cst_83 {dimension_numbers = #tpu.dot_dimension_numbers<[1], [0], [0], [1], [0, 0, 1, 1], [], []>} : vector<8x128xf32>, vector<128x384xf32>, vector<8x384xf32> -> vector<8x384xf32>
    %423 = arith.addf %422, %19 : vector<8x384xf32>
    %424 = vector.extract_strided_slice %421 {offsets = [0, 0], sizes = [8, 128], strides = [1, 1]} : vector<8x384xf32> to vector<8x128xf32>
    %425 = vector.extract_strided_slice %423 {offsets = [0, 0], sizes = [8, 128], strides = [1, 1]} : vector<8x384xf32> to vector<8x128xf32>
    %426 = arith.addf %424, %425 : vector<8x128xf32>
    %427 = arith.negf %426 : vector<8x128xf32>
    %428 = math.exp %427 : vector<8x128xf32>
    %cst_84 = arith.constant 1.000000e+00 : f32
    %429 = vector.broadcast %cst_84 : f32 to vector<8x128xf32>
    %430 = arith.addf %429, %428 : vector<8x128xf32>
    %431 = arith.divf %429, %430 : vector<8x128xf32>
    %432 = vector.extract_strided_slice %421 {offsets = [0, 128], sizes = [8, 128], strides = [1, 1]} : vector<8x384xf32> to vector<8x128xf32>
    %433 = vector.extract_strided_slice %423 {offsets = [0, 128], sizes = [8, 128], strides = [1, 1]} : vector<8x384xf32> to vector<8x128xf32>
    %434 = arith.addf %432, %433 : vector<8x128xf32>
    %435 = arith.negf %434 : vector<8x128xf32>
    %436 = math.exp %435 : vector<8x128xf32>
    %cst_85 = arith.constant 1.000000e+00 : f32
    %437 = vector.broadcast %cst_85 : f32 to vector<8x128xf32>
    %438 = arith.addf %437, %436 : vector<8x128xf32>
    %439 = arith.divf %437, %438 : vector<8x128xf32>
    %440 = vector.extract_strided_slice %421 {offsets = [0, 256], sizes = [8, 128], strides = [1, 1]} : vector<8x384xf32> to vector<8x128xf32>
    %441 = vector.extract_strided_slice %423 {offsets = [0, 256], sizes = [8, 128], strides = [1, 1]} : vector<8x384xf32> to vector<8x128xf32>
    %442 = arith.mulf %431, %441 : vector<8x128xf32>
    %443 = arith.addf %440, %442 : vector<8x128xf32>
    %444 = math.tanh %443 : vector<8x128xf32>
    %445 = arith.subf %391, %444 : vector<8x128xf32>
    %446 = arith.mulf %439, %445 : vector<8x128xf32>
    %447 = arith.addf %444, %446 : vector<8x128xf32>
    %c48 = arith.constant 48 : index
    %c0_86 = arith.constant 0 : index
    %448 = vector.load %arg7[%c48, %c0_86] : memref<64x128xf32, #tpu.memory_space<vmem>>, vector<8x128xf32>
    tpu.vector_store %arg7[%c48, %c0_86], %447 {strides = array<i32>} : memref<64x128xf32, #tpu.memory_space<vmem>>, vector<8x128xf32>,
    %cst_87 = arith.constant dense<0.000000e+00> : vector<8x384xf32>
    %449 = tpu.matmul %419, %9, %cst_87 {dimension_numbers = #tpu.dot_dimension_numbers<[1], [0], [0], [1], [0, 0, 1, 1], [], []>} : vector<8x128xf32>, vector<128x384xf32>, vector<8x384xf32> -> vector<8x384xf32>
    %450 = arith.addf %449, %17 : vector<8x384xf32>
    %cst_88 = arith.constant dense<0.000000e+00> : vector<8x384xf32>
    %451 = tpu.matmul %447, %11, %cst_88 {dimension_numbers = #tpu.dot_dimension_numbers<[1], [0], [0], [1], [0, 0, 1, 1], [], []>} : vector<8x128xf32>, vector<128x384xf32>, vector<8x384xf32> -> vector<8x384xf32>
    %452 = arith.addf %451, %19 : vector<8x384xf32>
    %453 = vector.extract_strided_slice %450 {offsets = [0, 0], sizes = [8, 128], strides = [1, 1]} : vector<8x384xf32> to vector<8x128xf32>
    %454 = vector.extract_strided_slice %452 {offsets = [0, 0], sizes = [8, 128], strides = [1, 1]} : vector<8x384xf32> to vector<8x128xf32>
    %455 = arith.addf %453, %454 : vector<8x128xf32>
    %456 = arith.negf %455 : vector<8x128xf32>
    %457 = math.exp %456 : vector<8x128xf32>
    %cst_89 = arith.constant 1.000000e+00 : f32
    %458 = vector.broadcast %cst_89 : f32 to vector<8x128xf32>
    %459 = arith.addf %458, %457 : vector<8x128xf32>
    %460 = arith.divf %458, %459 : vector<8x128xf32>
    %461 = vector.extract_strided_slice %450 {offsets = [0, 128], sizes = [8, 128], strides = [1, 1]} : vector<8x384xf32> to vector<8x128xf32>
    %462 = vector.extract_strided_slice %452 {offsets = [0, 128], sizes = [8, 128], strides = [1, 1]} : vector<8x384xf32> to vector<8x128xf32>
    %463 = arith.addf %461, %462 : vector<8x128xf32>
    %464 = arith.negf %463 : vector<8x128xf32>
    %465 = math.exp %464 : vector<8x128xf32>
    %cst_90 = arith.constant 1.000000e+00 : f32
    %466 = vector.broadcast %cst_90 : f32 to vector<8x128xf32>
    %467 = arith.addf %466, %465 : vector<8x128xf32>
    %468 = arith.divf %466, %467 : vector<8x128xf32>
    %469 = vector.extract_strided_slice %450 {offsets = [0, 256], sizes = [8, 128], strides = [1, 1]} : vector<8x384xf32> to vector<8x128xf32>
    %470 = vector.extract_strided_slice %452 {offsets = [0, 256], sizes = [8, 128], strides = [1, 1]} : vector<8x384xf32> to vector<8x128xf32>
    %471 = arith.mulf %460, %470 : vector<8x128xf32>
    %472 = arith.addf %469, %471 : vector<8x128xf32>
    %473 = math.tanh %472 : vector<8x128xf32>
    %474 = arith.subf %447, %473 : vector<8x128xf32>
    %475 = arith.mulf %468, %474 : vector<8x128xf32>
    %476 = arith.addf %473, %475 : vector<8x128xf32>
    %c56 = arith.constant 56 : index
    %c0_91 = arith.constant 0 : index
    %477 = vector.load %arg7[%c56, %c0_91] : memref<64x128xf32, #tpu.memory_space<vmem>>, vector<8x128xf32>
    tpu.vector_store %arg7[%c56, %c0_91], %476 {strides = array<i32>} : memref<64x128xf32, #tpu.memory_space<vmem>>, vector<8x128xf32>,
    %c0_92 = arith.constant 0 : index
    %c0_93 = arith.constant 0 : index
    %c0_94 = arith.constant 0 : index
    %478 = vector.load %arg6[%c0_92, %c0_93, %c0_94] : memref<2x8x128xf32, #tpu.memory_space<vmem>>, vector<1x8x128xf32>
    %479 = vector.shape_cast %478 : vector<1x8x128xf32> to vector<8x128xf32>
    %480 = vector.shape_cast %419 : vector<8x128xf32> to vector<1x8x128xf32>
    tpu.vector_store %arg6[%c0_92, %c0_93, %c0_94], %480 {strides = array<i32>} : memref<2x8x128xf32, #tpu.memory_space<vmem>>, vector<1x8x128xf32>,
    %c1_95 = arith.constant 1 : index
    %c0_96 = arith.constant 0 : index
    %c0_97 = arith.constant 0 : index
    %481 = vector.load %arg6[%c1_95, %c0_96, %c0_97] : memref<2x8x128xf32, #tpu.memory_space<vmem>>, vector<1x8x128xf32>
    %482 = vector.shape_cast %481 : vector<1x8x128xf32> to vector<8x128xf32>
    %483 = vector.shape_cast %476 : vector<8x128xf32> to vector<1x8x128xf32>
    tpu.vector_store %arg6[%c1_95, %c0_96, %c0_97], %483 {strides = array<i32>} : memref<2x8x128xf32, #tpu.memory_space<vmem>>, vector<1x8x128xf32>,
    %c0_98 = arith.constant 0 : index
    %c0_99 = arith.constant 0 : index
    %484 = vector.load %arg7[%c0_98, %c0_99] : memref<64x128xf32, #tpu.memory_space<vmem>>, vector<64x128xf32>
    %c0_100 = arith.constant 0 : index
    %c0_101 = arith.constant 0 : index
    %c0_102 = arith.constant 0 : index
    %485 = vector.load %arg4[%c0_100, %c0_101, %c0_102] : memref<3x136x128xf32, #tpu.memory_space<vmem>>, vector<1x128x128xf32>
    %486 = vector.shape_cast %485 : vector<1x128x128xf32> to vector<128x128xf32>
    %c0_103 = arith.constant 0 : index
    %c128_104 = arith.constant 128 : index
    %c0_105 = arith.constant 0 : index
    %487 = vector.load %arg4[%c0_103, %c128_104, %c0_105] : memref<3x136x128xf32, #tpu.memory_space<vmem>>, vector<1x1x128xf32>
    %488 = vector.shape_cast %487 : vector<1x1x128xf32> to vector<1x128xf32>
    %cst_106 = arith.constant dense<0.000000e+00> : vector<64x128xf32>
    %489 = tpu.matmul %484, %486, %cst_106 {dimension_numbers = #tpu.dot_dimension_numbers<[1], [0], [0], [1], [0, 0, 1, 1], [], []>} : vector<64x128xf32>, vector<128x128xf32>, vector<64x128xf32> -> vector<64x128xf32>
    %490 = vector.broadcast %488 : vector<1x128xf32> to vector<64x128xf32>
    %491 = arith.addf %489, %490 : vector<64x128xf32>
    %cst_107 = arith.constant 0.000000e+00 : f32
    %492 = vector.broadcast %cst_107 : f32 to vector<64x128xf32>
    %493 = arith.cmpf ogt, %491, %492 : vector<64x128xf32>
    %cst_108 = arith.constant 0.00999999977 : f32
    %494 = vector.broadcast %cst_108 : f32 to vector<64x128xf32>
    %495 = arith.mulf %494, %491 : vector<64x128xf32>
    %496 = arith.select %493, %491, %495 : vector<64x128xi1>, vector<64x128xf32>
    %c1_109 = arith.constant 1 : index
    %c0_110 = arith.constant 0 : index
    %c0_111 = arith.constant 0 : index
    %497 = vector.load %arg4[%c1_109, %c0_110, %c0_111] : memref<3x136x128xf32, #tpu.memory_space<vmem>>, vector<1x128x128xf32>
    %498 = vector.shape_cast %497 : vector<1x128x128xf32> to vector<128x128xf32>
    %c1_112 = arith.constant 1 : index
    %c128_113 = arith.constant 128 : index
    %c0_114 = arith.constant 0 : index
    %499 = vector.load %arg4[%c1_112, %c128_113, %c0_114] : memref<3x136x128xf32, #tpu.memory_space<vmem>>, vector<1x1x128xf32>
    %500 = vector.shape_cast %499 : vector<1x1x128xf32> to vector<1x128xf32>
    %cst_115 = arith.constant dense<0.000000e+00> : vector<64x128xf32>
    %501 = tpu.matmul %496, %498, %cst_115 {dimension_numbers = #tpu.dot_dimension_numbers<[1], [0], [0], [1], [0, 0, 1, 1], [], []>} : vector<64x128xf32>, vector<128x128xf32>, vector<64x128xf32> -> vector<64x128xf32>
    %502 = vector.broadcast %500 : vector<1x128xf32> to vector<64x128xf32>
    %503 = arith.addf %501, %502 : vector<64x128xf32>
    %cst_116 = arith.constant 0.000000e+00 : f32
    %504 = vector.broadcast %cst_116 : f32 to vector<64x128xf32>
    %505 = arith.cmpf ogt, %503, %504 : vector<64x128xf32>
    %cst_117 = arith.constant 0.00999999977 : f32
    %506 = vector.broadcast %cst_117 : f32 to vector<64x128xf32>
    %507 = arith.mulf %506, %503 : vector<64x128xf32>
    %508 = arith.select %505, %503, %507 : vector<64x128xi1>, vector<64x128xf32>
    %c2 = arith.constant 2 : index
    %c0_118 = arith.constant 0 : index
    %c0_119 = arith.constant 0 : index
    %509 = vector.load %arg4[%c2, %c0_118, %c0_119] : memref<3x136x128xf32, #tpu.memory_space<vmem>>, vector<1x128x128xf32>
    %510 = vector.shape_cast %509 : vector<1x128x128xf32> to vector<128x128xf32>
    %c2_120 = arith.constant 2 : index
    %c128_121 = arith.constant 128 : index
    %c0_122 = arith.constant 0 : index
    %511 = vector.load %arg4[%c2_120, %c128_121, %c0_122] : memref<3x136x128xf32, #tpu.memory_space<vmem>>, vector<1x1x128xf32>
    %512 = vector.shape_cast %511 : vector<1x1x128xf32> to vector<1x128xf32>
    %cst_123 = arith.constant dense<0.000000e+00> : vector<64x128xf32>
    %513 = tpu.matmul %508, %510, %cst_123 {dimension_numbers = #tpu.dot_dimension_numbers<[1], [0], [0], [1], [0, 0, 1, 1], [], []>} : vector<64x128xf32>, vector<128x128xf32>, vector<64x128xf32> -> vector<64x128xf32>
    %514 = vector.broadcast %512 : vector<1x128xf32> to vector<64x128xf32>
    %515 = arith.addf %513, %514 : vector<64x128xf32>
    %cst_124 = arith.constant dense<0xFF800000> : vector<64xf32>
    %516 = vector.multi_reduction <maximumf>, %515, %cst_124 [1] : vector<64x128xf32> to vector<64xf32>
    %517 = vector.shape_cast %516 : vector<64xf32> to vector<64x1xf32>
    %518 = vector.broadcast %517 : vector<64x1xf32> to vector<64x128xf32>
    %519 = arith.subf %515, %518 : vector<64x128xf32>
    %520 = math.exp %519 : vector<64x128xf32>
    %cst_125 = arith.constant dense<0.000000e+00> : vector<64xf32>
    %521 = vector.multi_reduction <add>, %520, %cst_125 [1] : vector<64x128xf32> to vector<64xf32>
    %522 = vector.shape_cast %521 : vector<64xf32> to vector<64x1xf32>
    %523 = vector.broadcast %522 : vector<64x1xf32> to vector<64x128xf32>
    %524 = arith.divf %520, %523 : vector<64x128xf32>
    %c0_126 = arith.constant 0 : index
    %c0_127 = arith.constant 0 : index
    %525 = vector.load %arg5[%c0_126, %c0_127] : memref<64x128xf32, #tpu.memory_space<vmem>>, vector<64x128xf32>
    tpu.vector_store %arg5[%c0_126, %c0_127], %524 {strides = array<i32>} : memref<64x128xf32, #tpu.memory_space<vmem>>, vector<64x128xf32>,
    return
  }
  func.func @transform_0(%arg0: i32) -> (i32, i32) {
    %c0_i32 = arith.constant 0 : i32
    %c0_i32_0 = arith.constant 0 : i32
    %c0_i32_1 = arith.constant 0 : i32
    return %c0_i32, %c0_i32_0 : i32, i32
  }
  func.func @transform_1(%arg0: i32) -> (i32, i32, i32) {
    %c0_i32 = arith.constant 0 : i32
    %c0_i32_0 = arith.constant 0 : i32
    %c0_i32_1 = arith.constant 0 : i32
    %c0_i32_2 = arith.constant 0 : i32
    return %c0_i32, %c0_i32_0, %c0_i32_1 : i32, i32, i32
  }
  func.func @transform_2(%arg0: i32) -> (i32, i32, i32) {
    %c0_i32 = arith.constant 0 : i32
    %c0_i32_0 = arith.constant 0 : i32
    %c0_i32_1 = arith.constant 0 : i32
    %c0_i32_2 = arith.constant 0 : i32
    return %c0_i32, %c0_i32_0, %c0_i32_1 : i32, i32, i32
  }
  func.func @transform_3(%arg0: i32) -> (i32, i32, i32) {
    %c0_i32 = arith.constant 0 : i32
    %c0_i32_0 = arith.constant 0 : i32
    %c0_i32_1 = arith.constant 0 : i32
    %c0_i32_2 = arith.constant 0 : i32
    return %c0_i32, %c0_i32_0, %c0_i32_1 : i32, i32, i32
  }
  func.func @transform_4(%arg0: i32) -> (i32, i32) {
    %c0_i32 = arith.constant 0 : i32
    %c0_i32_0 = arith.constant 0 : i32
    %c0_i32_1 = arith.constant 0 : i32
    return %c0_i32, %c0_i32_0 : i32, i32
  }
  func.func @transform_5(%arg0: i32) -> (i32, i32, i32) {
    %c0_i32 = arith.constant 0 : i32
    %c0_i32_0 = arith.constant 0 : i32
    %c0_i32_1 = arith.constant 0 : i32
    %c0_i32_2 = arith.constant 0 : i32
    return %c0_i32, %c0_i32_0, %c0_i32_1 : i32, i32, i32
  }
}

</mosaic_0001>

<bundles_post_ra>
// kernel: textnet_forward.1
= control target key start
LH: loop header
LB: loop body
LE: loop exit
PB: predicated region body
PF: predicated region fallthrough
CT: control target
= control target key end

     0   :  { %11 = vsyncpa [#allocation4], 0  ;;  %s9612_s0 = inlined_call_operand.vmem [shape: f32[64,128], index: 0, kind: input, shape index: {}]   ;;  %s9613_s1 = inlined_call_operand.vmem [shape: f32[2,8,128], index: 1, kind: input, shape index: {}]   ;;  %s9614_s2 = inlined_call_operand.hbm [shape: f32[2,264,384], index: 2, kind: input, shape index: {}]   ;;  %s9615_s3 = inlined_call_operand.hbm [shape: f32[3,136,128], index: 3, kind: input, shape index: {}]   ;;  %s9616_s4 = inlined_call_operand.vmem [shape: f32[64,128], index: 4, kind: output, shape index: {0}]   ;;  %s9617_s5 = inlined_call_operand.vmem [shape: f32[2,8,128], index: 5, kind: output, shape index: {1}]  }
   0x1   :  { %12 = vsyncpa [#allocation6], 0  ;;  %s8206_s18 = smov [#allocation3]   ;;  %s8158_s22 = scalar_lea.hbm %s9614_s2, 25344 }
   0x2   :  { %s22_s19 = sshll.u32 %s8206_s18, 4  ;;  %p8159_p0 = scmp.ne.s32.totalorder %s9614_s2, %s8158_s22  ;;  %s23_s19 = int_to_ptr.vmem [resolvable:$true] %s22_s19 }
   0x3   :  { %p8162_p1 = scmp.lt.u32.totalorder %s8158_s22, %s9614_s2 }
   0x5   :  { %p8164_p2 = pnand %p8162_p1, %p8159_p0 }
   0x7   :  { %8167 = shalt.err (!%p8164_p2)
}
   0x8   :  { %s8168_s27 = scalar_lea.vmem %s23_s19, 25344  ;;  %p8173_p4 = scmp.lt.s32.totalorder %s23_s19, %s23_s19 }
   0x9   :  { %p8169_p3 = scmp.ne.s32.totalorder %s23_s19, %s8168_s27  ;;  %p8174_p5 = scmp.lt.s32.totalorder %s8168_s27, %s8168_s27 }
   0xb   :  { %p8175_p6 = por %p8174_p5, %p8173_p4 }
   0xd   :  { %p8176_p7 = pnand %p8175_p6, %p8169_p3 }
   0xf   :  { %8179 = shalt.err (!%p8176_p7)
}
  0x10   :  { %s8207_s28 = smov 384   ;;  %s8208_s29 = smov 24  }
  0x11   :  { %28 = dma.hbm_to_vmem [thread:$0]  %s9614_s2, 25344, %s23_s19, [#allocation4], %s8207_s28, %s8207_s28, %s8208_s29  }
  0x12   :  { %s8209_s7 = smov [#allocation5]   ;;  %s8180_s11 = scalar_lea.hbm %s9615_s3, 6528 }
  0x13   :  { %s34_s8 = sshll.u32 %s8209_s7, 4  ;;  %p8181_p8 = scmp.ne.s32.totalorder %s9615_s3, %s8180_s11  ;;  %s35_s8 = int_to_ptr.vmem [resolvable:$true] %s34_s8 }
  0x14   :  { %p8184_p9 = scmp.lt.u32.totalorder %s8180_s11, %s9615_s3 }
  0x16   :  { %p8186_p10 = pnand %p8184_p9, %p8181_p8 }
  0x18   :  { %8189 = shalt.err (!%p8186_p10)
}
  0x19   :  { %s8190_s16 = scalar_lea.vmem %s35_s8, 6528  ;;  %p8195_p12 = scmp.lt.s32.totalorder %s35_s8, %s35_s8 }
  0x1a   :  { %p8191_p11 = scmp.ne.s32.totalorder %s35_s8, %s8190_s16  ;;  %p8196_p13 = scmp.lt.s32.totalorder %s8190_s16, %s8190_s16 }
  0x1c   :  { %p8197_p0 = por %p8196_p13, %p8195_p12 }
  0x1e   :  { %p8198_p1 = pnand %p8197_p0, %p8191_p11 }
  0x20   :  { %8201 = shalt.err (!%p8198_p1)
}
  0x21   :  { %s8210_s2 = smov 128   ;;  %s8211_s17 = smov 8  }
  0x22   :  { %40 = dma.hbm_to_vmem [thread:$0]  %s9615_s3, 6528, %s35_s8, [#allocation6], %s8210_s2, %s8210_s2, %s8211_s17  }
  0x23   :  { %8202 = dma.done.wait [#allocation4], 25344  }
  0x24   :  { %8203 = vsyncadd [#allocation4], 4294941952 }
  0x25   :  { %8204 = dma.done.wait [#allocation6], 6528  }
  0x26   :  { %8205 = vsyncadd [#allocation6], 4294960768  ;;  %v9618_v0 = vmov 0.0   ;;  %v48_v1 = vld [vmem:[#allocation3 + $0x8] sm:$0xff]  ;;  %v51_v2 = vld [vmem:[#allocation3 + $0x20] sm:$0xff]  ;;  %vm8214_vm0 = vmmov 0  }
  0x27   :  { %384 = vmatprep.mubr.f32.mxu0 %v9618_v0  ;;  %v47_v3 = vld [vmem:[#allocation3] sm:$0xff]  ;;  %v6341_v4 = vpack.c.bf16 %v51_v2, %v48_v1  ;;  %v50_v5 = vld [vmem:[#allocation3 + $0x18] sm:$0xff]  ;;  %v57_v7 = vld [vmem:[#allocation3 + $0x50] sm:$0xff] }
  0x28   :  { %v54_v6 = vld [vmem:[#allocation3 + $0x38] sm:$0xff]  ;;  %v6343_v8 = vpack.c.bf16 %v50_v5, %v47_v3  ;;  %v53_v10 = vld [vmem:[#allocation3 + $0x30] sm:$0xff]  ;;  %v56_v11 = vld [vmem:[#allocation3 + $0x48] sm:$0xff] }
  0x29   :  { %v6345_v9 = vpack.c.bf16 %v57_v7, %v54_v6  ;;  %v60_v12 = vld [vmem:[#allocation3 + $0x68] sm:$0xff]  ;;  %6342 = vmatprep.subr.bf16.mxu0 %v6341_v4  ;;  %v63_v13 = vld [vmem:[#allocation3 + $0x80] sm:$0xff]  ;;  %v6347_v14 = vpack.c.bf16 %v56_v11, %v53_v10  ;;  %v62_v17 = vld [vmem:[#allocation3 + $0x78] sm:$0xff] }
  0x2a   :  { %6344 = vmatpush1.bf16.msra.mxu0 %v6343_v8  ;;  %v6349_v15 = vpack.c.bf16 %v63_v13, %v60_v12  ;;  %v59_v16 = vld [vmem:[#allocation3 + $0x60] sm:$0xff]  ;;  %v66_v18 = vld [vmem:[#allocation3 + $0x98] sm:$0xff]  ;;  %v69_v19 = vld [vmem:[#allocation3 + $0xb0] sm:$0xff] }
  0x2b   :  { %6346 = vmatprep.subr.bf16.mxu0 %v6345_v9  ;;  %v6351_v20 = vpack.c.bf16 %v62_v17, %v59_v16  ;;  %v65_v21 = vld [vmem:[#allocation3 + $0x90] sm:$0xff]  ;;  %v6353_v22 = vpack.c.bf16 %v69_v19, %v66_v18  ;;  %v68_v23 = vld [vmem:[#allocation3 + $0xa8] sm:$0xff]  ;;  %v75_v27 = vld [vmem:[#allocation3 + $0xe0] sm:$0xff] }
  0x2c   :  { %v49_v24 = vld [vmem:[#allocation3 + $0x10] sm:$0xff]  ;;  %v52_v25 = vld [vmem:[#allocation3 + $0x28] sm:$0xff]  ;;  %v55_v29 = vld [vmem:[#allocation3 + $0x40] sm:$0xff]  ;;  %v6355_v31 = vpack.c.bf16 %v68_v23, %v65_v21 }
  0x2d   :  { %v72_v26 = vld [vmem:[#allocation3 + $0xc8] sm:$0xff]  ;;  %v6373_v28 = vpack.c.bf16 %v52_v25, %v49_v24  ;;  %v58_v30 = vld [vmem:[#allocation3 + $0x58] sm:$0xff]  ;;  %v71_v32 = vld [vmem:[#allocation3 + $0xc0] sm:$0xff] }
  0x2e   :  { %6348 = vmatpush1.bf16.msra.mxu0 %v6347_v14  ;;  %v6377_v33 = vpack.c.bf16 %v58_v30, %v55_v29  ;;  %v6357_v34 = vpack.c.bf16 %v75_v27, %v72_v26  ;;  %v74_v35 = vld [vmem:[#allocation3 + $0xd8] sm:$0xff]  ;;  %v8273_v36 = vld [vmem:[%s9612_s0] sm:$0xff]  ;;  %v61_v37 = vld [vmem:[#allocation3 + $0x70] sm:$0xff] }
  0x2f   :  { %6350 = vmatprep.subr.bf16.mxu0 %v6349_v15  ;;  %6374 = vmatprep.subr.bf16.mxu1 %v6373_v28  ;;  %v78_v38 = vld [vmem:[#allocation3 + $0xf8] sm:$0xff]  ;;  %v81_v39 = vld [vmem:[#allocation3 + $0x110] sm:$0xff]  ;;  %v64_v40 = vld [vmem:[#allocation3 + $0x88] sm:$0xff]  ;;  %v6359_v42 = vpack.c.bf16 %v74_v35, %v71_v32 }
  0x30   :  { %6376 = vmatpush3.bf16.msra.mxu1 %v6373_v28  ;;  %5357 = vmatprep.mubr.f32.mxu1 %v8273_v36  ;;  %v6381_v41 = vpack.c.bf16 %v64_v40, %v61_v37  ;;  %v67_v43 = vld [vmem:[#allocation3 + $0xa0] sm:$0xff]  ;;  %v70_v44 = vld [vmem:[#allocation3 + $0xb8] sm:$0xff]  ;;  %v6361_v45 = vpack.c.bf16 %v81_v39, %v78_v38  ;;  %v77_v46 = vld [vmem:[#allocation3 + $0xf0] sm:$0xff]  ;;  %v9684_v40 = vmov 0.0|0.0  }
  0x31   :  { %6378 = vmatprep.subr.bf16.mxu1 %v6377_v33  ;;  %v80_v47 = vld [vmem:[#allocation3 + $0x108] sm:$0xff]  ;;  %v87_v49 = vld [vmem:[#allocation3 + $0x140] sm:$0xff]  ;;  %v6385_v50 = vpack.c.bf16 %v70_v44, %v67_v43  ;;  %v73_v51 = vld [vmem:[#allocation3 + $0xd0] sm:$0xff] }
  0x32   :  { %6352 = vmatpush1.bf16.msra.mxu0 %v6351_v20  ;;  %v84_v48 = vld [vmem:[#allocation3 + $0x128] sm:$0xff]  ;;  %v6363_v53 = vpack.c.bf16 %v80_v47, %v77_v46  ;;  %v83_v55 = vld [vmem:[#allocation3 + $0x120] sm:$0xff]  ;;  %v86_v56 = vld [vmem:[#allocation3 + $0x138] sm:$0xff] }
  0x33   :  { %6354 = vmatprep.subr.bf16.mxu0 %v6353_v22  ;;  %v76_v52 = vld [vmem:[#allocation3 + $0xe8] sm:$0xff]  ;;  %v6365_v54 = vpack.c.bf16 %v87_v49, %v84_v48  ;;  %v90_v57 = vld [vmem:[#allocation3 + $0x158] sm:$0xff]  ;;  %v93_v58 = vld [vmem:[#allocation3 + $0x170] sm:$0xff]  ;;  %v6367_v62 = vpack.c.bf16 %v86_v56, %v83_v55 }
  0x34   :  { %6380 = vmatpush3.bf16.msra.mxu1 %v6377_v33  ;;  %v6389_v59 = vpack.c.bf16 %v76_v52, %v73_v51  ;;  %v79_v60 = vld [vmem:[#allocation3 + $0x100] sm:$0xff]  ;;  %v82_v61 = vld [vmem:[#allocation3 + $0x118] sm:$0xff]  ;;  %v6369_v63 = vpack.c.bf16 %v93_v58, %v90_v57  ;;  %v89_v1 = vld [vmem:[#allocation3 + $0x150] sm:$0xff] }
  0x35   :  { %6382 = vmatprep.subr.bf16.mxu1 %v6381_v41  ;;  %v92_v2 = vld [vmem:[#allocation3 + $0x168] sm:$0xff]  ;;  %v99_v4 = vld [vmem:[#allocation3 + $0x1a0] sm:$0xff]  ;;  %v6393_v5 = vpack.c.bf16 %v82_v61, %v79_v60  ;;  %v85_v6 = vld [vmem:[#allocation3 + $0x130] sm:$0xff] }
  0x36   :  { %6356 = vmatpush1.bf16.msra.mxu0 %v6355_v31  ;;  %v96_v3 = vld [vmem:[#allocation3 + $0x188] sm:$0xff]  ;;  %v6371_v8 = vpack.c.bf16 %v92_v2, %v89_v1  ;;  %v95_v10 = vld [vmem:[#allocation3 + $0x180] sm:$0xff]  ;;  %v98_v11 = vld [vmem:[#allocation3 + $0x198] sm:$0xff] }
  0x37   :  { %6358 = vmatprep.subr.bf16.mxu0 %v6357_v34  ;;  %v88_v7 = vld [vmem:[#allocation3 + $0x148] sm:$0xff]  ;;  %v8276_v9 = vpack.c.bf16 %v99_v4, %v96_v3  ;;  %v102_v12 = vld [vmem:[#allocation3 + $0x1b8] sm:$0xff]  ;;  %v105_v13 = vld [vmem:[#allocation3 + $0x1d0] sm:$0xff]  ;;  %v8278_v17 = vpack.c.bf16 %v98_v11, %v95_v10 }
  0x38   :  { %6384 = vmatpush3.bf16.msra.mxu1 %v6381_v41  ;;  %v6397_v14 = vpack.c.bf16 %v88_v7, %v85_v6  ;;  %v91_v15 = vld [vmem:[#allocation3 + $0x160] sm:$0xff]  ;;  %v94_v16 = vld [vmem:[#allocation3 + $0x178] sm:$0xff]  ;;  %v8281_v18 = vpack.c.bf16 %v105_v13, %v102_v12  ;;  %v101_v19 = vld [vmem:[#allocation3 + $0x1b0] sm:$0xff] }
  0x39   :  { %6386 = vmatprep.subr.bf16.mxu1 %v6385_v50  ;;  %9756 = vst [vmem:[#allocation9_spill] sm:$0xff] %v8276_v9  ;;  %9757 = vst [vmem:[#allocation10_spill] sm:$0xff] %v8278_v17  ;;  %v104_v20 = vld [vmem:[#allocation3 + $0x1c8] sm:$0xff]  ;;  %v111_v22 = vld [vmem:[#allocation3 + $0x200] sm:$0xff]  ;;  %v6401_v23 = vpack.c.bf16 %v94_v16, %v91_v15 }
  0x3a   :  { %6360 = vmatpush1.bf16.msra.mxu0 %v6359_v42  ;;  %9758 = vst [vmem:[#allocation11_spill] sm:$0xff] %v8281_v18  ;;  %v108_v21 = vld [vmem:[#allocation3 + $0x1e8] sm:$0xff]  ;;  %v8289_v25 = vpack.c.bf16 %v104_v20, %v101_v19  ;;  %v107_v27 = vld [vmem:[#allocation3 + $0x1e0] sm:$0xff]  ;;  %v110_v28 = vld [vmem:[#allocation3 + $0x1f8] sm:$0xff] }
  0x3b   :  { %6362 = vmatprep.subr.bf16.mxu0 %v6361_v45  ;;  %v295_v24 = vld [vmem:[%s9612_s0 + $0x8] sm:$0xff]  ;;  %v8292_v26 = vpack.c.bf16 %v111_v22, %v108_v21  ;;  %v114_v29 = vld [vmem:[#allocation3 + $0x218] sm:$0xff]  ;;  %v117_v30 = vld [vmem:[#allocation3 + $0x230] sm:$0xff]  ;;  %v8299_v34 = vpack.c.bf16 %v110_v28, %v107_v27 }
  0x3c   :  { %6388 = vmatpush3.bf16.msra.mxu1 %v6385_v50  ;;  %9759 = vst [vmem:[#allocation12_spill] sm:$0xff] %v8289_v25  ;;  %v97_v31 = vld [vmem:[#allocation3 + $0x190] sm:$0xff]  ;;  %v100_v32 = vld [vmem:[#allocation3 + $0x1a8] sm:$0xff]  ;;  %v8302_v35 = vpack.c.bf16 %v117_v30, %v114_v29  ;;  %v123_v39 = vld [vmem:[#allocation3 + $0x260] sm:$0xff] }
  0x3d   :  { %6390 = vmatprep.subr.bf16.mxu1 %v6389_v59  ;;  %9760 = vst [vmem:[#allocation13_spill] sm:$0xff] %v8292_v26  ;;  %v296_v33 = vld [vmem:[%s9612_s0 + $0x10] sm:$0xff]  ;;  %9761 = vst [vmem:[#allocation14_spill] sm:$0xff] %v8299_v34  ;;  %v116_v37 = vld [vmem:[#allocation3 + $0x228] sm:$0xff]  ;;  %v8305_v41 = vpack.c.bf16 %v100_v32, %v97_v31 }
  0x3e   :  { %6364 = vmatpush1.bf16.msra.mxu0 %v6363_v53  ;;  %9762 = vst [vmem:[#allocation15_spill] sm:$0xff] %v8302_v35  ;;  %v120_v38 = vld [vmem:[#allocation3 + $0x248] sm:$0xff]  ;;  %v103_v42 = vld [vmem:[#allocation3 + $0x1c0] sm:$0xff]  ;;  %v106_v43 = vld [vmem:[#allocation3 + $0x1d8] sm:$0xff] }
  0x3f   :  { %6366 = vmatprep.subr.bf16.mxu0 %v6365_v54  ;;  %9763 = vst [vmem:[#allocation16_spill] sm:$0xff] %v8305_v41  ;;  %v297_v44 = vld [vmem:[%s9612_s0 + $0x18] sm:$0xff]  ;;  %v8315_v46 = vpack.c.bf16 %v123_v39, %v120_v38  ;;  %v119_v47 = vld [vmem:[#allocation3 + $0x240] sm:$0xff]  ;;  %v129_v50 = vld [vmem:[#allocation3 + $0x290] sm:$0xff]  ;;  %v8318_v51 = vpack.c.bf16 %v106_v43, %v103_v42  ;;  %v146_v39 = vlaneseq }
  0x40   :  { %6392 = vmatpush3.bf16.msra.mxu1 %v6389_v59  ;;  %v122_v48 = vld [vmem:[#allocation3 + $0x258] sm:$0xff]  ;;  %v109_v52 = vld [vmem:[#allocation3 + $0x1f0] sm:$0xff]  ;;  %v112_v53 = vld [vmem:[#allocation3 + $0x208] sm:$0xff] }
  0x41   :  { %6394 = vmatprep.subr.bf16.mxu1 %v6393_v5  ;;  %9765 = vst [vmem:[#allocation18_spill] sm:$0xff] %v8315_v46  ;;  %v126_v49 = vld [vmem:[#allocation3 + $0x278] sm:$0xff]  ;;  %9766 = vst [vmem:[#allocation19_spill] sm:$0xff] %v8318_v51  ;;  %v298_v54 = vld [vmem:[%s9612_s0 + $0x20] sm:$0xff]  ;;  %v8326_v55 = vpack.c.bf16 %v122_v48, %v119_v47  ;;  %v8332_v61 = vpack.c.bf16 %v112_v53, %v109_v52  ;;  %v147_v42 = vshrl.u32 %v146_v39, 7 }
  0x42   :  { %6368 = vmatpush1.bf16.msra.mxu0 %v6367_v62  ;;  %v8329_v56 = vpack.c.bf16 %v129_v50, %v126_v49  ;;  %v125_v57 = vld [vmem:[#allocation3 + $0x270] sm:$0xff]  ;;  %v128_v58 = vld [vmem:[#allocation3 + $0x288] sm:$0xff]  ;;  %v135_v60 = vld [vmem:[#allocation3 + $0x2c0] sm:$0xff] }
  0x43   :  { %6370 = vmatprep.subr.bf16.mxu0 %v6369_v63  ;;  %9767 = vst [vmem:[#allocation20_spill] sm:$0xff] %v8326_v55  ;;  %v132_v59 = vld [vmem:[#allocation3 + $0x2a8] sm:$0xff]  ;;  %9769 = vst [vmem:[#allocation22_spill] sm:$0xff] %v8332_v61  ;;  %v115_v62 = vld [vmem:[#allocation3 + $0x220] sm:$0xff]  ;;  %v8340_v2 = vpack.c.bf16 %v128_v58, %v125_v57  ;;  %v8434_v43 = vsub.s32 2, %v147_v42 }
  0x44   :  { %6396 = vmatpush3.bf16.msra.mxu1 %v6393_v5  ;;  %9768 = vst [vmem:[#allocation21_spill] sm:$0xff] %v8329_v56  ;;  %v118_v63 = vld [vmem:[#allocation3 + $0x238] sm:$0xff]  ;;  %v299_v1 = vld [vmem:[%s9612_s0 + $0x28] sm:$0xff]  ;;  %v300_v3 = vld [vmem:[%s9612_s0 + $0x30] sm:$0xff]  ;;  %v8346_v4 = vpack.c.bf16 %v135_v60, %v132_v59 }
  0x45   :  { %6398 = vmatprep.subr.bf16.mxu1 %v6397_v14  ;;  %9770 = vst [vmem:[#allocation23_spill] sm:$0xff] %v8340_v2  ;;  %v131_v5 = vld [vmem:[#allocation3 + $0x2a0] sm:$0xff]  ;;  %v134_v6 = vld [vmem:[#allocation3 + $0x2b8] sm:$0xff]  ;;  %v8349_v10 = vpack.c.bf16 %v118_v63, %v115_v62  ;;  %v121_v11 = vld [vmem:[#allocation3 + $0x250] sm:$0xff]  ;;  %v8447_v63 = vsub.s32 0, %v147_v42 }
  0x46   :  { %6372 = vmatpush1.bf16.msra.mxu0 %v6371_v8  ;;  %9771 = vst [vmem:[#allocation24_spill] sm:$0xff] %v8346_v4  ;;  %v138_v7 = vld [vmem:[#allocation3 + $0x2d8] sm:$0xff]  ;;  %v141_v8 = vld [vmem:[#allocation3 + $0x2f0] sm:$0xff]  ;;  %v124_v12 = vld [vmem:[#allocation3 + $0x268] sm:$0xff]  ;;  %v8354_v13 = vpack.c.bf16 %v134_v6, %v131_v5 }
  0x47   :  { %6406 = vmatprep.subr.bf16.mxu0 %v8276_v9  ;;  %9772 = vst [vmem:[#allocation25_spill] sm:$0xff] %v8349_v10  ;;  %v8360_v15 = vpack.c.bf16 %v141_v8, %v138_v7  ;;  %v137_v16 = vld [vmem:[#allocation3 + $0x2d0] sm:$0xff]  ;;  %v140_v19 = vld [vmem:[#allocation3 + $0x2e8] sm:$0xff]  ;;  %v8363_v20 = vpack.c.bf16 %v124_v12, %v121_v11  ;;  %v127_v21 = vld [vmem:[#allocation3 + $0x280] sm:$0xff] }
  0x48   :  { %6400 = vmatpush3.bf16.msra.mxu1 %v6397_v14  ;;  %9773 = vst [vmem:[#allocation26_spill] sm:$0xff] %v8354_v13  ;;  %v301_v14 = vld [vmem:[%s9612_s0 + $0x38] sm:$0xff]  ;;  %v133_v27 = vld [vmem:[#allocation3 + $0x2b0] sm:$0xff]  ;;  %v136_v28 = vld [vmem:[#allocation3 + $0x2c8] sm:$0xff] }
  0x49   :  { %385 = vmatmul.mubr.f32.vlgmr.msra.gmra.mrb[0].mxu0 %v8273_v36  ;;  %6402 = vmatprep.subr.bf16.mxu1 %v6401_v23  ;;  %v113_v36 = vld [vmem:[#allocation3 + $0x210] sm:$0xff]  ;;  %9774 = vst [vmem:[#allocation27_spill] sm:$0xff] %v8360_v15  ;;  %9775 = vst [vmem:[#allocation28_spill] sm:$0xff] %v8363_v20  ;;  %v130_v22 = vld [vmem:[#allocation3 + $0x298] sm:$0xff]  ;;  %v8386_v30 = vpack.c.bf16 %v136_v28, %v133_v27 }
  0x4a   :  { %6408 = vmatpush1.bf16.msra.mxu0 %v8278_v17  ;;  %390 = vmatprep.mubr.f32.mxu0 %v9618_v0  ;;  %v8312_v45 = vpack.c.bf16 %v116_v37, %v113_v36  ;;  %v8382_v29 = vld [vmem:[%s9613_s1] sm:$0xff]  ;;  %v142_v32 = vld [vmem:[#allocation3 + $0x2f8] sm:$0xff]  ;;  %9781 = vst [vmem:[#allocation34_spill] sm:$0xff] %v8434_v43 }
  0x4b   :  { %6410 = vmatprep.subr.bf16.mxu0 %v8281_v18  ;;  %9778 = vst [vmem:[#allocation31_spill] sm:$0xff] %v8386_v30  ;;  %v139_v31 = vld [vmem:[#allocation3 + $0x2e0] sm:$0xff]  ;;  %v166_v37 = vld [vmem:[#allocation3 + $0x338] sm:$0xff] }
  0x4c   :  { %6404 = vmatpush3.bf16.msra.mxu1 %v6401_v23  ;;  %9764 = vst [vmem:[#allocation17_spill] sm:$0xff] %v8312_v45  ;;  %v8370_v23 = vpack.c.bf16 %v140_v19, %v137_v16  ;;  %v163_v36 = vld [vmem:[#allocation3 + $0x320] sm:$0xff] }
  0x4d   :  { %391 = vmatmul.mubr.f32.gmra.mrb[2].mxu0 %v295_v24  ;;  %6437 = vmatprep.subr.bf16.mxu1 %v9684_v40  ;;  %v8431_v38 = vpack.c.bf16 %v166_v37, %v163_v36 }
  0x4e   :  { %6412 = vmatpush1.bf16.msra.mxu0 %v8289_v25  ;;  %396 = vmatprep.mubr.f32.mxu0 %v9618_v0  ;;  %9776 = vst [vmem:[#allocation29_spill] sm:$0xff] %v8370_v23 }
  0x4f   :  { %6414 = vmatprep.subr.bf16.mxu0 %v8292_v26  ;;  %5358 = vmatmul.mubr.f32.vlgmr.msra.gmra.mrb[0].mxu1 %v295_v24  ;;  %v8374_v24 = vpack.c.bf16 %v130_v22, %v127_v21  ;;  %9780 = vst [vmem:[#allocation33_spill] sm:$0xff] %v8431_v38 }
  0x50   :  { %6439 = vmatpush3.bf16.msra.mxu1 %v8305_v41  ;;  %5360 = vmatprep.mubr.f32.mxu1 %v296_v33 }
  0x51   :  { %397 = vmatmul.mubr.f32.gmra.mrb[4].mxu0 %v296_v33  ;;  %6440 = vmatprep.subr.bf16.mxu1 %v9684_v40  ;;  %9777 = vst [vmem:[#allocation30_spill] sm:$0xff] %v8374_v24  ;;  %v8394_v33 = vpack.c.bf16 %v142_v32, %v139_v31 }
  0x52   :  { %6416 = vmatpush1.bf16.msra.mxu0 %v8299_v34  ;;  %402 = vmatprep.mubr.f32.mxu0 %v9618_v0 }
  0x53   :  { %6418 = vmatprep.subr.bf16.mxu0 %v8302_v35  ;;  %5361 = vmatmul.mubr.f32.gmra.mrb[2].mxu1 %v297_v44  ;;  %9779 = vst [vmem:[#allocation32_spill] sm:$0xff] %v8394_v33 }
  0x54   :  { %6442 = vmatpush3.bf16.msra.mxu1 %v8318_v51  ;;  %5363 = vmatprep.mubr.f32.mxu1 %v298_v54 }
  0x55   :  { %403 = vmatmul.mubr.f32.gmra.mrb[6].mxu0 %v297_v44  ;;  %6443 = vmatprep.subr.bf16.mxu1 %v9684_v40  ;;  %v303_v44 = vld [vmem:[#allocation3 + $0x300] ss:$8 sm:$0x7] }
  0x56   :  { %6420 = vmatpush1.bf16.msra.mxu0 %v8312_v45  ;;  %408 = vmatprep.mubr.f32.mxu0 %v9618_v0  ;;  %v316_v47 = vrot.slane %v303_v44, %v8434_v43  ;;  %v308_v11 = vrot.slane %v303_v44, %v8447_v63 }
  0x57   :  { %6422 = vmatprep.subr.bf16.mxu0 %v8315_v46  ;;  %5364 = vmatmul.mubr.f32.gmra.mrb[4].mxu1 %v299_v1 }
  0x58   :  { %6445 = vmatpush3.bf16.msra.mxu1 %v8332_v61  ;;  %5366 = vmatprep.mubr.f32.mxu1 %v300_v3 }
  0x59   :  { %409 = vmatmul.mubr.f32.gmra.mrb[8].mxu0 %v298_v54  ;;  %6446 = vmatprep.subr.bf16.mxu1 %v9684_v40 }
  0x5a   :  { %6424 = vmatpush1.bf16.msra.mxu0 %v8326_v55  ;;  %414 = vmatprep.mubr.f32.mxu0 %v9618_v0 }
  0x5b   :  { %6426 = vmatprep.subr.bf16.mxu0 %v8329_v56  ;;  %5367 = vmatmul.mubr.f32.gmra.mrb[6].mxu1 %v301_v14 }
  0x5c   :  { %6448 = vmatpush3.bf16.msra.mxu1 %v8349_v10  ;;  %5401 = vmatprep.mubr.msk.f32.mxu1 %vm8214_vm0, %v9618_v0 }
  0x5d   :  { %415 = vmatmul.mubr.f32.gmra.mrb[10].mxu0 %v299_v1  ;;  %6449 = vmatprep.subr.bf16.mxu1 %v9684_v40  ;;  %v144_v1 = vld [vmem:[#allocation3 + $0x301] ss:$8 sm:$0x7] }
  0x5e   :  { %6428 = vmatpush1.bf16.msra.mxu0 %v8340_v2  ;;  %420 = vmatprep.mubr.f32.mxu0 %v9618_v0  ;;  %v149_v8 = vrot.slane %v144_v1, %v8447_v63 }
  0x5f   :  { %6430 = vmatprep.subr.bf16.mxu0 %v8346_v4 }
  0x60   :  { %6451 = vmatpush3.bf16.msra.mxu1 %v8363_v20  ;;  %v8455_v12 = vadd.f32 %v308_v11, %v149_v8 }
  0x61   :  { %421 = vmatmul.mubr.f32.gmra.mrb[12].mxu0 %v300_v3  ;;  %6452 = vmatprep.subr.bf16.mxu1 %v9684_v40 }
  0x62   :  { %6432 = vmatpush1.bf16.msra.mxu0 %v8354_v13  ;;  %426 = vmatprep.mubr.f32.mxu0 %v9618_v0 }
  0x63   :  { %6434 = vmatprep.subr.bf16.mxu0 %v8360_v15 }
  0x64   :  { %6454 = vmatpush3.bf16.msra.mxu1 %v8374_v24 }
  0x65   :  { %427 = vmatmul.mubr.f32.gmra.mrb[14].mxu0 %v301_v14  ;;  %6455 = vmatprep.subr.bf16.mxu1 %v9684_v40  ;;  %v8457_v14 = vsub.s32 1, %v147_v42 }
  0x66   :  { %6436 = vmatpush1.bf16.msra.mxu0 %v8370_v23  ;;  %605 = vmatprep.mubr.f32.mxu0 %v9618_v0 }
  0x67   :  { %6462 = vmatprep.subr.bf16.mxu0 %v8276_v9  ;;  %v153_v21 = vrot.slane %v144_v1, %v8457_v14  ;;  %v312_v22 = vrot.slane %v303_v44, %v8457_v14 }
  0x68   :  { %6457 = vmatpush3.bf16.msra.mxu1 %v8386_v30 }
  0x69   :  { %606 = vmatmul.mubr.f32.vlgmr.msra.gmra.mrb[0].mxu0 %v8382_v29  ;;  %6458 = vmatprep.subr.bf16.mxu1 %v9684_v40  ;;  %v8462_v31 = vadd.f32 %v312_v22, %v153_v21  ;;  %v165_v21 = vld [vmem:[#allocation3 + $0x330] sm:$0xff]  ;;  %v164_v22 = vld [vmem:[#allocation3 + $0x328] sm:$0xff] }
  0x6a   :  { %6464 = vmatpush1.bf16.msra.mxu0 %v8278_v17  ;;  %766 = vmatprep.mubr.f32.mxu0 %v9618_v0 }
  0x6b   :  { %6466 = vmatprep.subr.bf16.mxu0 %v8281_v18 }
  0x6c   :  { %6460 = vmatpush3.bf16.msra.mxu1 %v8394_v33 }
  0x6d   :  { %6493 = vmatprep.subr.bf16.mxu1 %v9684_v40 }
  0x6e   :  { %6468 = vmatpush1.bf16.msra.mxu0 %v8289_v25 }
  0x6f   :  { %6470 = vmatprep.subr.bf16.mxu0 %v8292_v26  ;;  %5402 = vmatmul.mubr.f32.vlgmr.msra.gmra.mrb[8].mxu1 %v8382_v29 }
  0x70   :  { %6495 = vmatpush3.bf16.msra.mxu1 %v8305_v41  ;;  %5436 = vmatprep.mubr.msk.f32.mxu1 %vm8214_vm0, %v9618_v0 }
  0x71   :  { %6496 = vmatprep.subr.bf16.mxu1 %v9684_v40 }
  0x72   :  { %6472 = vmatpush1.bf16.msra.mxu0 %v8299_v34 }
  0x73   :  { %6474 = vmatprep.subr.bf16.mxu0 %v8302_v35 }
  0x74   :  { %6498 = vmatpush3.bf16.msra.mxu1 %v8318_v51 }
  0x75   :  { %6499 = vmatprep.subr.bf16.mxu1 %v9684_v40 }
  0x76   :  { %6476 = vmatpush1.bf16.msra.mxu0 %v8312_v45 }
  0x77   :  { %6478 = vmatprep.subr.bf16.mxu0 %v8315_v46 }
  0x78   :  { %6501 = vmatpush3.bf16.msra.mxu1 %v8332_v61 }
  0x79   :  { %6502 = vmatprep.subr.bf16.mxu1 %v9684_v40 }
  0x7a   :  { %6480 = vmatpush1.bf16.msra.mxu0 %v8326_v55 }
  0x7b   :  { %6482 = vmatprep.subr.bf16.mxu0 %v8329_v56 }
  0x7c   :  { %6504 = vmatpush3.bf16.msra.mxu1 %v8349_v10 }
  0x7d   :  { %6505 = vmatprep.subr.bf16.mxu1 %v9684_v40 }
  0x7e   :  { %6484 = vmatpush1.bf16.msra.mxu0 %v8340_v2 }
  0x7f   :  { %6486 = vmatprep.subr.bf16.mxu0 %v8346_v4 }
  0x80   :  { %6507 = vmatpush3.bf16.msra.mxu1 %v8363_v20 }
  0x81   :  { %6508 = vmatprep.subr.bf16.mxu1 %v9684_v40 }
  0x82   :  { %6488 = vmatpush1.bf16.msra.mxu0 %v8354_v13 }
  0x83   :  { %6490 = vmatprep.subr.bf16.mxu0 %v8360_v15 }
  0x84   :  { %6510 = vmatpush3.bf16.msra.mxu1 %v8374_v24 }
  0x85   :  { %6511 = vmatprep.subr.bf16.mxu1 %v9684_v40 }
  0x86   :  { %6492 = vmatpush1.bf16.msra.mxu0 %v8370_v23 }
  0x87   :  { %6518 = vmatprep.subr.bf16.mxu0 %v8431_v38 }
  0x88   :  { %6513 = vmatpush3.bf16.msra.mxu1 %v8386_v30 }
  0x89   :  { %6514 = vmatprep.subr.bf16.mxu1 %v9684_v40 }
  0x8c   :  { %6516 = vmatpush3.bf16.msra.mxu1 %v8394_v33 }
  0x8d   :  { %6549 = vmatprep.subr.bf16.mxu1 %v9684_v40 }
 0x122   :  { %v5359_v48 = vpop.f32.mrb[0].mxu1 }
 0x123   :  { %v8437_v49 = vadd.f32 %v5359_v48, %v316_v47  ;;  %v499_v50 = vpop.f32.mrb[1].mxu1 }
 0x126   :  { %v5362_v52 = vpop.f32.mrb[2].mxu1 }
 0x127   :  { %v8439_v53 = vadd.f32 %v5362_v52, %v316_v47  ;;  %v509_v54 = vpop.f32.mrb[3].mxu1  ;;  %v8466_v52 = vrot.slane %v144_v1, %v8434_v43  ;;  %v169_v1 = vld [vmem:[#allocation3 + $0x350] sm:$0xff] }
 0x128   :  { %v8441_v57 = vadd.f32 %v509_v54, %v316_v47  ;;  %v209_v43 = vld [vmem:[#allocation3 + $0x490] sm:$0xff] }
 0x129   :  { %9782 = vst [vmem:[#allocation35_spill] sm:$0xff] %v8439_v53  ;;  %v205_v53 = vld [vmem:[#allocation3 + $0x470] sm:$0xff] }
 0x12a   :  { %9783 = vst [vmem:[#allocation36_spill] sm:$0xff] %v8441_v57  ;;  %v5365_v58 = vpop.f32.mrb[4].mxu1  ;;  %v208_v57 = vld [vmem:[#allocation3 + $0x488] sm:$0xff] }
 0x12b   :  { %v8443_v59 = vadd.f32 %v5365_v58, %v316_v47  ;;  %v519_v60 = vpop.f32.mrb[5].mxu1 }
 0x12c   :  { %v8445_v62 = vadd.f32 %v519_v60, %v316_v47  ;;  %v500_v60 = vadd.f32 %v499_v50, %v316_v47 }
 0x12d   :  { %9784 = vst [vmem:[#allocation37_spill] sm:$0xff] %v8443_v59  ;;  %v202_v59 = vld [vmem:[#allocation3 + $0x458] sm:$0xff] }
 0x12e   :  { %9785 = vst [vmem:[#allocation38_spill] sm:$0xff] %v8445_v62  ;;  %v5368_v3 = vpop.f32.mrb[6].mxu1  ;;  %v203_v62 = vld [vmem:[#allocation3 + $0x460] sm:$0xff] }
 0x12f   :  { %v8449_v5 = vadd.f32 %v5368_v3, %v316_v47  ;;  %v529_v6 = vpop.f32.mrb[7].mxu1 }
 0x130   :  { %v8451_v7 = vadd.f32 %v529_v6, %v316_v47  ;;  %v168_v47 = vld [vmem:[#allocation3 + $0x348] sm:$0xff] }
 0x131   :  { %9786 = vst [vmem:[#allocation39_spill] sm:$0xff] %v8449_v5  ;;  %v197_v5 = vld [vmem:[#allocation3 + $0x430] sm:$0xff] }
 0x132   :  { %9787 = vst [vmem:[#allocation40_spill] sm:$0xff] %v8451_v7  ;;  %v199_v7 = vld [vmem:[#allocation3 + $0x440] sm:$0xff] }
 0x13c   :  { %v607_v16 = vpop.f32.mrb[0].mxu0 }
 0x13d   :  { %v7862_v19 = vadd.f32 %v8455_v12, %v607_v16  ;;  %v609_v27 = vpop.f32.mrb[1].mxu0  ;;  %v162_v16 = vld [vmem:[#allocation3 + $0x318] sm:$0xff] }
 0x13e   :  { %v7864_v32 = vadd.f32 %v8462_v31, %v609_v27  ;;  %v167_v27 = vld [vmem:[#allocation3 + $0x340] sm:$0xff] }
 0x13f   :  { %v4785_v28 = vmul.f32 -1.442695, %v7862_v19 }
 0x140   :  { %v4786_v39 = vmul.f32 -1.442695, %v7864_v32  ;;  %v172_v32 = vld [vmem:[#allocation3 + $0x368] sm:$0xff] }
 0x141   :  { %7966 = vpow2.f32 %v4785_v28 }
 0x142   :  { %v678_v36 = vpop.f32.mrb[8].mxu1  ;;  %7968 = vpow2.f32 %v4786_v39  ;;  %v8472_v39 = vpack.c.bf16 %v167_v27, %v164_v22  ;;  %v184_v22 = vld [vmem:[#allocation3 + $0x3c8] sm:$0xff] }
 0x143   :  { %v5403_v37 = vpop.f32.mrb[9].mxu1  ;;  %v679_v54 = vadd.f32 %v678_v36, %v8466_v52  ;;  %v8470_v36 = vpack.c.bf16 %v165_v21, %v162_v16  ;;  %v176_v16 = vld [vmem:[#allocation3 + $0x388] sm:$0xff]  ;;  %v181_v21 = vld [vmem:[#allocation3 + $0x3b0] sm:$0xff] }
 0x14b   :  { %v7967_v48 = vpop.eup %7966 }
 0x14c   :  { %v686_v42 = vadd.f32 1.0, %v7967_v48  ;;  %v7969_v44 = vpop.eup %7968  ;;  %v8476_v48 = vpack.c.bf16 %v172_v32, %v169_v1  ;;  %v180_v1 = vld [vmem:[#allocation3 + $0x3a8] sm:$0xff]  ;;  %v8501_v32 = vpack.c.bf16 %v184_v22, %v181_v21  ;;  %v191_v21 = vld [vmem:[#allocation3 + $0x400] sm:$0xff]  ;;  %v193_v22 = vld [vmem:[#allocation3 + $0x410] sm:$0xff] }
 0x14d   :  { %v693_v6 = vadd.f32 1.0, %v7969_v44  ;;  %v173_v44 = vld [vmem:[#allocation3 + $0x370] sm:$0xff] }
 0x14e   :  { %7970 = vrcp.f32 %v686_v42  ;;  %v171_v42 = vld [vmem:[#allocation3 + $0x360] sm:$0xff] }
 0x158   :  { %v7971_v58 = vpop.eup %7970 }
 0x159   :  { %v696_v3 = vmul.f32 %v7971_v58, %v679_v54  ;;  %v170_v54 = vld [vmem:[#allocation3 + $0x358] sm:$0xff] }
 0x15a   :  { %v178_v58 = vld [vmem:[#allocation3 + $0x398] sm:$0xff] }
 0x15b   :  { %v697_v8 = vadd.f32 %v696_v3, %v500_v60  ;;  %v8482_v60 = vpack.c.bf16 %v171_v42, %v168_v47  ;;  %v8484_v3 = vpack.c.bf16 %v173_v44, %v170_v54  ;;  %v182_v47 = vld [vmem:[#allocation3 + $0x3b8] sm:$0xff]  ;;  %v185_v42 = vld [vmem:[#allocation3 + $0x3d0] sm:$0xff]  ;;  %v187_v54 = vld [vmem:[#allocation3 + $0x3e0] sm:$0xff] }
 0x15c   :  { %v190_v44 = vld [vmem:[#allocation3 + $0x3f8] sm:$0xff] }
 0x15d   :  { %7972 = vtanh.f32 %v697_v8 }
 0x15e   :  { %7974 = vrcp.f32 %v693_v6  ;;  %v174_v6 = vld [vmem:[#allocation3 + $0x378] sm:$0xff] }
 0x167   :  { %v7973_v11 = vpop.eup %7972 }
 0x168   :  { %v699_v19 = vsub.f32 %v8382_v29, %v7973_v11  ;;  %v7975_v28 = vpop.eup %7974  ;;  %v175_v29 = vld [vmem:[#allocation3 + $0x380] sm:$0xff] }
 0x169   :  { %v8488_v8 = vpack.c.bf16 %v178_v58, %v175_v29  ;;  %v8507_v58 = vpack.c.bf16 %v185_v42, %v182_v47  ;;  %v192_v47 = vld [vmem:[#allocation3 + $0x408] sm:$0xff] }
 0x16a   :  { %v700_v37 = vmul.f32 %v7975_v28, %v699_v19  ;;  %v179_v19 = vld [vmem:[#allocation3 + $0x3a0] sm:$0xff] }
 0x16b   :  { %v8497_v28 = vpack.c.bf16 %v179_v19, %v176_v16  ;;  %v189_v16 = vld [vmem:[#allocation3 + $0x3f0] sm:$0xff]  ;;  %v188_v19 = vld [vmem:[#allocation3 + $0x3e8] sm:$0xff] }
 0x16c   :  { %v8474_v50 = vadd.f32 %v7973_v11, %v700_v37  ;;  %v177_v11 = vld [vmem:[#allocation3 + $0x390] sm:$0xff]  ;;  %v183_v37 = vld [vmem:[#allocation3 + $0x3c0] sm:$0xff] }
 0x16d   :  { %v8495_v27 = vpack.c.bf16 %v177_v11, %v174_v6  ;;  %v8505_v29 = vpack.c.bf16 %v183_v37, %v180_v1  ;;  %v186_v6 = vld [vmem:[#allocation3 + $0x3d8] sm:$0xff]  ;;  %v8511_v11 = vpack.c.bf16 %v190_v44, %v187_v54  ;;  %v8517_v37 = vpack.c.bf16 %v191_v21, %v188_v19  ;;  %v195_v54 = vld [vmem:[#allocation3 + $0x420] sm:$0xff]  ;;  %v201_v21 = vld [vmem:[#allocation3 + $0x450] sm:$0xff] }
 0x16e   :  { %767 = vmatmul.mubr.f32.vlgmr.msra.gmra.mrb[2].mxu0 %v8474_v50  ;;  %5437 = vmatmul.mubr.f32.vlgmr.msra.gmra.mrb[10].mxu1 %v8474_v50  ;;  %v8515_v1 = vpack.c.bf16 %v189_v16, %v186_v6  ;;  %v194_v44 = vld [vmem:[#allocation3 + $0x418] sm:$0xff]  ;;  %v8525_v6 = vpack.c.bf16 %v195_v54, %v192_v47  ;;  %v204_v54 = vld [vmem:[#allocation3 + $0x468] sm:$0xff] }
 0x16f   :  { %6520 = vmatpush1.bf16.msra.mxu0 %v8470_v36  ;;  %6551 = vmatpush3.bf16.msra.mxu1 %v8472_v39  ;;  %9789 = vst [vmem:[#allocation42_spill] sm:$0xff] %v8517_v37  ;;  %v8527_v16 = vpack.c.bf16 %v197_v5, %v194_v44  ;;  %v198_v19 = vld [vmem:[#allocation3 + $0x438] sm:$0xff] }
 0x170   :  { %6522 = vmatprep.subr.bf16.mxu0 %v8476_v48  ;;  %6552 = vmatprep.subr.bf16.mxu1 %v9684_v40  ;;  %9788 = vst [vmem:[#allocation41_spill] sm:$0xff] %v8515_v1  ;;  %9791 = vst [vmem:[#allocation44_spill] sm:$0xff] %v8525_v6  ;;  %v8535_v47 = vpack.c.bf16 %v201_v21, %v198_v19  ;;  %v206_v44 = vld [vmem:[#allocation3 + $0x478] sm:$0xff] }
 0x171   :  { %927 = vmatprep.mubr.f32.mxu0 %v9618_v0  ;;  %5471 = vmatprep.mubr.msk.f32.mxu1 %vm8214_vm0, %v9618_v0  ;;  %v196_v0 = vld [vmem:[#allocation3 + $0x428] sm:$0xff]  ;;  %9792 = vst [vmem:[#allocation45_spill] sm:$0xff] %v8527_v16  ;;  %v210_v21 = vld [vmem:[#allocation3 + $0x498] sm:$0xff] }
 0x172   :  { %v8521_v42 = vpack.c.bf16 %v196_v0, %v193_v22  ;;  %v8531_v0 = vpack.c.bf16 %v202_v59, %v199_v7  ;;  %v200_v22 = vld [vmem:[#allocation3 + $0x448] sm:$0xff]  ;;  %9794 = vst [vmem:[#allocation47_spill] sm:$0xff] %v8535_v47  ;;  %v8541_v59 = vpack.c.bf16 %v208_v57, %v205_v53  ;;  %v207_v7 = vld [vmem:[#allocation3 + $0x480] sm:$0xff]  ;;  %v213_v57 = vld [vmem:[#allocation3 + $0x4b0] sm:$0xff] }
 0x173   :  { %6524 = vmatpush1.bf16.msra.mxu0 %v8482_v60  ;;  %6554 = vmatpush3.bf16.msra.mxu1 %v8484_v3  ;;  %v8537_v5 = vpack.c.bf16 %v203_v62, %v200_v22  ;;  %v8545_v19 = vpack.c.bf16 %v207_v7, %v204_v54  ;;  %v8547_v62 = vpack.c.bf16 %v209_v43, %v206_v44  ;;  %v212_v22 = vld [vmem:[#allocation3 + $0x4a8] sm:$0xff] }
 0x174   :  { %6526 = vmatprep.subr.bf16.mxu0 %v8488_v8  ;;  %6555 = vmatprep.subr.bf16.mxu1 %v9684_v40  ;;  %9790 = vst [vmem:[#allocation43_spill] sm:$0xff] %v8521_v42  ;;  %9793 = vst [vmem:[#allocation46_spill] sm:$0xff] %v8531_v0  ;;  %v8555_v54 = vpack.c.bf16 %v213_v57, %v210_v21  ;;  %v216_v43 = vld [vmem:[#allocation3 + $0x4c8] sm:$0xff]  ;;  %v225_v57 = vld [vmem:[#allocation3 + $0x510] sm:$0xff] }
 0x175   :  { %9795 = vst [vmem:[#allocation48_spill] sm:$0xff] %v8537_v5  ;;  %9796 = vst [vmem:[#allocation49_spill] sm:$0xff] %v8541_v59 }
 0x176   :  { %9797 = vst [vmem:[#allocation50_spill] sm:$0xff] %v8545_v19  ;;  %9798 = vst [vmem:[#allocation51_spill] sm:$0xff] %v8547_v62 }
 0x177   :  { %6528 = vmatpush1.bf16.msra.mxu0 %v8495_v27  ;;  %6557 = vmatpush3.bf16.msra.mxu1 %v8497_v28  ;;  %9800 = vst [vmem:[#allocation53_spill] sm:$0xff] %v8555_v54 }
 0x178   :  { %6530 = vmatprep.subr.bf16.mxu0 %v8501_v32  ;;  %6558 = vmatprep.subr.bf16.mxu1 %v9684_v40 }
 0x17b   :  { %6532 = vmatpush1.bf16.msra.mxu0 %v8505_v29  ;;  %6560 = vmatpush3.bf16.msra.mxu1 %v8507_v58 }
 0x17c   :  { %6534 = vmatprep.subr.bf16.mxu0 %v8511_v11  ;;  %6561 = vmatprep.subr.bf16.mxu1 %v9684_v40 }
 0x17f   :  { %6536 = vmatpush1.bf16.msra.mxu0 %v8515_v1  ;;  %6563 = vmatpush3.bf16.msra.mxu1 %v8517_v37  ;;  %v214_v37 = vld [vmem:[#allocation3 + $0x4b8] sm:$0xff]  ;;  %v9806_v1 = vmov 0.0  }
 0x180   :  { %6538 = vmatprep.subr.bf16.mxu0 %v8521_v42  ;;  %6564 = vmatprep.subr.bf16.mxu1 %v9684_v40  ;;  %v211_v42 = vld [vmem:[#allocation3 + $0x4a0] sm:$0xff] }
 0x181   :  { %v8551_v53 = vpack.c.bf16 %v214_v37, %v211_v42  ;;  %v219_v37 = vld [vmem:[#allocation3 + $0x4e0] sm:$0xff]  ;;  %v218_v42 = vld [vmem:[#allocation3 + $0x4d8] sm:$0xff] }
 0x182   :  { %v8566_v21 = vpack.c.bf16 %v219_v37, %v216_v43  ;;  %v228_v43 = vld [vmem:[#allocation3 + $0x528] sm:$0xff]  ;;  %v231_v37 = vld [vmem:[#allocation3 + $0x540] sm:$0xff] }
 0x183   :  { %6540 = vmatpush1.bf16.msra.mxu0 %v8525_v6  ;;  %6566 = vmatpush3.bf16.msra.mxu1 %v8527_v16  ;;  %9799 = vst [vmem:[#allocation52_spill] sm:$0xff] %v8551_v53  ;;  %v217_v16 = vld [vmem:[#allocation3 + $0x4d0] sm:$0xff]  ;;  %v220_v6 = vld [vmem:[#allocation3 + $0x4e8] sm:$0xff] }
 0x184   :  { %6542 = vmatprep.subr.bf16.mxu0 %v8531_v0  ;;  %6567 = vmatprep.subr.bf16.mxu1 %v9684_v40  ;;  %v215_v0 = vld [vmem:[#allocation3 + $0x4c0] sm:$0xff]  ;;  %v8560_v44 = vpack.c.bf16 %v220_v6, %v217_v16  ;;  %9803 = vst [vmem:[#allocation56_spill] sm:$0xff] %v8566_v21 }
 0x185   :  { %v8557_v7 = vpack.c.bf16 %v215_v0, %v212_v22  ;;  %v222_v0 = vld [vmem:[#allocation3 + $0x4f8] sm:$0xff]  ;;  %v224_v22 = vld [vmem:[#allocation3 + $0x508] sm:$0xff] }
 0x186   :  { %9802 = vst [vmem:[#allocation55_spill] sm:$0xff] %v8560_v44 }
 0x187   :  { %6544 = vmatpush1.bf16.msra.mxu0 %v8535_v47  ;;  %6569 = vmatpush3.bf16.msra.mxu1 %v8537_v5  ;;  %9801 = vst [vmem:[#allocation54_spill] sm:$0xff] %v8557_v7  ;;  %v223_v5 = vld [vmem:[#allocation3 + $0x500] sm:$0xff]  ;;  %v226_v47 = vld [vmem:[#allocation3 + $0x518] sm:$0xff] }
 0x188   :  { %6546 = vmatprep.subr.bf16.mxu0 %v8541_v59  ;;  %6570 = vmatprep.subr.bf16.mxu1 %v9684_v40  ;;  %v221_v59 = vld [vmem:[#allocation3 + $0x4f0] sm:$0xff]  ;;  %v8572_v16 = vpack.c.bf16 %v226_v47, %v223_v5 }
 0x189   :  { %v8569_v6 = vpack.c.bf16 %v221_v59, %v218_v42  ;;  %v8579_v59 = vpack.c.bf16 %v225_v57, %v222_v0  ;;  %v230_v42 = vld [vmem:[#allocation3 + $0x538] sm:$0xff]  ;;  %v8589_v0 = vpack.c.bf16 %v231_v37, %v228_v43  ;;  %v240_v37 = vld [vmem:[#allocation3 + $0x588] sm:$0xff] }
 0x18a   :  { %9805 = vst [vmem:[#allocation58_spill] sm:$0xff] %v8572_v16  ;;  %v234_v57 = vld [vmem:[#allocation3 + $0x558] sm:$0xff] }
 0x18b   :  { %6548 = vmatpush1.bf16.msra.mxu0 %v8545_v19  ;;  %6572 = vmatpush3.bf16.msra.mxu1 %v8547_v62  ;;  %9804 = vst [vmem:[#allocation57_spill] sm:$0xff] %v8569_v6  ;;  %v229_v62 = vld [vmem:[#allocation3 + $0x530] sm:$0xff]  ;;  %v232_v19 = vld [vmem:[#allocation3 + $0x548] sm:$0xff]  ;;  %9807 = vst [vmem:[#allocation59_spill] sm:$0xff] %v8579_v59 }
 0x18c   :  { %6574 = vmatprep.subr.bf16.mxu0 %v8551_v53  ;;  %6605 = vmatprep.subr.bf16.mxu1 %v9684_v40  ;;  %v227_v53 = vld [vmem:[#allocation3 + $0x520] sm:$0xff]  ;;  %v8585_v5 = vpack.c.bf16 %v232_v19, %v229_v62  ;;  %9810 = vst [vmem:[#allocation62_spill] sm:$0xff] %v8589_v0  ;;  %v237_v62 = vld [vmem:[#allocation3 + $0x570] sm:$0xff] }
 0x18d   :  { %v8582_v47 = vpack.c.bf16 %v227_v53, %v224_v22  ;;  %v236_v22 = vld [vmem:[#allocation3 + $0x568] sm:$0xff]  ;;  %v8599_v43 = vpack.c.bf16 %v237_v62, %v234_v57  ;;  %v246_v62 = vld [vmem:[#allocation3 + $0x5b8] sm:$0xff] }
 0x18e   :  { %928 = vmatmul.mubr.f32.vlgmr.msra.gmra.mrb[16].mxu0 %v8474_v50  ;;  %5472 = vmatmul.mubr.f32.vlgmr.msra.gmra.mrb[12].mxu1 %v8474_v50  ;;  %9809 = vst [vmem:[#allocation61_spill] sm:$0xff] %v8585_v5 }
 0x18f   :  { %6576 = vmatpush1.bf16.msra.mxu0 %v8555_v54  ;;  %6607 = vmatpush3.bf16.msra.mxu1 %v8557_v7  ;;  %9808 = vst [vmem:[#allocation60_spill] sm:$0xff] %v8582_v47  ;;  %v235_v7 = vld [vmem:[#allocation3 + $0x560] sm:$0xff]  ;;  %v238_v54 = vld [vmem:[#allocation3 + $0x578] sm:$0xff] }
 0x190   :  { %6578 = vmatprep.subr.bf16.mxu0 %v8560_v44  ;;  %6608 = vmatprep.subr.bf16.mxu1 %v9684_v40  ;;  %v233_v44 = vld [vmem:[#allocation3 + $0x550] sm:$0xff]  ;;  %v8595_v19 = vpack.c.bf16 %v238_v54, %v235_v7  ;;  %v243_v7 = vld [vmem:[#allocation3 + $0x5a0] sm:$0xff] }
 0x191   :  { %1068 = vmatprep.mubr.f32.mxu0 %v9806_v1  ;;  %5506 = vmatprep.mubr.msk.f32.mxu1 %vm8214_vm0, %v9806_v1  ;;  %v8592_v53 = vpack.c.bf16 %v233_v44, %v230_v42  ;;  %v242_v42 = vld [vmem:[#allocation3 + $0x598] sm:$0xff]  ;;  %v8609_v57 = vpack.c.bf16 %v243_v7, %v240_v37  ;;  %v252_v7 = vld [vmem:[#allocation3 + $0x5e8] sm:$0xff] }
 0x192   :  { %9812 = vst [vmem:[#allocation64_spill] sm:$0xff] %v8595_v19 }
 0x193   :  { %6580 = vmatpush1.bf16.msra.mxu0 %v8566_v21  ;;  %6610 = vmatpush3.bf16.msra.mxu1 %v8569_v6  ;;  %9811 = vst [vmem:[#allocation63_spill] sm:$0xff] %v8592_v53  ;;  %v241_v6 = vld [vmem:[#allocation3 + $0x590] sm:$0xff]  ;;  %v244_v21 = vld [vmem:[#allocation3 + $0x5a8] sm:$0xff]  ;;  %9815 = vst [vmem:[#allocation67_spill] sm:$0xff] %v8609_v57 }
 0x194   :  { %6582 = vmatprep.subr.bf16.mxu0 %v8572_v16  ;;  %6611 = vmatprep.subr.bf16.mxu1 %v9684_v40  ;;  %v239_v16 = vld [vmem:[#allocation3 + $0x580] sm:$0xff]  ;;  %v8605_v54 = vpack.c.bf16 %v244_v21, %v241_v6  ;;  %v249_v6 = vld [vmem:[#allocation3 + $0x5d0] sm:$0xff] }
 0x195   :  { %v8602_v44 = vpack.c.bf16 %v239_v16, %v236_v22  ;;  %v248_v22 = vld [vmem:[#allocation3 + $0x5c8] sm:$0xff]  ;;  %v8619_v37 = vpack.c.bf16 %v249_v6, %v246_v62 }
 0x196   :  { %9814 = vst [vmem:[#allocation66_spill] sm:$0xff] %v8605_v54 }
 0x197   :  { %6584 = vmatpush1.bf16.msra.mxu0 %v8579_v59  ;;  %6613 = vmatpush3.bf16.msra.mxu1 %v8582_v47  ;;  %9813 = vst [vmem:[#allocation65_spill] sm:$0xff] %v8602_v44  ;;  %v247_v47 = vld [vmem:[#allocation3 + $0x5c0] sm:$0xff]  ;;  %v250_v59 = vld [vmem:[#allocation3 + $0x5d8] sm:$0xff]  ;;  %9818 = vst [vmem:[#allocation70_spill] sm:$0xff] %v8619_v37 }
 0x198   :  { %6586 = vmatprep.subr.bf16.mxu0 %v8585_v5  ;;  %6614 = vmatprep.subr.bf16.mxu1 %v9684_v40  ;;  %v245_v5 = vld [vmem:[#allocation3 + $0x5b0] sm:$0xff]  ;;  %v8615_v21 = vpack.c.bf16 %v250_v59, %v247_v47  ;;  %v255_v47 = vld [vmem:[#allocation3 + $0x600] sm:$0xff] }
 0x199   :  { %v8612_v16 = vpack.c.bf16 %v245_v5, %v242_v42  ;;  %v254_v42 = vld [vmem:[#allocation3 + $0x5f8] sm:$0xff] }
 0x19a   :  { %9817 = vst [vmem:[#allocation69_spill] sm:$0xff] %v8615_v21 }
 0x19b   :  { %6588 = vmatpush1.bf16.msra.mxu0 %v8589_v0  ;;  %6616 = vmatpush3.bf16.msra.mxu1 %v8592_v53  ;;  %9816 = vst [vmem:[#allocation68_spill] sm:$0xff] %v8612_v16  ;;  %v253_v53 = vld [vmem:[#allocation3 + $0x5f0] sm:$0xff]  ;;  %v256_v0 = vld [vmem:[#allocation3 + $0x608] sm:$0xff] }
 0x19c   :  { %6590 = vmatprep.subr.bf16.mxu0 %v8595_v19  ;;  %6617 = vmatprep.subr.bf16.mxu1 %v9684_v40  ;;  %v251_v19 = vld [vmem:[#allocation3 + $0x5e0] sm:$0xff]  ;;  %v8625_v59 = vpack.c.bf16 %v256_v0, %v253_v53  ;;  %v8640_v0 = vld [vmem:[%s9613_s1 + $0x8] sm:$0xff] }
 0x19d   :  { %v8622_v5 = vpack.c.bf16 %v251_v19, %v248_v22 }
 0x19e   :  { %9820 = vst [vmem:[#allocation72_spill] sm:$0xff] %v8625_v59 }
 0x19f   :  { %6592 = vmatpush1.bf16.msra.mxu0 %v8599_v43  ;;  %6619 = vmatpush3.bf16.msra.mxu1 %v8602_v44  ;;  %9819 = vst [vmem:[#allocation71_spill] sm:$0xff] %v8622_v5  ;;  %v8629_v44 = vpack.c.bf16 %v255_v47, %v252_v7 }
 0x1a0   :  { %6594 = vmatprep.subr.bf16.mxu0 %v8605_v54  ;;  %6620 = vmatprep.subr.bf16.mxu1 %v9684_v40  ;;  %v257_v54 = vld [vmem:[#allocation3 + $0x610] sm:$0xff] }
 0x1a1   :  { %9821 = vst [vmem:[#allocation73_spill] sm:$0xff] %v8629_v44  ;;  %v8632_v62 = vpack.c.bf16 %v257_v54, %v254_v42 }
 0x1a3   :  { %6596 = vmatpush1.bf16.msra.mxu0 %v8609_v57  ;;  %6622 = vmatpush3.bf16.msra.mxu1 %v8612_v16  ;;  %9822 = vst [vmem:[#allocation74_spill] sm:$0xff] %v8632_v62 }
 0x1a4   :  { %6598 = vmatprep.subr.bf16.mxu0 %v8615_v21  ;;  %6623 = vmatprep.subr.bf16.mxu1 %v9684_v40 }
 0x1a7   :  { %6600 = vmatpush1.bf16.msra.mxu0 %v8619_v37  ;;  %6625 = vmatpush3.bf16.msra.mxu1 %v8622_v5 }
 0x1a8   :  { %6602 = vmatprep.subr.bf16.mxu0 %v8625_v59  ;;  %6626 = vmatprep.subr.bf16.mxu1 %v9684_v40 }
 0x1ab   :  { %6604 = vmatpush1.bf16.msra.mxu0 %v8629_v44  ;;  %6628 = vmatpush3.bf16.msra.mxu1 %v8632_v62 }
 0x1ac   :  { %6630 = vmatprep.subr.bf16.mxu0 %v8276_v9  ;;  %6661 = vmatprep.subr.bf16.mxu1 %v9684_v40 }
 0x1ae   :  { %1069 = vmatmul.mubr.f32.vlgmr.msra.gmra.mrb[16].mxu0 %v8640_v0  ;;  %5507 = vmatmul.mubr.f32.vlgmr.msra.gmra.mrb[14].mxu1 %v8640_v0 }
 0x1af   :  { %6632 = vmatpush1.bf16.msra.mxu0 %v8278_v17  ;;  %6663 = vmatpush3.bf16.msra.mxu1 %v8305_v41 }
 0x1b0   :  { %6634 = vmatprep.subr.bf16.mxu0 %v8281_v18  ;;  %6664 = vmatprep.subr.bf16.mxu1 %v9684_v40 }
 0x1b1   :  { %1230 = vmatprep.mubr.f32.mxu0 %v9806_v1  ;;  %5541 = vmatprep.mubr.msk.f32.mxu1 %vm8214_vm0, %v9806_v1 }
 0x1b3   :  { %6636 = vmatpush1.bf16.msra.mxu0 %v8289_v25  ;;  %6666 = vmatpush3.bf16.msra.mxu1 %v8318_v51 }
 0x1b4   :  { %6638 = vmatprep.subr.bf16.mxu0 %v8292_v26  ;;  %6667 = vmatprep.subr.bf16.mxu1 %v9684_v40 }
 0x1b7   :  { %6640 = vmatpush1.bf16.msra.mxu0 %v8299_v34  ;;  %6669 = vmatpush3.bf16.msra.mxu1 %v8332_v61 }
 0x1b8   :  { %6642 = vmatprep.subr.bf16.mxu0 %v8302_v35  ;;  %6670 = vmatprep.subr.bf16.mxu1 %v9684_v40 }
 0x1bb   :  { %6644 = vmatpush1.bf16.msra.mxu0 %v8312_v45  ;;  %6672 = vmatpush3.bf16.msra.mxu1 %v8349_v10 }
 0x1bc   :  { %6646 = vmatprep.subr.bf16.mxu0 %v8315_v46  ;;  %6673 = vmatprep.subr.bf16.mxu1 %v9684_v40 }
 0x1bf   :  { %6648 = vmatpush1.bf16.msra.mxu0 %v8326_v55  ;;  %6675 = vmatpush3.bf16.msra.mxu1 %v8363_v20 }
 0x1c0   :  { %6650 = vmatprep.subr.bf16.mxu0 %v8329_v56  ;;  %6676 = vmatprep.subr.bf16.mxu1 %v9684_v40 }
 0x1c3   :  { %6652 = vmatpush1.bf16.msra.mxu0 %v8340_v2  ;;  %6678 = vmatpush3.bf16.msra.mxu1 %v8374_v24 }
 0x1c4   :  { %6654 = vmatprep.subr.bf16.mxu0 %v8346_v4  ;;  %6679 = vmatprep.subr.bf16.mxu1 %v9684_v40 }
 0x1c7   :  { %6656 = vmatpush1.bf16.msra.mxu0 %v8354_v13  ;;  %6681 = vmatpush3.bf16.msra.mxu1 %v8386_v30 }
 0x1c8   :  { %6658 = vmatprep.subr.bf16.mxu0 %v8360_v15  ;;  %6682 = vmatprep.subr.bf16.mxu1 %v9684_v40 }
 0x1cb   :  { %6660 = vmatpush1.bf16.msra.mxu0 %v8370_v23  ;;  %6684 = vmatpush3.bf16.msra.mxu1 %v8394_v33 }
 0x1cc   :  { %6686 = vmatprep.subr.bf16.mxu0 %v8431_v38  ;;  %6717 = vmatprep.subr.bf16.mxu1 %v9684_v40 }
 0x241   :  { %v768_v53 = vpop.f32.mrb[2].mxu0  ;;  %v839_v19 = vpop.f32.mrb[10].mxu1 }
 0x242   :  { %v7866_v54 = vadd.f32 %v8455_v12, %v768_v53  ;;  %v770_v6 = vpop.f32.mrb[3].mxu0  ;;  %v5438_v22 = vpop.f32.mrb[11].mxu1  ;;  %v840_v38 = vadd.f32 %v839_v19, %v8466_v52 }
 0x243   :  { %v7868_v47 = vadd.f32 %v8462_v31, %v770_v6 }
 0x244   :  { %v4787_v7 = vmul.f32 -1.442695, %v7866_v54 }
 0x245   :  { %v4788_v42 = vmul.f32 -1.442695, %v7868_v47 }
 0x246   :  { %7976 = vpow2.f32 %v4787_v7 }
 0x247   :  { %7978 = vpow2.f32 %v4788_v42 }
 0x250   :  { %v7977_v15 = vpop.eup %7976 }
 0x251   :  { %v847_v30 = vadd.f32 1.0, %v7977_v15  ;;  %v7979_v33 = vpop.eup %7978 }
 0x252   :  { %v854_v4 = vadd.f32 1.0, %v7979_v33 }
 0x253   :  { %7980 = vrcp.f32 %v847_v30 }
 0x25d   :  { %v7981_v23 = vpop.eup %7980 }
 0x25e   :  { %v857_v40 = vmul.f32 %v7981_v23, %v840_v38 }
 0x260   :  { %v858_v13 = vadd.f32 %v857_v40, %v8437_v49  ;;  %v9823_v40 = vmov 0.0|0.0  }
 0x261   :  { %v8686_v53 = vpop.f32.mrb[12].mxu1 }
 0x262   :  { %7982 = vtanh.f32 %v858_v13  ;;  %v5473_v54 = vpop.f32.mrb[13].mxu1  ;;  %v259_v13 = vld [vmem:[#allocation3 + $0x618] ss:$8 sm:$0x7] }
 0x263   :  { %7984 = vrcp.f32 %v854_v4  ;;  %v261_v4 = vld [vmem:[#allocation3 + $0x619] ss:$8 sm:$0x7]  ;;  %v266_v23 = vrot.slane %v259_v13, %v8447_v63 }
 0x264   :  { %v282_v30 = vrot.slane %v261_v4, %v8447_v63  ;;  %v286_v19 = vrot.slane %v261_v4, %v8457_v14 }
 0x266   :  { %v8710_v33 = vadd.f32 %v282_v30, %v266_v23  ;;  %v9829_v30 = vld [vmem:[#allocation44_spill] sm:$0xff] }
 0x268   :  { %9824 = vst [vmem:[#allocation75_spill] sm:$0xff] %v8710_v33 }
 0x26c   :  { %v7983_v22 = vpop.eup %7982 }
 0x26d   :  { %v860_v6 = vsub.f32 %v8474_v50, %v7983_v22  ;;  %v7985_v7 = vpop.eup %7984  ;;  %v270_v50 = vrot.slane %v259_v13, %v8457_v14 }
 0x26f   :  { %v861_v15 = vmul.f32 %v7985_v7, %v860_v6  ;;  %v9825_v6 = vld [vmem:[#allocation41_spill] sm:$0xff]  ;;  %v9826_v7 = vld [vmem:[#allocation42_spill] sm:$0xff]  ;;  %v8723_v23 = vadd.f32 %v286_v19, %v270_v50 }
 0x271   :  { %v8689_v47 = vadd.f32 %v7983_v22, %v861_v15  ;;  %v9827_v15 = vld [vmem:[#allocation43_spill] sm:$0xff]  ;;  %9828 = vst [vmem:[#allocation41_spill] sm:$0xff] %v8723_v23 }
 0x273   :  { %1231 = vmatmul.mubr.f32.vlgmr.msra.gmra.mrb[4].mxu0 %v8689_v47  ;;  %5542 = vmatmul.mubr.f32.vlgmr.msra.gmra.mrb[16].mxu1 %v8689_v47 }
 0x274   :  { %6688 = vmatpush1.bf16.msra.mxu0 %v8470_v36  ;;  %6719 = vmatpush3.bf16.msra.mxu1 %v8472_v39 }
 0x275   :  { %6690 = vmatprep.subr.bf16.mxu0 %v8476_v48  ;;  %6720 = vmatprep.subr.bf16.mxu1 %v9823_v40 }
 0x276   :  { %1391 = vmatprep.mubr.f32.mxu0 %v9806_v1  ;;  %5576 = vmatprep.mubr.msk.f32.mxu1 %vm8214_vm0, %v9806_v1 }
 0x278   :  { %6692 = vmatpush1.bf16.msra.mxu0 %v8482_v60  ;;  %6722 = vmatpush3.bf16.msra.mxu1 %v8484_v3 }
 0x279   :  { %6694 = vmatprep.subr.bf16.mxu0 %v8488_v8  ;;  %6723 = vmatprep.subr.bf16.mxu1 %v9823_v40 }
 0x27c   :  { %6696 = vmatpush1.bf16.msra.mxu0 %v8495_v27  ;;  %6725 = vmatpush3.bf16.msra.mxu1 %v8497_v28 }
 0x27d   :  { %6698 = vmatprep.subr.bf16.mxu0 %v8501_v32  ;;  %6726 = vmatprep.subr.bf16.mxu1 %v9823_v40 }
 0x280   :  { %6700 = vmatpush1.bf16.msra.mxu0 %v8505_v29  ;;  %6728 = vmatpush3.bf16.msra.mxu1 %v8507_v58 }
 0x281   :  { %v1070_v38 = vpop.f32.mrb[16].mxu0  ;;  %6702 = vmatprep.subr.bf16.mxu0 %v8511_v11  ;;  %6729 = vmatprep.subr.bf16.mxu1 %v9823_v40  ;;  %v1141_v49 = vpop.f32.mrb[14].mxu1 }
 0x282   :  { %v7894_v63 = vadd.f32 %v8710_v33, %v1070_v38  ;;  %v1072_v42 = vpop.f32.mrb[17].mxu0  ;;  %v5508_v54 = vpop.f32.mrb[15].mxu1  ;;  %v9830_v38 = vld [vmem:[#allocation45_spill] sm:$0xff]  ;;  %v9831_v33 = vld [vmem:[#allocation46_spill] sm:$0xff] }
 0x283   :  { %v7896_v14 = vadd.f32 %v8723_v23, %v1072_v42  ;;  %v9833_v54 = vld [vmem:[#allocation48_spill] sm:$0xff]  ;;  %v9838_v42 = vld [vmem:[#allocation53_spill] sm:$0xff] }
 0x284   :  { %v4789_v22 = vmul.f32 -1.442695, %v7894_v63  ;;  %6704 = vmatpush1.bf16.msra.mxu0 %v9825_v6  ;;  %6731 = vmatpush3.bf16.msra.mxu1 %v9826_v7  ;;  %v9832_v63 = vld [vmem:[#allocation47_spill] sm:$0xff] }
 0x285   :  { %6706 = vmatprep.subr.bf16.mxu0 %v9827_v15  ;;  %6732 = vmatprep.subr.bf16.mxu1 %v9823_v40  ;;  %v9834_v15 = vld [vmem:[#allocation49_spill] sm:$0xff]  ;;  %v4790_v50 = vmul.f32 -1.442695, %v7896_v14  ;;  %v9840_v14 = vld [vmem:[#allocation55_spill] sm:$0xff] }
 0x286   :  { %7986 = vpow2.f32 %v4789_v22  ;;  %v9835_v22 = vld [vmem:[#allocation50_spill] sm:$0xff] }
 0x287   :  { %7988 = vpow2.f32 %v4790_v50  ;;  %v9843_v50 = vld [vmem:[#allocation57_spill] sm:$0xff] }
 0x288   :  { %6708 = vmatpush1.bf16.msra.mxu0 %v9829_v30  ;;  %6734 = vmatpush3.bf16.msra.mxu1 %v9830_v38  ;;  %v9836_v30 = vld [vmem:[#allocation51_spill] sm:$0xff] }
 0x289   :  { %6710 = vmatprep.subr.bf16.mxu0 %v9831_v33  ;;  %6735 = vmatprep.subr.bf16.mxu1 %v9823_v40  ;;  %v9837_v33 = vld [vmem:[#allocation52_spill] sm:$0xff] }
 0x28c   :  { %6712 = vmatpush1.bf16.msra.mxu0 %v9832_v63  ;;  %6737 = vmatpush3.bf16.msra.mxu1 %v9833_v54  ;;  %v9847_v63 = vld [vmem:[#allocation61_spill] sm:$0xff] }
 0x28d   :  { %6714 = vmatprep.subr.bf16.mxu0 %v9834_v15  ;;  %6738 = vmatprep.subr.bf16.mxu1 %v9823_v40  ;;  %v9839_v15 = vld [vmem:[#allocation54_spill] sm:$0xff] }
 0x290   :  { %v7987_v19 = vpop.eup %7986  ;;  %6716 = vmatpush1.bf16.msra.mxu0 %v9835_v22  ;;  %6740 = vmatpush3.bf16.msra.mxu1 %v9836_v30  ;;  %v9841_v30 = vld [vmem:[#allocation34_spill] sm:$0xff]  ;;  %v9846_v22 = vld [vmem:[#allocation60_spill] sm:$0xff] }
 0x291   :  { %v1149_v38 = vadd.f32 1.0, %v7987_v19  ;;  %6742 = vmatprep.subr.bf16.mxu0 %v9837_v33  ;;  %6773 = vmatprep.subr.bf16.mxu1 %v9823_v40  ;;  %v8745_v19 = vrot.slane %v261_v4, %v9841_v30  ;;  %v9844_v33 = vld [vmem:[#allocation58_spill] sm:$0xff]  ;;  %v7989_v4 = vpop.eup %7988 }
 0x293   :  { %7990 = vrcp.f32 %v1149_v38  ;;  %1392 = vmatmul.mubr.f32.vlgmr.msra.gmra.mrb[18].mxu0 %v8689_v47  ;;  %5577 = vmatmul.mubr.f32.vlgmr.msra.gmra.mrb[18].mxu1 %v8689_v47  ;;  %v9842_v38 = vld [vmem:[#allocation56_spill] sm:$0xff] }
 0x294   :  { %6744 = vmatpush1.bf16.msra.mxu0 %v9838_v42  ;;  %6775 = vmatpush3.bf16.msra.mxu1 %v9839_v15  ;;  %v1142_v15 = vadd.f32 %v1141_v49, %v8745_v19  ;;  %v9845_v42 = vld [vmem:[#allocation59_spill] sm:$0xff]  ;;  %v9850_v49 = vld [vmem:[#allocation64_spill] sm:$0xff] }
 0x295   :  { %6746 = vmatprep.subr.bf16.mxu0 %v9840_v14  ;;  %6776 = vmatprep.subr.bf16.mxu1 %v9823_v40  ;;  %v8755_v14 = vrot.slane %v259_v13, %v9841_v30  ;;  %v9848_v13 = vld [vmem:[#allocation62_spill] sm:$0xff]  ;;  %v9849_v30 = vld [vmem:[#allocation63_spill] sm:$0xff] }
 0x296   :  { %1532 = vmatprep.mubr.f32.mxu0 %v9806_v1  ;;  %5611 = vmatprep.mubr.msk.f32.mxu1 %vm8214_vm0, %v9806_v1 }
 0x298   :  { %6748 = vmatpush1.bf16.msra.mxu0 %v9842_v38  ;;  %6778 = vmatpush3.bf16.msra.mxu1 %v9843_v50  ;;  %v1156_v38 = vadd.f32 1.0, %v7989_v4  ;;  %v9857_v4 = vld [vmem:[#allocation27_spill] sm:$0xff] }
 0x299   :  { %6750 = vmatprep.subr.bf16.mxu0 %v9844_v33  ;;  %6779 = vmatprep.subr.bf16.mxu1 %v9823_v40  ;;  %v1001_v33 = vadd.f32 %v8686_v53, %v8755_v14 }
 0x29c   :  { %6752 = vmatpush1.bf16.msra.mxu0 %v9845_v42  ;;  %6781 = vmatpush3.bf16.msra.mxu1 %v9846_v22  ;;  %v9852_v22 = vld [vmem:[#allocation66_spill] sm:$0xff] }
 0x29d   :  { %v7991_v54 = vpop.eup %7990  ;;  %6754 = vmatprep.subr.bf16.mxu0 %v9847_v63  ;;  %6782 = vmatprep.subr.bf16.mxu1 %v9823_v40  ;;  %v9851_v63 = vld [vmem:[#allocation65_spill] sm:$0xff] }
 0x29e   :  { %v1159_v50 = vmul.f32 %v7991_v54, %v1142_v15 }
 0x2a0   :  { %v1160_v23 = vadd.f32 %v1159_v50, %v1001_v33  ;;  %6756 = vmatpush1.bf16.msra.mxu0 %v9848_v13  ;;  %6784 = vmatpush3.bf16.msra.mxu1 %v9849_v30  ;;  %v9856_v50 = vld [vmem:[#allocation31_spill] sm:$0xff] }
 0x2a1   :  { %6758 = vmatprep.subr.bf16.mxu0 %v9850_v49  ;;  %6785 = vmatprep.subr.bf16.mxu1 %v9823_v40 }
 0x2a2   :  { %7992 = vtanh.f32 %v1160_v23 }
 0x2a3   :  { %7994 = vrcp.f32 %v1156_v38  ;;  %v9855_v38 = vld [vmem:[#allocation26_spill] sm:$0xff] }
 0x2a4   :  { %6760 = vmatpush1.bf16.msra.mxu0 %v8599_v43  ;;  %6787 = vmatpush3.bf16.msra.mxu1 %v9851_v63 }
 0x2a5   :  { %6762 = vmatprep.subr.bf16.mxu0 %v9852_v22  ;;  %6788 = vmatprep.subr.bf16.mxu1 %v9823_v40 }
 0x2a8   :  { %6764 = vmatpush1.bf16.msra.mxu0 %v8609_v57  ;;  %6790 = vmatpush3.bf16.msra.mxu1 %v8612_v16 }
 0x2a9   :  { %6766 = vmatprep.subr.bf16.mxu0 %v8615_v21  ;;  %6791 = vmatprep.subr.bf16.mxu1 %v9823_v40 }
 0x2ac   :  { %v7993_v53 = vpop.eup %7992  ;;  %6768 = vmatpush1.bf16.msra.mxu0 %v8619_v37  ;;  %6793 = vmatpush3.bf16.msra.mxu1 %v8622_v5 }
 0x2ad   :  { %6770 = vmatprep.subr.bf16.mxu0 %v8625_v59  ;;  %6794 = vmatprep.subr.bf16.mxu1 %v9823_v40  ;;  %v1162_v33 = vsub.f32 %v8640_v0, %v7993_v53  ;;  %v7995_v15 = vpop.eup %7994  ;;  %v9854_v0 = vld [vmem:[#allocation24_spill] sm:$0xff] }
 0x2af   :  { %v1163_v23 = vmul.f32 %v7995_v15, %v1162_v33  ;;  %v9859_v33 = vld [vmem:[#allocation32_spill] sm:$0xff]  ;;  %v9860_v15 = vld [vmem:[#allocation33_spill] sm:$0xff] }
 0x2b0   :  { %6772 = vmatpush1.bf16.msra.mxu0 %v8629_v44  ;;  %6796 = vmatpush3.bf16.msra.mxu1 %v8632_v62 }
 0x2b1   :  { %v8783_v54 = vadd.f32 %v7993_v53, %v1163_v23  ;;  %6798 = vmatprep.subr.bf16.mxu0 %v8276_v9  ;;  %6829 = vmatprep.subr.bf16.mxu1 %v9823_v40  ;;  %v9858_v53 = vld [vmem:[#allocation29_spill] sm:$0xff] }
 0x2b3   :  { %9853 = vst [vmem:[#allocation42_spill] sm:$0xff] %v8783_v54  ;;  %1533 = vmatmul.mubr.f32.vlgmr.msra.gmra.mrb[18].mxu0 %v8783_v54  ;;  %5612 = vmatmul.mubr.f32.vlgmr.msra.gmra.mrb[20].mxu1 %v8783_v54 }
 0x2b4   :  { %6800 = vmatpush1.bf16.msra.mxu0 %v8278_v17  ;;  %6831 = vmatpush3.bf16.msra.mxu1 %v8305_v41 }
 0x2b5   :  { %6802 = vmatprep.subr.bf16.mxu0 %v8281_v18  ;;  %6832 = vmatprep.subr.bf16.mxu1 %v9823_v40 }
 0x2b6   :  { %1694 = vmatprep.mubr.f32.mxu0 %v9806_v1  ;;  %5646 = vmatprep.mubr.msk.f32.mxu1 %vm8214_vm0, %v9806_v1 }
 0x2b8   :  { %6804 = vmatpush1.bf16.msra.mxu0 %v8289_v25  ;;  %6834 = vmatpush3.bf16.msra.mxu1 %v8318_v51 }
 0x2b9   :  { %6806 = vmatprep.subr.bf16.mxu0 %v8292_v26  ;;  %6835 = vmatprep.subr.bf16.mxu1 %v9823_v40 }
 0x2bc   :  { %6808 = vmatpush1.bf16.msra.mxu0 %v8299_v34  ;;  %6837 = vmatpush3.bf16.msra.mxu1 %v8332_v61 }
 0x2bd   :  { %6810 = vmatprep.subr.bf16.mxu0 %v8302_v35  ;;  %6838 = vmatprep.subr.bf16.mxu1 %v9823_v40 }
 0x2c0   :  { %6812 = vmatpush1.bf16.msra.mxu0 %v8312_v45  ;;  %6840 = vmatpush3.bf16.msra.mxu1 %v8349_v10  ;;  %v9861_v10 = vld [vmem:[#allocation36_spill] sm:$0xff] }
 0x2c1   :  { %6814 = vmatprep.subr.bf16.mxu0 %v8315_v46  ;;  %6841 = vmatprep.subr.bf16.mxu1 %v9823_v40 }
 0x2c4   :  { %6816 = vmatpush1.bf16.msra.mxu0 %v8326_v55  ;;  %6843 = vmatpush3.bf16.msra.mxu1 %v8363_v20 }
 0x2c5   :  { %6818 = vmatprep.subr.bf16.mxu0 %v8329_v56  ;;  %6844 = vmatprep.subr.bf16.mxu1 %v9823_v40 }
 0x2c8   :  { %6820 = vmatpush1.bf16.msra.mxu0 %v8340_v2  ;;  %6846 = vmatpush3.bf16.msra.mxu1 %v8374_v24 }
 0x2c9   :  { %6822 = vmatprep.subr.bf16.mxu0 %v9854_v0  ;;  %6847 = vmatprep.subr.bf16.mxu1 %v9823_v40 }
 0x2cc   :  { %6824 = vmatpush1.bf16.msra.mxu0 %v9855_v38  ;;  %6849 = vmatpush3.bf16.msra.mxu1 %v9856_v50 }
 0x2cd   :  { %6826 = vmatprep.subr.bf16.mxu0 %v9857_v4  ;;  %6850 = vmatprep.subr.bf16.mxu1 %v9823_v40 }
 0x2d0   :  { %6828 = vmatpush1.bf16.msra.mxu0 %v9858_v53  ;;  %6852 = vmatpush3.bf16.msra.mxu1 %v9859_v33 }
 0x2d1   :  { %6854 = vmatprep.subr.bf16.mxu0 %v9860_v15  ;;  %6885 = vmatprep.subr.bf16.mxu1 %v9823_v40 }
 0x346   :  { %v1232_v23 = vpop.f32.mrb[4].mxu0  ;;  %v1303_v0 = vpop.f32.mrb[16].mxu1 }
 0x347   :  { %v7870_v24 = vadd.f32 %v8455_v12, %v1232_v23  ;;  %v1234_v2 = vpop.f32.mrb[5].mxu0  ;;  %v5543_v38 = vpop.f32.mrb[17].mxu1  ;;  %v1304_v15 = vadd.f32 %v1303_v0, %v8466_v52 }
 0x348   :  { %v7872_v4 = vadd.f32 %v8462_v31, %v1234_v2 }
 0x349   :  { %v4791_v56 = vmul.f32 -1.442695, %v7870_v24 }
 0x34a   :  { %v4792_v50 = vmul.f32 -1.442695, %v7872_v4  ;;  %v9863_v4 = vld [vmem:[#allocation43_spill] sm:$0xff] }
 0x34b   :  { %7996 = vpow2.f32 %v4791_v56 }
 0x34c   :  { %7998 = vpow2.f32 %v4792_v50 }
 0x355   :  { %v7997_v20 = vpop.eup %7996 }
 0x356   :  { %v1311_v55 = vadd.f32 1.0, %v7997_v20  ;;  %v7999_v33 = vpop.eup %7998 }
 0x357   :  { %v1318_v35 = vadd.f32 1.0, %v7999_v33  ;;  %v9865_v33 = vld [vmem:[#allocation45_spill] sm:$0xff] }
 0x358   :  { %8000 = vrcp.f32 %v1311_v55 }
 0x362   :  { %v8001_v53 = vpop.eup %8000 }
 0x363   :  { %v1321_v46 = vmul.f32 %v8001_v53, %v1304_v15  ;;  %v9864_v53 = vld [vmem:[#allocation44_spill] sm:$0xff]  ;;  %v9866_v15 = vld [vmem:[#allocation46_spill] sm:$0xff] }
 0x365   :  { %v1322_v45 = vadd.f32 %v1321_v46, %v9861_v10  ;;  %v9862_v46 = vld [vmem:[#allocation75_spill] sm:$0xff] }
 0x366   :  { %v8828_v23 = vpop.f32.mrb[18].mxu1 }
 0x367   :  { %8002 = vtanh.f32 %v1322_v45  ;;  %v5578_v24 = vpop.f32.mrb[19].mxu1 }
 0x368   :  { %8004 = vrcp.f32 %v1318_v35  ;;  %v9867_v24 = vld [vmem:[#allocation41_spill] sm:$0xff] }
 0x371   :  { %v8003_v56 = vpop.eup %8002 }
 0x372   :  { %v1324_v2 = vsub.f32 %v8689_v47, %v8003_v56  ;;  %v8005_v38 = vpop.eup %8004 }
 0x374   :  { %v1325_v20 = vmul.f32 %v8005_v38, %v1324_v2  ;;  %v9868_v2 = vld [vmem:[#allocation47_spill] sm:$0xff]  ;;  %v9869_v38 = vld [vmem:[#allocation48_spill] sm:$0xff] }
 0x376   :  { %v8831_v50 = vadd.f32 %v8003_v56, %v1325_v20  ;;  %v9870_v20 = vld [vmem:[#allocation49_spill] sm:$0xff] }
 0x378   :  { %1695 = vmatmul.mubr.f32.vlgmr.msra.gmra.mrb[6].mxu0 %v8831_v50  ;;  %5647 = vmatmul.mubr.f32.vlgmr.msra.gmra.mrb[22].mxu1 %v8831_v50 }
 0x379   :  { %6856 = vmatpush1.bf16.msra.mxu0 %v8470_v36  ;;  %6887 = vmatpush3.bf16.msra.mxu1 %v8472_v39 }
 0x37a   :  { %6858 = vmatprep.subr.bf16.mxu0 %v8476_v48  ;;  %6888 = vmatprep.subr.bf16.mxu1 %v9823_v40 }
 0x37b   :  { %1855 = vmatprep.mubr.f32.mxu0 %v9806_v1  ;;  %5681 = vmatprep.mubr.msk.f32.mxu1 %vm8214_vm0, %v9806_v1 }
 0x37d   :  { %6860 = vmatpush1.bf16.msra.mxu0 %v8482_v60  ;;  %6890 = vmatpush3.bf16.msra.mxu1 %v8484_v3 }
 0x37e   :  { %6862 = vmatprep.subr.bf16.mxu0 %v8488_v8  ;;  %6891 = vmatprep.subr.bf16.mxu1 %v9823_v40 }
 0x381   :  { %6864 = vmatpush1.bf16.msra.mxu0 %v8495_v27  ;;  %6893 = vmatpush3.bf16.msra.mxu1 %v8497_v28 }
 0x382   :  { %6866 = vmatprep.subr.bf16.mxu0 %v8501_v32  ;;  %6894 = vmatprep.subr.bf16.mxu1 %v9823_v40 }
 0x385   :  { %6868 = vmatpush1.bf16.msra.mxu0 %v8505_v29  ;;  %6896 = vmatpush3.bf16.msra.mxu1 %v8507_v58 }
 0x386   :  { %v1534_v35 = vpop.f32.mrb[18].mxu0  ;;  %v1605_v45 = vpop.f32.mrb[20].mxu1  ;;  %6870 = vmatprep.subr.bf16.mxu0 %v8511_v11  ;;  %6897 = vmatprep.subr.bf16.mxu1 %v9823_v40 }
 0x387   :  { %v7898_v55 = vadd.f32 %v9862_v46, %v1534_v35  ;;  %v1536_v10 = vpop.f32.mrb[19].mxu0  ;;  %v5613_v47 = vpop.f32.mrb[21].mxu1 }
 0x388   :  { %v7900_v56 = vadd.f32 %v9867_v24, %v1536_v10  ;;  %v9871_v47 = vld [vmem:[#allocation50_spill] sm:$0xff]  ;;  %v9874_v10 = vld [vmem:[#allocation53_spill] sm:$0xff] }
 0x389   :  { %v4793_v0 = vmul.f32 -1.442695, %v7898_v55  ;;  %6872 = vmatpush1.bf16.msra.mxu0 %v9825_v6  ;;  %6899 = vmatpush3.bf16.msra.mxu1 %v9826_v7 }
 0x38a   :  { %6874 = vmatprep.subr.bf16.mxu0 %v9863_v4  ;;  %6900 = vmatprep.subr.bf16.mxu1 %v9823_v40  ;;  %v4794_v35 = vmul.f32 -1.442695, %v7900_v56  ;;  %v9876_v56 = vld [vmem:[#allocation55_spill] sm:$0xff] }
 0x38b   :  { %8006 = vpow2.f32 %v4793_v0  ;;  %v9872_v0 = vld [vmem:[#allocation51_spill] sm:$0xff] }
 0x38c   :  { %8008 = vpow2.f32 %v4794_v35  ;;  %v9879_v35 = vld [vmem:[#allocation58_spill] sm:$0xff] }
 0x38d   :  { %6876 = vmatpush1.bf16.msra.mxu0 %v9864_v53  ;;  %6902 = vmatpush3.bf16.msra.mxu1 %v9865_v33 }
 0x38e   :  { %6878 = vmatprep.subr.bf16.mxu0 %v9866_v15  ;;  %6903 = vmatprep.subr.bf16.mxu1 %v9823_v40  ;;  %v9873_v15 = vld [vmem:[#allocation52_spill] sm:$0xff] }
 0x391   :  { %6880 = vmatpush1.bf16.msra.mxu0 %v9868_v2  ;;  %6905 = vmatpush3.bf16.msra.mxu1 %v9869_v38 }
 0x392   :  { %6882 = vmatprep.subr.bf16.mxu0 %v9870_v20  ;;  %6906 = vmatprep.subr.bf16.mxu1 %v9823_v40  ;;  %v9875_v20 = vld [vmem:[#allocation54_spill] sm:$0xff] }
 0x395   :  { %v8007_v55 = vpop.eup %8006  ;;  %6884 = vmatpush1.bf16.msra.mxu0 %v9871_v47  ;;  %6908 = vmatpush3.bf16.msra.mxu1 %v9872_v0  ;;  %v9881_v0 = vld [vmem:[#allocation61_spill] sm:$0xff] }
 0x396   :  { %v1613_v33 = vadd.f32 1.0, %v8007_v55  ;;  %6910 = vmatprep.subr.bf16.mxu0 %v9873_v15  ;;  %6941 = vmatprep.subr.bf16.mxu1 %v9823_v40  ;;  %v9877_v55 = vld [vmem:[#allocation56_spill] sm:$0xff] }
 0x398   :  { %8010 = vrcp.f32 %v1613_v33  ;;  %1856 = vmatmul.mubr.f32.vlgmr.msra.gmra.mrb[20].mxu0 %v8831_v50  ;;  %5682 = vmatmul.mubr.f32.vlgmr.msra.gmra.mrb[24].mxu1 %v8831_v50  ;;  %v9878_v33 = vld [vmem:[#allocation57_spill] sm:$0xff] }
 0x399   :  { %6912 = vmatpush1.bf16.msra.mxu0 %v9874_v10  ;;  %6943 = vmatpush3.bf16.msra.mxu1 %v9875_v20  ;;  %v8009_v10 = vpop.eup %8008  ;;  %v1606_v20 = vadd.f32 %v1605_v45, %v8745_v19 }
 0x39a   :  { %6914 = vmatprep.subr.bf16.mxu0 %v9876_v56  ;;  %6944 = vmatprep.subr.bf16.mxu1 %v9823_v40  ;;  %v9880_v56 = vld [vmem:[#allocation60_spill] sm:$0xff] }
 0x39b   :  { %1996 = vmatprep.mubr.f32.mxu0 %v9806_v1  ;;  %5716 = vmatprep.mubr.msk.f32.mxu1 %vm8214_vm0, %v9806_v1 }
 0x39d   :  { %6916 = vmatpush1.bf16.msra.mxu0 %v9877_v55  ;;  %6946 = vmatpush3.bf16.msra.mxu1 %v9878_v33  ;;  %v1465_v55 = vadd.f32 %v8828_v23, %v8755_v14 }
 0x39e   :  { %6918 = vmatprep.subr.bf16.mxu0 %v9879_v35  ;;  %6947 = vmatprep.subr.bf16.mxu1 %v9823_v40  ;;  %v1620_v35 = vadd.f32 1.0, %v8009_v10  ;;  %v9883_v10 = vld [vmem:[#allocation15_spill] sm:$0xff] }
 0x3a1   :  { %6920 = vmatpush1.bf16.msra.mxu0 %v9845_v42  ;;  %6949 = vmatpush3.bf16.msra.mxu1 %v9880_v56 }
 0x3a2   :  { %v8011_v15 = vpop.eup %8010  ;;  %6922 = vmatprep.subr.bf16.mxu0 %v9881_v0  ;;  %6950 = vmatprep.subr.bf16.mxu1 %v9823_v40 }
 0x3a3   :  { %v1623_v33 = vmul.f32 %v8011_v15, %v1606_v20 }
 0x3a5   :  { %v1624_v47 = vadd.f32 %v1623_v33, %v1465_v55  ;;  %6924 = vmatpush1.bf16.msra.mxu0 %v9848_v13  ;;  %6952 = vmatpush3.bf16.msra.mxu1 %v9849_v30  ;;  %v9884_v55 = vld [vmem:[#allocation17_spill] sm:$0xff] }
 0x3a6   :  { %6926 = vmatprep.subr.bf16.mxu0 %v9850_v49  ;;  %6953 = vmatprep.subr.bf16.mxu1 %v9823_v40  ;;  %v9885_v33 = vld [vmem:[#allocation25_spill] sm:$0xff] }
 0x3a7   :  { %8012 = vtanh.f32 %v1624_v47 }
 0x3a8   :  { %8014 = vrcp.f32 %v1620_v35  ;;  %v9886_v35 = vld [vmem:[#allocation18_spill] sm:$0xff] }
 0x3a9   :  { %6928 = vmatpush1.bf16.msra.mxu0 %v8599_v43  ;;  %6955 = vmatpush3.bf16.msra.mxu1 %v9851_v63 }
 0x3aa   :  { %6930 = vmatprep.subr.bf16.mxu0 %v9852_v22  ;;  %6956 = vmatprep.subr.bf16.mxu1 %v9823_v40 }
 0x3ad   :  { %6932 = vmatpush1.bf16.msra.mxu0 %v8609_v57  ;;  %6958 = vmatpush3.bf16.msra.mxu1 %v8612_v16 }
 0x3ae   :  { %6934 = vmatprep.subr.bf16.mxu0 %v8615_v21  ;;  %6959 = vmatprep.subr.bf16.mxu1 %v9823_v40 }
 0x3b1   :  { %v8013_v23 = vpop.eup %8012  ;;  %6936 = vmatpush1.bf16.msra.mxu0 %v8619_v37  ;;  %6961 = vmatpush3.bf16.msra.mxu1 %v8622_v5 }
 0x3b2   :  { %6938 = vmatprep.subr.bf16.mxu0 %v8625_v59  ;;  %6962 = vmatprep.subr.bf16.mxu1 %v9823_v40  ;;  %v1626_v45 = vsub.f32 %v8783_v54, %v8013_v23  ;;  %v8015_v15 = vpop.eup %8014  ;;  %v9891_v54 = vld [vmem:[#allocation30_spill] sm:$0xff] }
 0x3b4   :  { %v1627_v20 = vmul.f32 %v8015_v15, %v1626_v45  ;;  %v9888_v45 = vld [vmem:[#allocation28_spill] sm:$0xff]  ;;  %v9889_v15 = vld [vmem:[#allocation21_spill] sm:$0xff] }
 0x3b5   :  { %6940 = vmatpush1.bf16.msra.mxu0 %v8629_v44  ;;  %6964 = vmatpush3.bf16.msra.mxu1 %v8632_v62 }
 0x3b6   :  { %v8911_v47 = vadd.f32 %v8013_v23, %v1627_v20  ;;  %6966 = vmatprep.subr.bf16.mxu0 %v8276_v9  ;;  %6997 = vmatprep.subr.bf16.mxu1 %v9823_v40  ;;  %v9887_v23 = vld [vmem:[#allocation20_spill] sm:$0xff]  ;;  %v9890_v20 = vld [vmem:[#allocation23_spill] sm:$0xff] }
 0x3b8   :  { %9882 = vst [vmem:[#allocation34_spill] sm:$0xff] %v8911_v47  ;;  %1997 = vmatmul.mubr.f32.vlgmr.msra.gmra.mrb[20].mxu0 %v8911_v47  ;;  %5717 = vmatmul.mubr.f32.vlgmr.msra.gmra.mrb[26].mxu1 %v8911_v47 }
 0x3b9   :  { %6968 = vmatpush1.bf16.msra.mxu0 %v8278_v17  ;;  %6999 = vmatpush3.bf16.msra.mxu1 %v8305_v41 }
 0x3ba   :  { %6970 = vmatprep.subr.bf16.mxu0 %v8281_v18  ;;  %7000 = vmatprep.subr.bf16.mxu1 %v9823_v40  ;;  %v9899_v18 = vld [vmem:[#allocation35_spill] sm:$0xff] }
 0x3bb   :  { %2158 = vmatprep.mubr.f32.mxu0 %v9806_v1  ;;  %5751 = vmatprep.mubr.msk.f32.mxu1 %vm8214_vm0, %v9806_v1 }
 0x3bd   :  { %6972 = vmatpush1.bf16.msra.mxu0 %v8289_v25  ;;  %7002 = vmatpush3.bf16.msra.mxu1 %v8318_v51 }
 0x3be   :  { %6974 = vmatprep.subr.bf16.mxu0 %v8292_v26  ;;  %7003 = vmatprep.subr.bf16.mxu1 %v9823_v40 }
 0x3c1   :  { %6976 = vmatpush1.bf16.msra.mxu0 %v8299_v34  ;;  %7005 = vmatpush3.bf16.msra.mxu1 %v8332_v61 }
 0x3c2   :  { %6978 = vmatprep.subr.bf16.mxu0 %v9883_v10  ;;  %7006 = vmatprep.subr.bf16.mxu1 %v9823_v40  ;;  %v9892_v10 = vld [vmem:[#allocation24_spill] sm:$0xff] }
 0x3c5   :  { %6980 = vmatpush1.bf16.msra.mxu0 %v9884_v55  ;;  %7008 = vmatpush3.bf16.msra.mxu1 %v9885_v33  ;;  %v9893_v33 = vld [vmem:[#allocation26_spill] sm:$0xff]  ;;  %v9895_v55 = vld [vmem:[#allocation27_spill] sm:$0xff] }
 0x3c6   :  { %6982 = vmatprep.subr.bf16.mxu0 %v9886_v35  ;;  %7009 = vmatprep.subr.bf16.mxu1 %v9823_v40  ;;  %v9894_v35 = vld [vmem:[#allocation31_spill] sm:$0xff] }
 0x3c9   :  { %6984 = vmatpush1.bf16.msra.mxu0 %v9887_v23  ;;  %7011 = vmatpush3.bf16.msra.mxu1 %v9888_v45  ;;  %v9896_v45 = vld [vmem:[#allocation29_spill] sm:$0xff] }
 0x3ca   :  { %6986 = vmatprep.subr.bf16.mxu0 %v9889_v15  ;;  %7012 = vmatprep.subr.bf16.mxu1 %v9823_v40  ;;  %v9897_v15 = vld [vmem:[#allocation32_spill] sm:$0xff]  ;;  %v9898_v23 = vld [vmem:[#allocation33_spill] sm:$0xff] }
 0x3cd   :  { %6988 = vmatpush1.bf16.msra.mxu0 %v9890_v20  ;;  %7014 = vmatpush3.bf16.msra.mxu1 %v9891_v54 }
 0x3ce   :  { %6990 = vmatprep.subr.bf16.mxu0 %v9892_v10  ;;  %7015 = vmatprep.subr.bf16.mxu1 %v9823_v40 }
 0x3d1   :  { %6992 = vmatpush1.bf16.msra.mxu0 %v9893_v33  ;;  %7017 = vmatpush3.bf16.msra.mxu1 %v9894_v35 }
 0x3d2   :  { %6994 = vmatprep.subr.bf16.mxu0 %v9895_v55  ;;  %7018 = vmatprep.subr.bf16.mxu1 %v9823_v40 }
 0x3d5   :  { %6996 = vmatpush1.bf16.msra.mxu0 %v9896_v45  ;;  %7020 = vmatpush3.bf16.msra.mxu1 %v9897_v15 }
 0x3d6   :  { %7022 = vmatprep.subr.bf16.mxu0 %v9898_v23  ;;  %7053 = vmatprep.subr.bf16.mxu1 %v9823_v40 }
 0x44b   :  { %v1696_v54 = vpop.f32.mrb[6].mxu0  ;;  %v1767_v10 = vpop.f32.mrb[22].mxu1 }
 0x44c   :  { %v7874_v20 = vadd.f32 %v8455_v12, %v1696_v54  ;;  %v1698_v61 = vpop.f32.mrb[7].mxu0  ;;  %v5648_v33 = vpop.f32.mrb[23].mxu1  ;;  %v1768_v23 = vadd.f32 %v1767_v10, %v8466_v52  ;;  %v9900_v10 = vld [vmem:[#allocation45_spill] sm:$0xff] }
 0x44d   :  { %v7876_v55 = vadd.f32 %v8462_v31, %v1698_v61 }
 0x44e   :  { %v4795_v34 = vmul.f32 -1.442695, %v7874_v20 }
 0x44f   :  { %v4796_v35 = vmul.f32 -1.442695, %v7876_v55 }
 0x450   :  { %8016 = vpow2.f32 %v4795_v34 }
 0x451   :  { %8018 = vpow2.f32 %v4796_v35 }
 0x45a   :  { %v8017_v26 = vpop.eup %8016 }
 0x45b   :  { %v1775_v51 = vadd.f32 1.0, %v8017_v26  ;;  %v8019_v15 = vpop.eup %8018 }
 0x45c   :  { %v1782_v17 = vadd.f32 1.0, %v8019_v15  ;;  %v9902_v15 = vld [vmem:[#allocation49_spill] sm:$0xff] }
 0x45d   :  { %8020 = vrcp.f32 %v1775_v51 }
 0x467   :  { %v8021_v45 = vpop.eup %8020 }
 0x468   :  { %v1785_v25 = vmul.f32 %v8021_v45, %v1768_v23  ;;  %v9901_v23 = vld [vmem:[#allocation46_spill] sm:$0xff] }
 0x46a   :  { %v1786_v41 = vadd.f32 %v1785_v25, %v9899_v18 }
 0x46b   :  { %v8956_v54 = vpop.f32.mrb[24].mxu1 }
 0x46c   :  { %8022 = vtanh.f32 %v1786_v41  ;;  %v5683_v33 = vpop.f32.mrb[25].mxu1 }
 0x46d   :  { %8024 = vrcp.f32 %v1782_v17 }
 0x476   :  { %v8023_v34 = vpop.eup %8022 }
 0x477   :  { %v1788_v61 = vsub.f32 %v8831_v50, %v8023_v34  ;;  %v8025_v55 = vpop.eup %8024 }
 0x479   :  { %v1789_v26 = vmul.f32 %v8025_v55, %v1788_v61  ;;  %v9904_v61 = vld [vmem:[#allocation51_spill] sm:$0xff] }
 0x47b   :  { %v8959_v35 = vadd.f32 %v8023_v34, %v1789_v26  ;;  %v9903_v34 = vld [vmem:[#allocation50_spill] sm:$0xff]  ;;  %v9905_v26 = vld [vmem:[#allocation52_spill] sm:$0xff] }
 0x47d   :  { %2159 = vmatmul.mubr.f32.vlgmr.msra.gmra.mrb[8].mxu0 %v8959_v35  ;;  %5752 = vmatmul.mubr.f32.vlgmr.msra.gmra.mrb[28].mxu1 %v8959_v35 }
 0x47e   :  { %7024 = vmatpush1.bf16.msra.mxu0 %v8470_v36  ;;  %7055 = vmatpush3.bf16.msra.mxu1 %v8472_v39 }
 0x47f   :  { %7026 = vmatprep.subr.bf16.mxu0 %v8476_v48  ;;  %7056 = vmatprep.subr.bf16.mxu1 %v9823_v40 }
 0x480   :  { %2319 = vmatprep.mubr.f32.mxu0 %v9806_v1  ;;  %5786 = vmatprep.mubr.msk.f32.mxu1 %vm8214_vm0, %v9806_v1 }
 0x482   :  { %7028 = vmatpush1.bf16.msra.mxu0 %v8482_v60  ;;  %7058 = vmatpush3.bf16.msra.mxu1 %v8484_v3 }
 0x483   :  { %7030 = vmatprep.subr.bf16.mxu0 %v8488_v8  ;;  %7059 = vmatprep.subr.bf16.mxu1 %v9823_v40 }
 0x486   :  { %7032 = vmatpush1.bf16.msra.mxu0 %v8495_v27  ;;  %7061 = vmatpush3.bf16.msra.mxu1 %v8497_v28 }
 0x487   :  { %7034 = vmatprep.subr.bf16.mxu0 %v8501_v32  ;;  %7062 = vmatprep.subr.bf16.mxu1 %v9823_v40 }
 0x48a   :  { %7036 = vmatpush1.bf16.msra.mxu0 %v8505_v29  ;;  %7064 = vmatpush3.bf16.msra.mxu1 %v8507_v58 }
 0x48b   :  { %v1998_v17 = vpop.f32.mrb[20].mxu0  ;;  %v2069_v18 = vpop.f32.mrb[26].mxu1  ;;  %7038 = vmatprep.subr.bf16.mxu0 %v8511_v11  ;;  %7065 = vmatprep.subr.bf16.mxu1 %v9823_v40 }
 0x48c   :  { %v7902_v25 = vadd.f32 %v9862_v46, %v1998_v17  ;;  %v2000_v41 = vpop.f32.mrb[21].mxu0  ;;  %v5718_v51 = vpop.f32.mrb[27].mxu1  ;;  %v9906_v17 = vld [vmem:[#allocation53_spill] sm:$0xff] }
 0x48d   :  { %v7904_v45 = vadd.f32 %v9867_v24, %v2000_v41  ;;  %v9908_v41 = vld [vmem:[#allocation55_spill] sm:$0xff]  ;;  %v9909_v51 = vld [vmem:[#allocation56_spill] sm:$0xff] }
 0x48e   :  { %v4797_v50 = vmul.f32 -1.442695, %v7902_v25  ;;  %7040 = vmatpush1.bf16.msra.mxu0 %v9825_v6  ;;  %7067 = vmatpush3.bf16.msra.mxu1 %v9826_v7  ;;  %v9907_v25 = vld [vmem:[#allocation54_spill] sm:$0xff] }
 0x48f   :  { %7042 = vmatprep.subr.bf16.mxu0 %v9863_v4  ;;  %7068 = vmatprep.subr.bf16.mxu1 %v9823_v40  ;;  %v4798_v20 = vmul.f32 -1.442695, %v7904_v45  ;;  %v9911_v45 = vld [vmem:[#allocation58_spill] sm:$0xff] }
 0x490   :  { %8026 = vpow2.f32 %v4797_v50  ;;  %v9910_v50 = vld [vmem:[#allocation57_spill] sm:$0xff] }
 0x491   :  { %8028 = vpow2.f32 %v4798_v20 }
 0x492   :  { %7044 = vmatpush1.bf16.msra.mxu0 %v9864_v53  ;;  %7070 = vmatpush3.bf16.msra.mxu1 %v9900_v10 }
 0x493   :  { %7046 = vmatprep.subr.bf16.mxu0 %v9901_v23  ;;  %7071 = vmatprep.subr.bf16.mxu1 %v9823_v40 }
 0x496   :  { %7048 = vmatpush1.bf16.msra.mxu0 %v9868_v2  ;;  %7073 = vmatpush3.bf16.msra.mxu1 %v9869_v38 }
 0x497   :  { %7050 = vmatprep.subr.bf16.mxu0 %v9902_v15  ;;  %7074 = vmatprep.subr.bf16.mxu1 %v9823_v40 }
 0x49a   :  { %v8027_v33 = vpop.eup %8026  ;;  %7052 = vmatpush1.bf16.msra.mxu0 %v9903_v34  ;;  %7076 = vmatpush3.bf16.msra.mxu1 %v9904_v61 }
 0x49b   :  { %v2077_v55 = vadd.f32 1.0, %v8027_v33  ;;  %7078 = vmatprep.subr.bf16.mxu0 %v9905_v26  ;;  %7109 = vmatprep.subr.bf16.mxu1 %v9823_v40  ;;  %v8029_v20 = vpop.eup %8028  ;;  %v2070_v33 = vadd.f32 %v2069_v18, %v8745_v19 }
 0x49d   :  { %8030 = vrcp.f32 %v2077_v55  ;;  %2320 = vmatmul.mubr.f32.vlgmr.msra.gmra.mrb[22].mxu0 %v8959_v35  ;;  %5787 = vmatmul.mubr.f32.vlgmr.msra.gmra.mrb[30].mxu1 %v8959_v35 }
 0x49e   :  { %7080 = vmatpush1.bf16.msra.mxu0 %v9906_v17  ;;  %7111 = vmatpush3.bf16.msra.mxu1 %v9907_v25 }
 0x49f   :  { %7082 = vmatprep.subr.bf16.mxu0 %v9908_v41  ;;  %7112 = vmatprep.subr.bf16.mxu1 %v9823_v40 }
 0x4a0   :  { %2460 = vmatprep.mubr.f32.mxu0 %v9806_v1  ;;  %5821 = vmatprep.mubr.msk.f32.mxu1 %vm8214_vm0, %v9806_v1 }
 0x4a2   :  { %7084 = vmatpush1.bf16.msra.mxu0 %v9909_v51  ;;  %7114 = vmatpush3.bf16.msra.mxu1 %v9910_v50  ;;  %v1929_v51 = vadd.f32 %v8956_v54, %v8755_v14 }
 0x4a3   :  { %7086 = vmatprep.subr.bf16.mxu0 %v9911_v45  ;;  %7115 = vmatprep.subr.bf16.mxu1 %v9823_v40  ;;  %v2084_v45 = vadd.f32 1.0, %v8029_v20  ;;  %v9914_v20 = vld [vmem:[#allocation16_spill] sm:$0xff] }
 0x4a6   :  { %7088 = vmatpush1.bf16.msra.mxu0 %v9845_v42  ;;  %7117 = vmatpush3.bf16.msra.mxu1 %v9880_v56 }
 0x4a7   :  { %v8031_v55 = vpop.eup %8030  ;;  %7090 = vmatprep.subr.bf16.mxu0 %v9881_v0  ;;  %7118 = vmatprep.subr.bf16.mxu1 %v9823_v40 }
 0x4a8   :  { %v2087_v50 = vmul.f32 %v8031_v55, %v2070_v33  ;;  %v9915_v33 = vld [vmem:[#allocation11_spill] sm:$0xff]  ;;  %v9916_v55 = vld [vmem:[#allocation12_spill] sm:$0xff] }
 0x4aa   :  { %v2088_v41 = vadd.f32 %v2087_v50, %v1929_v51  ;;  %7092 = vmatpush1.bf16.msra.mxu0 %v9848_v13  ;;  %7120 = vmatpush3.bf16.msra.mxu1 %v9849_v30 }
 0x4ab   :  { %7094 = vmatprep.subr.bf16.mxu0 %v9850_v49  ;;  %7121 = vmatprep.subr.bf16.mxu1 %v9823_v40 }
 0x4ac   :  { %8032 = vtanh.f32 %v2088_v41 }
 0x4ad   :  { %8034 = vrcp.f32 %v2084_v45  ;;  %v9913_v45 = vld [vmem:[#allocation10_spill] sm:$0xff] }
 0x4ae   :  { %7096 = vmatpush1.bf16.msra.mxu0 %v8599_v43  ;;  %7123 = vmatpush3.bf16.msra.mxu1 %v9851_v63 }
 0x4af   :  { %7098 = vmatprep.subr.bf16.mxu0 %v9852_v22  ;;  %7124 = vmatprep.subr.bf16.mxu1 %v9823_v40 }
 0x4b2   :  { %7100 = vmatpush1.bf16.msra.mxu0 %v8609_v57  ;;  %7126 = vmatpush3.bf16.msra.mxu1 %v8612_v16 }
 0x4b3   :  { %7102 = vmatprep.subr.bf16.mxu0 %v8615_v21  ;;  %7127 = vmatprep.subr.bf16.mxu1 %v9823_v40 }
 0x4b6   :  { %v8033_v54 = vpop.eup %8032  ;;  %7104 = vmatpush1.bf16.msra.mxu0 %v8619_v37  ;;  %7129 = vmatpush3.bf16.msra.mxu1 %v8622_v5  ;;  %v9937_v5 = vld [vmem:[#allocation38_spill] sm:$0xff] }
 0x4b7   :  { %7106 = vmatprep.subr.bf16.mxu0 %v8625_v59  ;;  %7130 = vmatprep.subr.bf16.mxu1 %v9823_v40  ;;  %v2090_v18 = vsub.f32 %v8911_v47, %v8033_v54  ;;  %v8035_v41 = vpop.eup %8034  ;;  %v9921_v47 = vld [vmem:[#allocation15_spill] sm:$0xff] }
 0x4b9   :  { %v2091_v51 = vmul.f32 %v8035_v41, %v2090_v18  ;;  %v9918_v18 = vld [vmem:[#allocation13_spill] sm:$0xff]  ;;  %v9919_v41 = vld [vmem:[#allocation14_spill] sm:$0xff] }
 0x4ba   :  { %7108 = vmatpush1.bf16.msra.mxu0 %v8629_v44  ;;  %7132 = vmatpush3.bf16.msra.mxu1 %v8632_v62 }
 0x4bb   :  { %v9039_v50 = vadd.f32 %v8033_v54, %v2091_v51  ;;  %7134 = vmatprep.subr.bf16.mxu0 %v8276_v9  ;;  %7165 = vmatprep.subr.bf16.mxu1 %v9823_v40  ;;  %v9917_v54 = vld [vmem:[#allocation19_spill] sm:$0xff]  ;;  %v9920_v51 = vld [vmem:[#allocation22_spill] sm:$0xff] }
 0x4bd   :  { %9912 = vst [vmem:[#allocation59_spill] sm:$0xff] %v9039_v50  ;;  %2461 = vmatmul.mubr.f32.vlgmr.msra.gmra.mrb[22].mxu0 %v9039_v50  ;;  %5822 = vmatmul.mubr.f32.vlgmr.msra.gmra.mrb[32].mxu1 %v9039_v50 }
 0x4be   :  { %7136 = vmatpush1.bf16.msra.mxu0 %v9913_v45  ;;  %7167 = vmatpush3.bf16.msra.mxu1 %v9914_v20  ;;  %v9923_v20 = vld [vmem:[#allocation25_spill] sm:$0xff]  ;;  %v9924_v45 = vld [vmem:[#allocation18_spill] sm:$0xff] }
 0x4bf   :  { %7138 = vmatprep.subr.bf16.mxu0 %v9915_v33  ;;  %7168 = vmatprep.subr.bf16.mxu1 %v9823_v40  ;;  %v9922_v33 = vld [vmem:[#allocation17_spill] sm:$0xff] }
 0x4c0   :  { %2622 = vmatprep.mubr.f32.mxu0 %v9806_v1  ;;  %5856 = vmatprep.mubr.msk.f32.mxu1 %vm8214_vm0, %v9806_v1 }
 0x4c2   :  { %7140 = vmatpush1.bf16.msra.mxu0 %v9916_v55  ;;  %7170 = vmatpush3.bf16.msra.mxu1 %v9917_v54  ;;  %v9925_v54 = vld [vmem:[#allocation20_spill] sm:$0xff]  ;;  %v9927_v55 = vld [vmem:[#allocation21_spill] sm:$0xff] }
 0x4c3   :  { %7142 = vmatprep.subr.bf16.mxu0 %v9918_v18  ;;  %7171 = vmatprep.subr.bf16.mxu1 %v9823_v40  ;;  %v9926_v18 = vld [vmem:[#allocation28_spill] sm:$0xff] }
 0x4c6   :  { %7144 = vmatpush1.bf16.msra.mxu0 %v9919_v41  ;;  %7173 = vmatpush3.bf16.msra.mxu1 %v9920_v51  ;;  %v9928_v51 = vld [vmem:[#allocation23_spill] sm:$0xff]  ;;  %v9930_v41 = vld [vmem:[#allocation24_spill] sm:$0xff] }
 0x4c7   :  { %7146 = vmatprep.subr.bf16.mxu0 %v9921_v47  ;;  %7174 = vmatprep.subr.bf16.mxu1 %v9823_v40  ;;  %v9929_v47 = vld [vmem:[#allocation30_spill] sm:$0xff] }
 0x4ca   :  { %7148 = vmatpush1.bf16.msra.mxu0 %v9922_v33  ;;  %7176 = vmatpush3.bf16.msra.mxu1 %v9923_v20  ;;  %v9931_v20 = vld [vmem:[#allocation26_spill] sm:$0xff]  ;;  %v9933_v33 = vld [vmem:[#allocation27_spill] sm:$0xff] }
 0x4cb   :  { %7150 = vmatprep.subr.bf16.mxu0 %v9924_v45  ;;  %7177 = vmatprep.subr.bf16.mxu1 %v9823_v40  ;;  %v9932_v45 = vld [vmem:[#allocation31_spill] sm:$0xff] }
 0x4ce   :  { %7152 = vmatpush1.bf16.msra.mxu0 %v9925_v54  ;;  %7179 = vmatpush3.bf16.msra.mxu1 %v9926_v18  ;;  %v9934_v18 = vld [vmem:[#allocation29_spill] sm:$0xff] }
 0x4cf   :  { %7154 = vmatprep.subr.bf16.mxu0 %v9927_v55  ;;  %7180 = vmatprep.subr.bf16.mxu1 %v9823_v40  ;;  %v9935_v55 = vld [vmem:[#allocation32_spill] sm:$0xff]  ;;  %v9936_v54 = vld [vmem:[#allocation33_spill] sm:$0xff] }
 0x4d2   :  { %7156 = vmatpush1.bf16.msra.mxu0 %v9928_v51  ;;  %7182 = vmatpush3.bf16.msra.mxu1 %v9929_v47 }
 0x4d3   :  { %7158 = vmatprep.subr.bf16.mxu0 %v9930_v41  ;;  %7183 = vmatprep.subr.bf16.mxu1 %v9823_v40 }
 0x4d6   :  { %7160 = vmatpush1.bf16.msra.mxu0 %v9931_v20  ;;  %7185 = vmatpush3.bf16.msra.mxu1 %v9932_v45 }
 0x4d7   :  { %7162 = vmatprep.subr.bf16.mxu0 %v9933_v33  ;;  %7186 = vmatprep.subr.bf16.mxu1 %v9823_v40 }
 0x4da   :  { %7164 = vmatpush1.bf16.msra.mxu0 %v9934_v18  ;;  %7188 = vmatpush3.bf16.msra.mxu1 %v9935_v55 }
 0x4db   :  { %7190 = vmatprep.subr.bf16.mxu0 %v9936_v54  ;;  %7221 = vmatprep.subr.bf16.mxu1 %v9823_v40 }
 0x550   :  { %v2160_v47 = vpop.f32.mrb[8].mxu0  ;;  %v2231_v41 = vpop.f32.mrb[28].mxu1 }
 0x551   :  { %v7878_v51 = vadd.f32 %v8455_v12, %v2160_v47  ;;  %v2162_v9 = vpop.f32.mrb[9].mxu0  ;;  %v5753_v20 = vpop.f32.mrb[29].mxu1  ;;  %v2232_v54 = vadd.f32 %v2231_v41, %v8466_v52 }
 0x552   :  { %v7880_v33 = vadd.f32 %v8462_v31, %v2162_v9 }
 0x553   :  { %v4799_v62 = vmul.f32 -1.442695, %v7878_v51  ;;  %v9938_v51 = vld [vmem:[#allocation55_spill] sm:$0xff] }
 0x554   :  { %v4800_v45 = vmul.f32 -1.442695, %v7880_v33 }
 0x555   :  { %8036 = vpow2.f32 %v4799_v62 }
 0x556   :  { %8038 = vpow2.f32 %v4800_v45 }
 0x55f   :  { %v8037_v44 = vpop.eup %8036 }
 0x560   :  { %v2239_v50 = vadd.f32 1.0, %v8037_v44  ;;  %v8039_v55 = vpop.eup %8038 }
 0x561   :  { %v2246_v21 = vadd.f32 1.0, %v8039_v55 }
 0x562   :  { %8040 = vrcp.f32 %v2239_v50 }
 0x56c   :  { %v8041_v18 = vpop.eup %8040 }
 0x56d   :  { %v2249_v59 = vmul.f32 %v8041_v18, %v2232_v54 }
 0x56f   :  { %v2250_v37 = vadd.f32 %v2249_v59, %v9937_v5 }
 0x570   :  { %v9084_v47 = vpop.f32.mrb[30].mxu1 }
 0x571   :  { %8042 = vtanh.f32 %v2250_v37  ;;  %v5788_v20 = vpop.f32.mrb[31].mxu1 }
 0x572   :  { %8044 = vrcp.f32 %v2246_v21  ;;  %v9939_v20 = vld [vmem:[#allocation56_spill] sm:$0xff] }
 0x57b   :  { %v8043_v62 = vpop.eup %8042 }
 0x57c   :  { %v2252_v9 = vsub.f32 %v8959_v35, %v8043_v62  ;;  %v8045_v33 = vpop.eup %8044 }
 0x57e   :  { %v2253_v44 = vmul.f32 %v8045_v33, %v2252_v9  ;;  %v9941_v9 = vld [vmem:[#allocation58_spill] sm:$0xff] }
 0x580   :  { %v9087_v45 = vadd.f32 %v8043_v62, %v2253_v44  ;;  %v9940_v62 = vld [vmem:[#allocation57_spill] sm:$0xff] }
 0x582   :  { %2623 = vmatmul.mubr.f32.vlgmr.msra.gmra.mrb[10].mxu0 %v9087_v45  ;;  %5857 = vmatmul.mubr.f32.vlgmr.msra.gmra.mrb[34].mxu1 %v9087_v45 }
 0x583   :  { %7192 = vmatpush1.bf16.msra.mxu0 %v8470_v36  ;;  %7223 = vmatpush3.bf16.msra.mxu1 %v8472_v39 }
 0x584   :  { %7194 = vmatprep.subr.bf16.mxu0 %v8476_v48  ;;  %7224 = vmatprep.subr.bf16.mxu1 %v9823_v40 }
 0x585   :  { %2783 = vmatprep.mubr.f32.mxu0 %v9806_v1  ;;  %5891 = vmatprep.mubr.msk.f32.mxu1 %vm8214_vm0, %v9806_v1 }
 0x587   :  { %7196 = vmatpush1.bf16.msra.mxu0 %v8482_v60  ;;  %7226 = vmatpush3.bf16.msra.mxu1 %v8484_v3 }
 0x588   :  { %7198 = vmatprep.subr.bf16.mxu0 %v8488_v8  ;;  %7227 = vmatprep.subr.bf16.mxu1 %v9823_v40 }
 0x58b   :  { %7200 = vmatpush1.bf16.msra.mxu0 %v8495_v27  ;;  %7229 = vmatpush3.bf16.msra.mxu1 %v8497_v28 }
 0x58c   :  { %7202 = vmatprep.subr.bf16.mxu0 %v8501_v32  ;;  %7230 = vmatprep.subr.bf16.mxu1 %v9823_v40 }
 0x58f   :  { %7204 = vmatpush1.bf16.msra.mxu0 %v8505_v29  ;;  %7232 = vmatpush3.bf16.msra.mxu1 %v8507_v58 }
 0x590   :  { %v2462_v21 = vpop.f32.mrb[22].mxu0  ;;  %v2533_v37 = vpop.f32.mrb[32].mxu1  ;;  %7206 = vmatprep.subr.bf16.mxu0 %v8511_v11  ;;  %7233 = vmatprep.subr.bf16.mxu1 %v9823_v40 }
 0x591   :  { %v7906_v5 = vadd.f32 %v9862_v46, %v2462_v21  ;;  %v2464_v59 = vpop.f32.mrb[23].mxu0  ;;  %v5823_v35 = vpop.f32.mrb[33].mxu1  ;;  %v2534_v44 = vadd.f32 %v2533_v37, %v8745_v19 }
 0x592   :  { %v7908_v55 = vadd.f32 %v9867_v24, %v2464_v59 }
 0x593   :  { %v4801_v50 = vmul.f32 -1.442695, %v7906_v5  ;;  %7208 = vmatpush1.bf16.msra.mxu0 %v9825_v6  ;;  %7235 = vmatpush3.bf16.msra.mxu1 %v9826_v7  ;;  %v2393_v5 = vadd.f32 %v9084_v47, %v8755_v14  ;;  %v9942_v47 = vld [vmem:[#allocation69_spill] sm:$0xff] }
 0x594   :  { %7210 = vmatprep.subr.bf16.mxu0 %v9863_v4  ;;  %7236 = vmatprep.subr.bf16.mxu1 %v9823_v40  ;;  %v4802_v54 = vmul.f32 -1.442695, %v7908_v55  ;;  %v9943_v55 = vld [vmem:[#allocation70_spill] sm:$0xff] }
 0x595   :  { %8046 = vpow2.f32 %v4801_v50 }
 0x596   :  { %8048 = vpow2.f32 %v4802_v54  ;;  %v9944_v54 = vld [vmem:[#allocation71_spill] sm:$0xff] }
 0x597   :  { %7212 = vmatpush1.bf16.msra.mxu0 %v9864_v53  ;;  %7238 = vmatpush3.bf16.msra.mxu1 %v9900_v10 }
 0x598   :  { %7214 = vmatprep.subr.bf16.mxu0 %v9901_v23  ;;  %7239 = vmatprep.subr.bf16.mxu1 %v9823_v40 }
 0x59b   :  { %7216 = vmatpush1.bf16.msra.mxu0 %v9868_v2  ;;  %7241 = vmatpush3.bf16.msra.mxu1 %v9869_v38 }
 0x59c   :  { %7218 = vmatprep.subr.bf16.mxu0 %v9902_v15  ;;  %7242 = vmatprep.subr.bf16.mxu1 %v9823_v40 }
 0x59f   :  { %v8047_v18 = vpop.eup %8046  ;;  %7220 = vmatpush1.bf16.msra.mxu0 %v9903_v34  ;;  %7244 = vmatpush3.bf16.msra.mxu1 %v9904_v61 }
 0x5a0   :  { %v2541_v41 = vadd.f32 1.0, %v8047_v18  ;;  %7246 = vmatprep.subr.bf16.mxu0 %v9905_v26  ;;  %7277 = vmatprep.subr.bf16.mxu1 %v9823_v40  ;;  %v8049_v33 = vpop.eup %8048  ;;  %v9945_v18 = vld [vmem:[#allocation72_spill] sm:$0xff] }
 0x5a1   :  { %v2548_v50 = vadd.f32 1.0, %v8049_v33 }
 0x5a2   :  { %8050 = vrcp.f32 %v2541_v41  ;;  %2784 = vmatmul.mubr.f32.vlgmr.msra.gmra.mrb[24].mxu0 %v9087_v45  ;;  %5892 = vmatmul.mubr.f32.vlgmr.msra.gmra.mrb[36].mxu1 %v9087_v45  ;;  %v9946_v41 = vld [vmem:[#allocation59_spill] sm:$0xff] }
 0x5a3   :  { %7248 = vmatpush1.bf16.msra.mxu0 %v9906_v17  ;;  %7279 = vmatpush3.bf16.msra.mxu1 %v9907_v25 }
 0x5a4   :  { %7250 = vmatprep.subr.bf16.mxu0 %v9938_v51  ;;  %7280 = vmatprep.subr.bf16.mxu1 %v9823_v40 }
 0x5a5   :  { %2924 = vmatprep.mubr.f32.mxu0 %v9806_v1  ;;  %5926 = vmatprep.mubr.msk.f32.mxu1 %vm8214_vm0, %v9806_v1 }
 0x5a7   :  { %7252 = vmatpush1.bf16.msra.mxu0 %v9939_v20  ;;  %7282 = vmatpush3.bf16.msra.mxu1 %v9940_v62 }
 0x5a8   :  { %7254 = vmatprep.subr.bf16.mxu0 %v9941_v9  ;;  %7283 = vmatprep.subr.bf16.mxu1 %v9823_v40 }
 0x5ab   :  { %7256 = vmatpush1.bf16.msra.mxu0 %v9845_v42  ;;  %7285 = vmatpush3.bf16.msra.mxu1 %v9880_v56 }
 0x5ac   :  { %v8051_v21 = vpop.eup %8050  ;;  %7258 = vmatprep.subr.bf16.mxu0 %v9881_v0  ;;  %7286 = vmatprep.subr.bf16.mxu1 %v9823_v40 }
 0x5ad   :  { %v2551_v59 = vmul.f32 %v8051_v21, %v2534_v44 }
 0x5af   :  { %v2552_v35 = vadd.f32 %v2551_v59, %v2393_v5  ;;  %7260 = vmatpush1.bf16.msra.mxu0 %v9848_v13  ;;  %7288 = vmatpush3.bf16.msra.mxu1 %v9849_v30  ;;  %v9947_v5 = vld [vmem:[#allocation73_spill] sm:$0xff]  ;;  %v9948_v59 = vld [vmem:[#allocation74_spill] sm:$0xff] }
 0x5b0   :  { %7262 = vmatprep.subr.bf16.mxu0 %v9850_v49  ;;  %7289 = vmatprep.subr.bf16.mxu1 %v9823_v40 }
 0x5b1   :  { %8052 = vtanh.f32 %v2552_v35 }
 0x5b2   :  { %8054 = vrcp.f32 %v2548_v50  ;;  %v9950_v50 = vld [vmem:[#allocation9_spill] sm:$0xff] }
 0x5b3   :  { %7264 = vmatpush1.bf16.msra.mxu0 %v8599_v43  ;;  %7291 = vmatpush3.bf16.msra.mxu1 %v9851_v63 }
 0x5b4   :  { %7266 = vmatprep.subr.bf16.mxu0 %v9852_v22  ;;  %7292 = vmatprep.subr.bf16.mxu1 %v9823_v40 }
 0x5b7   :  { %7268 = vmatpush1.bf16.msra.mxu0 %v8609_v57  ;;  %7294 = vmatpush3.bf16.msra.mxu1 %v8612_v16  ;;  %v9975_v57 = vld [vmem:[#allocation37_spill] sm:$0xff] }
 0x5b8   :  { %7270 = vmatprep.subr.bf16.mxu0 %v9942_v47  ;;  %7295 = vmatprep.subr.bf16.mxu1 %v9823_v40 }
 0x5bb   :  { %v8053_v37 = vpop.eup %8052  ;;  %7272 = vmatpush1.bf16.msra.mxu0 %v9943_v55  ;;  %7297 = vmatpush3.bf16.msra.mxu1 %v9944_v54  ;;  %v9952_v54 = vld [vmem:[#allocation16_spill] sm:$0xff] }
 0x5bc   :  { %7274 = vmatprep.subr.bf16.mxu0 %v9945_v18  ;;  %7298 = vmatprep.subr.bf16.mxu1 %v9823_v40  ;;  %v2554_v33 = vsub.f32 %v9946_v41, %v8053_v37  ;;  %v8055_v44 = vpop.eup %8054  ;;  %v9951_v18 = vld [vmem:[#allocation10_spill] sm:$0xff]  ;;  %v9953_v41 = vld [vmem:[#allocation11_spill] sm:$0xff] }
 0x5be   :  { %v2555_v21 = vmul.f32 %v8055_v44, %v2554_v33  ;;  %v9955_v33 = vld [vmem:[#allocation19_spill] sm:$0xff]  ;;  %v9956_v44 = vld [vmem:[#allocation13_spill] sm:$0xff] }
 0x5bf   :  { %7276 = vmatpush1.bf16.msra.mxu0 %v9947_v5  ;;  %7300 = vmatpush3.bf16.msra.mxu1 %v9948_v59  ;;  %v9962_v59 = vld [vmem:[#allocation18_spill] sm:$0xff] }
 0x5c0   :  { %v9167_v35 = vadd.f32 %v8053_v37, %v2555_v21  ;;  %7302 = vmatprep.subr.bf16.mxu0 %v9950_v50  ;;  %7333 = vmatprep.subr.bf16.mxu1 %v9823_v40  ;;  %v9954_v37 = vld [vmem:[#allocation12_spill] sm:$0xff]  ;;  %v9957_v21 = vld [vmem:[#allocation14_spill] sm:$0xff]  ;;  %v9961_v50 = vld [vmem:[#allocation25_spill] sm:$0xff] }
 0x5c2   :  { %9949 = vst [vmem:[#allocation62_spill] sm:$0xff] %v9167_v35  ;;  %2925 = vmatmul.mubr.f32.vlgmr.msra.gmra.mrb[24].mxu0 %v9167_v35  ;;  %5927 = vmatmul.mubr.f32.vlgmr.msra.gmra.mrb[38].mxu1 %v9167_v35 }
 0x5c3   :  { %7304 = vmatpush1.bf16.msra.mxu0 %v9951_v18  ;;  %7335 = vmatpush3.bf16.msra.mxu1 %v9952_v54  ;;  %v9958_v54 = vld [vmem:[#allocation22_spill] sm:$0xff]  ;;  %v9960_v18 = vld [vmem:[#allocation17_spill] sm:$0xff] }
 0x5c4   :  { %7306 = vmatprep.subr.bf16.mxu0 %v9953_v41  ;;  %7336 = vmatprep.subr.bf16.mxu1 %v9823_v40  ;;  %v9959_v41 = vld [vmem:[#allocation15_spill] sm:$0xff] }
 0x5c5   :  { %3086 = vmatprep.mubr.f32.mxu0 %v9806_v1  ;;  %5961 = vmatprep.mubr.msk.f32.mxu1 %vm8214_vm0, %v9806_v1 }
 0x5c7   :  { %7308 = vmatpush1.bf16.msra.mxu0 %v9954_v37  ;;  %7338 = vmatpush3.bf16.msra.mxu1 %v9955_v33  ;;  %v9963_v33 = vld [vmem:[#allocation20_spill] sm:$0xff]  ;;  %v9965_v37 = vld [vmem:[#allocation21_spill] sm:$0xff] }
 0x5c8   :  { %7310 = vmatprep.subr.bf16.mxu0 %v9956_v44  ;;  %7339 = vmatprep.subr.bf16.mxu1 %v9823_v40  ;;  %v9964_v44 = vld [vmem:[#allocation28_spill] sm:$0xff] }
 0x5cb   :  { %7312 = vmatpush1.bf16.msra.mxu0 %v9957_v21  ;;  %7341 = vmatpush3.bf16.msra.mxu1 %v9958_v54  ;;  %v9966_v54 = vld [vmem:[#allocation23_spill] sm:$0xff]  ;;  %v9968_v21 = vld [vmem:[#allocation24_spill] sm:$0xff] }
 0x5cc   :  { %7314 = vmatprep.subr.bf16.mxu0 %v9959_v41  ;;  %7342 = vmatprep.subr.bf16.mxu1 %v9823_v40  ;;  %v9967_v41 = vld [vmem:[#allocation30_spill] sm:$0xff] }
 0x5cf   :  { %7316 = vmatpush1.bf16.msra.mxu0 %v9960_v18  ;;  %7344 = vmatpush3.bf16.msra.mxu1 %v9961_v50  ;;  %v9969_v50 = vld [vmem:[#allocation26_spill] sm:$0xff]  ;;  %v9971_v18 = vld [vmem:[#allocation27_spill] sm:$0xff] }
 0x5d0   :  { %7318 = vmatprep.subr.bf16.mxu0 %v9962_v59  ;;  %7345 = vmatprep.subr.bf16.mxu1 %v9823_v40  ;;  %v9970_v59 = vld [vmem:[#allocation31_spill] sm:$0xff] }
 0x5d3   :  { %7320 = vmatpush1.bf16.msra.mxu0 %v9963_v33  ;;  %7347 = vmatpush3.bf16.msra.mxu1 %v9964_v44  ;;  %v9972_v44 = vld [vmem:[#allocation29_spill] sm:$0xff] }
 0x5d4   :  { %7322 = vmatprep.subr.bf16.mxu0 %v9965_v37  ;;  %7348 = vmatprep.subr.bf16.mxu1 %v9823_v40  ;;  %v9973_v37 = vld [vmem:[#allocation32_spill] sm:$0xff]  ;;  %v9974_v33 = vld [vmem:[#allocation33_spill] sm:$0xff] }
 0x5d7   :  { %7324 = vmatpush1.bf16.msra.mxu0 %v9966_v54  ;;  %7350 = vmatpush3.bf16.msra.mxu1 %v9967_v41 }
 0x5d8   :  { %7326 = vmatprep.subr.bf16.mxu0 %v9968_v21  ;;  %7351 = vmatprep.subr.bf16.mxu1 %v9823_v40 }
 0x5db   :  { %7328 = vmatpush1.bf16.msra.mxu0 %v9969_v50  ;;  %7353 = vmatpush3.bf16.msra.mxu1 %v9970_v59 }
 0x5dc   :  { %7330 = vmatprep.subr.bf16.mxu0 %v9971_v18  ;;  %7354 = vmatprep.subr.bf16.mxu1 %v9823_v40 }
 0x5df   :  { %7332 = vmatpush1.bf16.msra.mxu0 %v9972_v44  ;;  %7356 = vmatpush3.bf16.msra.mxu1 %v9973_v37 }
 0x5e0   :  { %7358 = vmatprep.subr.bf16.mxu0 %v9974_v33  ;;  %7389 = vmatprep.subr.bf16.mxu1 %v9823_v40 }
 0x655   :  { %v2624_v41 = vpop.f32.mrb[10].mxu0  ;;  %v2695_v21 = vpop.f32.mrb[34].mxu1 }
 0x656   :  { %v7882_v54 = vadd.f32 %v8455_v12, %v2624_v41  ;;  %v2626_v5 = vpop.f32.mrb[11].mxu0  ;;  %v5858_v50 = vpop.f32.mrb[35].mxu1  ;;  %v2696_v33 = vadd.f32 %v2695_v21, %v8466_v52 }
 0x657   :  { %v7884_v18 = vadd.f32 %v8462_v31, %v2626_v5 }
 0x658   :  { %v4803_v35 = vmul.f32 -1.442695, %v7882_v54 }
 0x659   :  { %v4804_v59 = vmul.f32 -1.442695, %v7884_v18 }
 0x65a   :  { %8056 = vpow2.f32 %v4803_v35 }
 0x65b   :  { %8058 = vpow2.f32 %v4804_v59 }
 0x664   :  { %v8057_v55 = vpop.eup %8056 }
 0x665   :  { %v2703_v47 = vadd.f32 1.0, %v8057_v55  ;;  %v8059_v37 = vpop.eup %8058 }
 0x666   :  { %v2710_v63 = vadd.f32 1.0, %v8059_v37 }
 0x667   :  { %8060 = vrcp.f32 %v2703_v47 }
 0x671   :  { %v8061_v44 = vpop.eup %8060 }
 0x672   :  { %v2713_v16 = vmul.f32 %v8061_v44, %v2696_v33 }
 0x674   :  { %v2714_v22 = vadd.f32 %v2713_v16, %v9975_v57 }
 0x675   :  { %v9212_v41 = vpop.f32.mrb[36].mxu1 }
 0x676   :  { %8062 = vtanh.f32 %v2714_v22  ;;  %v5893_v54 = vpop.f32.mrb[37].mxu1 }
 0x677   :  { %8064 = vrcp.f32 %v2710_v63 }
 0x680   :  { %v8063_v35 = vpop.eup %8062 }
 0x681   :  { %v2716_v18 = vsub.f32 %v9087_v45, %v8063_v35  ;;  %v8065_v5 = vpop.eup %8064 }
 0x683   :  { %v2717_v55 = vmul.f32 %v8065_v5, %v2716_v18  ;;  %v2857_v18 = vadd.f32 %v9212_v41, %v8755_v14  ;;  %v9978_v41 = vld [vmem:[#allocation67_spill] sm:$0xff] }
 0x685   :  { %v9215_v59 = vadd.f32 %v8063_v35, %v2717_v55 }
 0x687   :  { %3087 = vmatmul.mubr.f32.vlgmr.msra.gmra.mrb[12].mxu0 %v9215_v59  ;;  %5962 = vmatmul.mubr.f32.vlgmr.msra.gmra.mrb[40].mxu1 %v9215_v59 }
 0x688   :  { %7360 = vmatpush1.bf16.msra.mxu0 %v8470_v36  ;;  %7391 = vmatpush3.bf16.msra.mxu1 %v8472_v39 }
 0x689   :  { %7362 = vmatprep.subr.bf16.mxu0 %v8476_v48  ;;  %7392 = vmatprep.subr.bf16.mxu1 %v9823_v40 }
 0x68a   :  { %3247 = vmatprep.mubr.f32.mxu0 %v9806_v1  ;;  %5996 = vmatprep.mubr.msk.f32.mxu1 %vm8214_vm0, %v9806_v1 }
 0x68c   :  { %7364 = vmatpush1.bf16.msra.mxu0 %v8482_v60  ;;  %7394 = vmatpush3.bf16.msra.mxu1 %v8484_v3 }
 0x68d   :  { %7366 = vmatprep.subr.bf16.mxu0 %v8488_v8  ;;  %7395 = vmatprep.subr.bf16.mxu1 %v9823_v40 }
 0x690   :  { %7368 = vmatpush1.bf16.msra.mxu0 %v8495_v27  ;;  %7397 = vmatpush3.bf16.msra.mxu1 %v8497_v28 }
 0x691   :  { %7370 = vmatprep.subr.bf16.mxu0 %v8501_v32  ;;  %7398 = vmatprep.subr.bf16.mxu1 %v9823_v40 }
 0x694   :  { %7372 = vmatpush1.bf16.msra.mxu0 %v8505_v29  ;;  %7400 = vmatpush3.bf16.msra.mxu1 %v8507_v58 }
 0x695   :  { %v2926_v57 = vpop.f32.mrb[24].mxu0  ;;  %v2997_v16 = vpop.f32.mrb[38].mxu1  ;;  %7374 = vmatprep.subr.bf16.mxu0 %v8511_v11  ;;  %7401 = vmatprep.subr.bf16.mxu1 %v9823_v40 }
 0x696   :  { %v7910_v63 = vadd.f32 %v9862_v46, %v2926_v57  ;;  %v2928_v22 = vpop.f32.mrb[25].mxu0  ;;  %v5928_v45 = vpop.f32.mrb[39].mxu1  ;;  %v2998_v54 = vadd.f32 %v2997_v16, %v8745_v19  ;;  %v9976_v16 = vld [vmem:[#allocation65_spill] sm:$0xff] }
 0x697   :  { %v7912_v50 = vadd.f32 %v9867_v24, %v2928_v22  ;;  %v9979_v22 = vld [vmem:[#allocation68_spill] sm:$0xff]  ;;  %v9980_v45 = vld [vmem:[#allocation69_spill] sm:$0xff] }
 0x698   :  { %v4805_v47 = vmul.f32 -1.442695, %v7910_v63  ;;  %7376 = vmatpush1.bf16.msra.mxu0 %v9825_v6  ;;  %7403 = vmatpush3.bf16.msra.mxu1 %v9826_v7  ;;  %v9977_v63 = vld [vmem:[#allocation66_spill] sm:$0xff] }
 0x699   :  { %7378 = vmatprep.subr.bf16.mxu0 %v9863_v4  ;;  %7404 = vmatprep.subr.bf16.mxu1 %v9823_v40  ;;  %v4806_v37 = vmul.f32 -1.442695, %v7912_v50  ;;  %v9981_v50 = vld [vmem:[#allocation70_spill] sm:$0xff] }
 0x69a   :  { %8066 = vpow2.f32 %v4805_v47 }
 0x69b   :  { %8068 = vpow2.f32 %v4806_v37  ;;  %v9982_v37 = vld [vmem:[#allocation71_spill] sm:$0xff] }
 0x69c   :  { %7380 = vmatpush1.bf16.msra.mxu0 %v9864_v53  ;;  %7406 = vmatpush3.bf16.msra.mxu1 %v9900_v10 }
 0x69d   :  { %7382 = vmatprep.subr.bf16.mxu0 %v9901_v23  ;;  %7407 = vmatprep.subr.bf16.mxu1 %v9823_v40 }
 0x6a0   :  { %7384 = vmatpush1.bf16.msra.mxu0 %v9868_v2  ;;  %7409 = vmatpush3.bf16.msra.mxu1 %v9869_v38 }
 0x6a1   :  { %7386 = vmatprep.subr.bf16.mxu0 %v9902_v15  ;;  %7410 = vmatprep.subr.bf16.mxu1 %v9823_v40 }
 0x6a4   :  { %v8067_v33 = vpop.eup %8066  ;;  %7388 = vmatpush1.bf16.msra.mxu0 %v9903_v34  ;;  %7412 = vmatpush3.bf16.msra.mxu1 %v9904_v61 }
 0x6a5   :  { %v3005_v44 = vadd.f32 1.0, %v8067_v33  ;;  %7414 = vmatprep.subr.bf16.mxu0 %v9905_v26  ;;  %7445 = vmatprep.subr.bf16.mxu1 %v9823_v40  ;;  %v8069_v21 = vpop.eup %8068  ;;  %v9983_v33 = vld [vmem:[#allocation72_spill] sm:$0xff] }
 0x6a6   :  { %v3012_v57 = vadd.f32 1.0, %v8069_v21 }
 0x6a7   :  { %8070 = vrcp.f32 %v3005_v44  ;;  %3248 = vmatmul.mubr.f32.vlgmr.msra.gmra.mrb[26].mxu0 %v9215_v59  ;;  %5997 = vmatmul.mubr.f32.vlgmr.msra.gmra.mrb[42].mxu1 %v9215_v59  ;;  %v9984_v44 = vld [vmem:[#allocation62_spill] sm:$0xff] }
 0x6a8   :  { %7416 = vmatpush1.bf16.msra.mxu0 %v9906_v17  ;;  %7447 = vmatpush3.bf16.msra.mxu1 %v9907_v25 }
 0x6a9   :  { %7418 = vmatprep.subr.bf16.mxu0 %v9938_v51  ;;  %7448 = vmatprep.subr.bf16.mxu1 %v9823_v40 }
 0x6aa   :  { %3388 = vmatprep.mubr.f32.mxu0 %v9806_v1  ;;  %6031 = vmatprep.mubr.msk.f32.mxu1 %vm8214_vm0, %v9806_v1 }
 0x6ac   :  { %7420 = vmatpush1.bf16.msra.mxu0 %v9939_v20  ;;  %7450 = vmatpush3.bf16.msra.mxu1 %v9940_v62 }
 0x6ad   :  { %7422 = vmatprep.subr.bf16.mxu0 %v9941_v9  ;;  %7451 = vmatprep.subr.bf16.mxu1 %v9823_v40 }
 0x6b0   :  { %7424 = vmatpush1.bf16.msra.mxu0 %v9845_v42  ;;  %7453 = vmatpush3.bf16.msra.mxu1 %v9880_v56 }
 0x6b1   :  { %v8071_v35 = vpop.eup %8070  ;;  %7426 = vmatprep.subr.bf16.mxu0 %v9881_v0  ;;  %7454 = vmatprep.subr.bf16.mxu1 %v9823_v40 }
 0x6b2   :  { %v3015_v5 = vmul.f32 %v8071_v35, %v2998_v54 }
 0x6b4   :  { %v3016_v55 = vadd.f32 %v3015_v5, %v2857_v18  ;;  %7428 = vmatpush1.bf16.msra.mxu0 %v9848_v13  ;;  %7456 = vmatpush3.bf16.msra.mxu1 %v9849_v30  ;;  %v9985_v18 = vld [vmem:[#allocation73_spill] sm:$0xff]  ;;  %v9986_v5 = vld [vmem:[#allocation74_spill] sm:$0xff] }
 0x6b5   :  { %7430 = vmatprep.subr.bf16.mxu0 %v9850_v49  ;;  %7457 = vmatprep.subr.bf16.mxu1 %v9823_v40 }
 0x6b6   :  { %8072 = vtanh.f32 %v3016_v55 }
 0x6b7   :  { %8074 = vrcp.f32 %v3012_v57  ;;  %v9988_v57 = vld [vmem:[#allocation9_spill] sm:$0xff] }
 0x6b8   :  { %7432 = vmatpush1.bf16.msra.mxu0 %v8599_v43  ;;  %7459 = vmatpush3.bf16.msra.mxu1 %v9976_v16 }
 0x6b9   :  { %7434 = vmatprep.subr.bf16.mxu0 %v9977_v63  ;;  %7460 = vmatprep.subr.bf16.mxu1 %v9823_v40 }
 0x6bc   :  { %7436 = vmatpush1.bf16.msra.mxu0 %v9978_v41  ;;  %7462 = vmatpush3.bf16.msra.mxu1 %v9979_v22  ;;  %v10013_v41 = vld [vmem:[#allocation40_spill] sm:$0xff] }
 0x6bd   :  { %7438 = vmatprep.subr.bf16.mxu0 %v9980_v45  ;;  %7463 = vmatprep.subr.bf16.mxu1 %v9823_v40 }
 0x6c0   :  { %v8073_v47 = vpop.eup %8072  ;;  %7440 = vmatpush1.bf16.msra.mxu0 %v9981_v50  ;;  %7465 = vmatpush3.bf16.msra.mxu1 %v9982_v37  ;;  %v9990_v37 = vld [vmem:[#allocation16_spill] sm:$0xff] }
 0x6c1   :  { %7442 = vmatprep.subr.bf16.mxu0 %v9983_v33  ;;  %7466 = vmatprep.subr.bf16.mxu1 %v9823_v40  ;;  %v3018_v21 = vsub.f32 %v9984_v44, %v8073_v47  ;;  %v8075_v54 = vpop.eup %8074  ;;  %v9989_v33 = vld [vmem:[#allocation10_spill] sm:$0xff]  ;;  %v9991_v44 = vld [vmem:[#allocation11_spill] sm:$0xff] }
 0x6c3   :  { %v3019_v35 = vmul.f32 %v8075_v54, %v3018_v21  ;;  %v9993_v21 = vld [vmem:[#allocation19_spill] sm:$0xff]  ;;  %v9994_v54 = vld [vmem:[#allocation13_spill] sm:$0xff] }
 0x6c4   :  { %7444 = vmatpush1.bf16.msra.mxu0 %v9985_v18  ;;  %7468 = vmatpush3.bf16.msra.mxu1 %v9986_v5  ;;  %v10000_v5 = vld [vmem:[#allocation18_spill] sm:$0xff] }
 0x6c5   :  { %v9295_v55 = vadd.f32 %v8073_v47, %v3019_v35  ;;  %7470 = vmatprep.subr.bf16.mxu0 %v9988_v57  ;;  %7501 = vmatprep.subr.bf16.mxu1 %v9823_v40  ;;  %v9992_v47 = vld [vmem:[#allocation12_spill] sm:$0xff]  ;;  %v9998_v35 = vld [vmem:[#allocation17_spill] sm:$0xff] }
 0x6c6   :  { %v9999_v57 = vld [vmem:[#allocation25_spill] sm:$0xff] }
 0x6c7   :  { %9987 = vst [vmem:[#allocation63_spill] sm:$0xff] %v9295_v55  ;;  %3389 = vmatmul.mubr.f32.vlgmr.msra.gmra.mrb[26].mxu0 %v9295_v55  ;;  %6032 = vmatmul.mubr.f32.vlgmr.msra.gmra.mrb[44].mxu1 %v9295_v55 }
 0x6c8   :  { %7472 = vmatpush1.bf16.msra.mxu0 %v9989_v33  ;;  %7503 = vmatpush3.bf16.msra.mxu1 %v9990_v37  ;;  %v9995_v33 = vld [vmem:[#allocation14_spill] sm:$0xff] }
 0x6c9   :  { %7474 = vmatprep.subr.bf16.mxu0 %v9991_v44  ;;  %7504 = vmatprep.subr.bf16.mxu1 %v9823_v40  ;;  %v9996_v37 = vld [vmem:[#allocation22_spill] sm:$0xff]  ;;  %v9997_v44 = vld [vmem:[#allocation15_spill] sm:$0xff] }
 0x6ca   :  { %3550 = vmatprep.mubr.f32.mxu0 %v9806_v1  ;;  %6066 = vmatprep.mubr.msk.f32.mxu1 %vm8214_vm0, %v9806_v1 }
 0x6cc   :  { %7476 = vmatpush1.bf16.msra.mxu0 %v9992_v47  ;;  %7506 = vmatpush3.bf16.msra.mxu1 %v9993_v21  ;;  %v10001_v47 = vld [vmem:[#allocation20_spill] sm:$0xff] }
 0x6cd   :  { %7478 = vmatprep.subr.bf16.mxu0 %v9994_v54  ;;  %7507 = vmatprep.subr.bf16.mxu1 %v9823_v40  ;;  %v10002_v21 = vld [vmem:[#allocation28_spill] sm:$0xff]  ;;  %v10003_v54 = vld [vmem:[#allocation21_spill] sm:$0xff] }
 0x6d0   :  { %7480 = vmatpush1.bf16.msra.mxu0 %v9995_v33  ;;  %7509 = vmatpush3.bf16.msra.mxu1 %v9996_v37  ;;  %v10004_v33 = vld [vmem:[#allocation23_spill] sm:$0xff]  ;;  %v10005_v37 = vld [vmem:[#allocation30_spill] sm:$0xff] }
 0x6d1   :  { %7482 = vmatprep.subr.bf16.mxu0 %v9997_v44  ;;  %7510 = vmatprep.subr.bf16.mxu1 %v9823_v40  ;;  %v10006_v44 = vld [vmem:[#allocation24_spill] sm:$0xff] }
 0x6d4   :  { %7484 = vmatpush1.bf16.msra.mxu0 %v9998_v35  ;;  %7512 = vmatpush3.bf16.msra.mxu1 %v9999_v57  ;;  %v10007_v35 = vld [vmem:[#allocation26_spill] sm:$0xff]  ;;  %v10009_v57 = vld [vmem:[#allocation27_spill] sm:$0xff] }
 0x6d5   :  { %7486 = vmatprep.subr.bf16.mxu0 %v10000_v5  ;;  %7513 = vmatprep.subr.bf16.mxu1 %v9823_v40  ;;  %v10008_v5 = vld [vmem:[#allocation31_spill] sm:$0xff] }
 0x6d8   :  { %7488 = vmatpush1.bf16.msra.mxu0 %v10001_v47  ;;  %7515 = vmatpush3.bf16.msra.mxu1 %v10002_v21  ;;  %v10010_v47 = vld [vmem:[#allocation29_spill] sm:$0xff]  ;;  %v10011_v21 = vld [vmem:[#allocation32_spill] sm:$0xff] }
 0x6d9   :  { %7490 = vmatprep.subr.bf16.mxu0 %v10003_v54  ;;  %7516 = vmatprep.subr.bf16.mxu1 %v9823_v40  ;;  %v10012_v54 = vld [vmem:[#allocation33_spill] sm:$0xff] }
 0x6dc   :  { %7492 = vmatpush1.bf16.msra.mxu0 %v10004_v33  ;;  %7518 = vmatpush3.bf16.msra.mxu1 %v10005_v37 }
 0x6dd   :  { %7494 = vmatprep.subr.bf16.mxu0 %v10006_v44  ;;  %7519 = vmatprep.subr.bf16.mxu1 %v9823_v40 }
 0x6e0   :  { %7496 = vmatpush1.bf16.msra.mxu0 %v10007_v35  ;;  %7521 = vmatpush3.bf16.msra.mxu1 %v10008_v5 }
 0x6e1   :  { %7498 = vmatprep.subr.bf16.mxu0 %v10009_v57  ;;  %7522 = vmatprep.subr.bf16.mxu1 %v9823_v40 }
 0x6e4   :  { %7500 = vmatpush1.bf16.msra.mxu0 %v10010_v47  ;;  %7524 = vmatpush3.bf16.msra.mxu1 %v10011_v21 }
 0x6e5   :  { %7526 = vmatprep.subr.bf16.mxu0 %v10012_v54  ;;  %7557 = vmatprep.subr.bf16.mxu1 %v9823_v40 }
 0x75a   :  { %v3088_v33 = vpop.f32.mrb[12].mxu0  ;;  %v3159_v37 = vpop.f32.mrb[40].mxu1 }
 0x75b   :  { %v7886_v44 = vadd.f32 %v8455_v12, %v3088_v33  ;;  %v3090_v18 = vpop.f32.mrb[13].mxu0  ;;  %v5963_v35 = vpop.f32.mrb[41].mxu1  ;;  %v3160_v21 = vadd.f32 %v3159_v37, %v8466_v52 }
 0x75c   :  { %v7888_v5 = vadd.f32 %v8462_v31, %v3090_v18 }
 0x75d   :  { %v4807_v55 = vmul.f32 -1.442695, %v7886_v44 }
 0x75e   :  { %v4808_v57 = vmul.f32 -1.442695, %v7888_v5 }
 0x75f   :  { %8076 = vpow2.f32 %v4807_v55 }
 0x760   :  { %8078 = vpow2.f32 %v4808_v57 }
 0x769   :  { %v8077_v50 = vpop.eup %8076 }
 0x76a   :  { %v3167_v45 = vadd.f32 1.0, %v8077_v50  ;;  %v8079_v47 = vpop.eup %8078 }
 0x76b   :  { %v3174_v16 = vadd.f32 1.0, %v8079_v47 }
 0x76c   :  { %8080 = vrcp.f32 %v3167_v45 }
 0x776   :  { %v8081_v54 = vpop.eup %8080 }
 0x777   :  { %v3177_v22 = vmul.f32 %v8081_v54, %v3160_v21 }
 0x779   :  { %v3178_v63 = vadd.f32 %v3177_v22, %v10013_v41 }
 0x77a   :  { %v9340_v33 = vpop.f32.mrb[42].mxu1 }
 0x77b   :  { %8082 = vtanh.f32 %v3178_v63  ;;  %v5998_v44 = vpop.f32.mrb[43].mxu1 }
 0x77c   :  { %8084 = vrcp.f32 %v3174_v16 }
 0x785   :  { %v8083_v55 = vpop.eup %8082 }
 0x786   :  { %v3180_v18 = vsub.f32 %v9215_v59, %v8083_v55  ;;  %v8085_v35 = vpop.eup %8084 }
 0x788   :  { %v3181_v50 = vmul.f32 %v8085_v35, %v3180_v18  ;;  %v3321_v18 = vadd.f32 %v9340_v33, %v8755_v14  ;;  %v10016_v33 = vld [vmem:[#allocation67_spill] sm:$0xff] }
 0x78a   :  { %v9343_v5 = vadd.f32 %v8083_v55, %v3181_v50 }
 0x78c   :  { %3551 = vmatmul.mubr.f32.vlgmr.msra.gmra.mrb[14].mxu0 %v9343_v5  ;;  %6067 = vmatmul.mubr.f32.vlgmr.msra.gmra.mrb[46].mxu1 %v9343_v5 }
 0x78d   :  { %7528 = vmatpush1.bf16.msra.mxu0 %v8470_v36  ;;  %7559 = vmatpush3.bf16.msra.mxu1 %v8472_v39 }
 0x78e   :  { %7530 = vmatprep.subr.bf16.mxu0 %v8476_v48  ;;  %7560 = vmatprep.subr.bf16.mxu1 %v9823_v40 }
 0x78f   :  { %3711 = vmatprep.mubr.f32.mxu0 %v9806_v1  ;;  %6101 = vmatprep.mubr.msk.f32.mxu1 %vm8214_vm0, %v9806_v1 }
 0x791   :  { %7532 = vmatpush1.bf16.msra.mxu0 %v8482_v60  ;;  %7562 = vmatpush3.bf16.msra.mxu1 %v8484_v3 }
 0x792   :  { %7534 = vmatprep.subr.bf16.mxu0 %v8488_v8  ;;  %7563 = vmatprep.subr.bf16.mxu1 %v9823_v40 }
 0x795   :  { %7536 = vmatpush1.bf16.msra.mxu0 %v8495_v27  ;;  %7565 = vmatpush3.bf16.msra.mxu1 %v8497_v28 }
 0x796   :  { %7538 = vmatprep.subr.bf16.mxu0 %v8501_v32  ;;  %7566 = vmatprep.subr.bf16.mxu1 %v9823_v40 }
 0x799   :  { %7540 = vmatpush1.bf16.msra.mxu0 %v8505_v29  ;;  %7568 = vmatpush3.bf16.msra.mxu1 %v8507_v58 }
 0x79a   :  { %v3390_v59 = vpop.f32.mrb[26].mxu0  ;;  %v3461_v16 = vpop.f32.mrb[44].mxu1  ;;  %7542 = vmatprep.subr.bf16.mxu0 %v8511_v11  ;;  %7569 = vmatprep.subr.bf16.mxu1 %v9823_v40 }
 0x79b   :  { %v7914_v63 = vadd.f32 %v9862_v46, %v3390_v59  ;;  %v3392_v41 = vpop.f32.mrb[27].mxu0  ;;  %v6033_v22 = vpop.f32.mrb[45].mxu1  ;;  %v3462_v44 = vadd.f32 %v3461_v16, %v8745_v19  ;;  %v10014_v16 = vld [vmem:[#allocation65_spill] sm:$0xff] }
 0x79c   :  { %v7916_v54 = vadd.f32 %v9867_v24, %v3392_v41  ;;  %v10017_v41 = vld [vmem:[#allocation68_spill] sm:$0xff]  ;;  %v10018_v22 = vld [vmem:[#allocation69_spill] sm:$0xff] }
 0x79d   :  { %v4809_v45 = vmul.f32 -1.442695, %v7914_v63  ;;  %7544 = vmatpush1.bf16.msra.mxu0 %v9825_v6  ;;  %7571 = vmatpush3.bf16.msra.mxu1 %v9826_v7  ;;  %v10015_v63 = vld [vmem:[#allocation66_spill] sm:$0xff] }
 0x79e   :  { %7546 = vmatprep.subr.bf16.mxu0 %v9863_v4  ;;  %7572 = vmatprep.subr.bf16.mxu1 %v9823_v40  ;;  %v4810_v37 = vmul.f32 -1.442695, %v7916_v54  ;;  %v10019_v54 = vld [vmem:[#allocation70_spill] sm:$0xff] }
 0x79f   :  { %8086 = vpow2.f32 %v4809_v45 }
 0x7a0   :  { %8088 = vpow2.f32 %v4810_v37  ;;  %v10020_v37 = vld [vmem:[#allocation71_spill] sm:$0xff] }
 0x7a1   :  { %7548 = vmatpush1.bf16.msra.mxu0 %v9864_v53  ;;  %7574 = vmatpush3.bf16.msra.mxu1 %v9900_v10 }
 0x7a2   :  { %7550 = vmatprep.subr.bf16.mxu0 %v9901_v23  ;;  %7575 = vmatprep.subr.bf16.mxu1 %v9823_v40 }
 0x7a5   :  { %7552 = vmatpush1.bf16.msra.mxu0 %v9868_v2  ;;  %7577 = vmatpush3.bf16.msra.mxu1 %v9869_v38 }
 0x7a6   :  { %7554 = vmatprep.subr.bf16.mxu0 %v9902_v15  ;;  %7578 = vmatprep.subr.bf16.mxu1 %v9823_v40 }
 0x7a9   :  { %v8087_v57 = vpop.eup %8086  ;;  %7556 = vmatpush1.bf16.msra.mxu0 %v9903_v34  ;;  %7580 = vmatpush3.bf16.msra.mxu1 %v9904_v61 }
 0x7aa   :  { %v3469_v47 = vadd.f32 1.0, %v8087_v57  ;;  %7582 = vmatprep.subr.bf16.mxu0 %v9905_v26  ;;  %7613 = vmatprep.subr.bf16.mxu1 %v9823_v40  ;;  %v8089_v21 = vpop.eup %8088  ;;  %v10021_v57 = vld [vmem:[#allocation72_spill] sm:$0xff] }
 0x7ab   :  { %v3476_v59 = vadd.f32 1.0, %v8089_v21 }
 0x7ac   :  { %8090 = vrcp.f32 %v3469_v47  ;;  %3712 = vmatmul.mubr.f32.vlgmr.msra.gmra.mrb[28].mxu0 %v9343_v5  ;;  %6102 = vmatmul.mubr.f32.vlgmr.msra.gmra.mrb[48].mxu1 %v9343_v5  ;;  %v10022_v47 = vld [vmem:[#allocation63_spill] sm:$0xff] }
 0x7ad   :  { %7584 = vmatpush1.bf16.msra.mxu0 %v9906_v17  ;;  %7615 = vmatpush3.bf16.msra.mxu1 %v9907_v25 }
 0x7ae   :  { %7586 = vmatprep.subr.bf16.mxu0 %v9938_v51  ;;  %7616 = vmatprep.subr.bf16.mxu1 %v9823_v40 }
 0x7af   :  { %3852 = vmatprep.mubr.f32.mxu0 %v9806_v1  ;;  %6136 = vmatprep.mubr.msk.f32.mxu1 %vm8214_vm0, %v9806_v1 }
 0x7b1   :  { %7588 = vmatpush1.bf16.msra.mxu0 %v9939_v20  ;;  %7618 = vmatpush3.bf16.msra.mxu1 %v9940_v62 }
 0x7b2   :  { %7590 = vmatprep.subr.bf16.mxu0 %v9941_v9  ;;  %7619 = vmatprep.subr.bf16.mxu1 %v9823_v40 }
 0x7b5   :  { %7592 = vmatpush1.bf16.msra.mxu0 %v9845_v42  ;;  %7621 = vmatpush3.bf16.msra.mxu1 %v9880_v56 }
 0x7b6   :  { %v8091_v55 = vpop.eup %8090  ;;  %7594 = vmatprep.subr.bf16.mxu0 %v9881_v0  ;;  %7622 = vmatprep.subr.bf16.mxu1 %v9823_v40 }
 0x7b7   :  { %v3479_v35 = vmul.f32 %v8091_v55, %v3462_v44 }
 0x7b9   :  { %v3480_v50 = vadd.f32 %v3479_v35, %v3321_v18  ;;  %7596 = vmatpush1.bf16.msra.mxu0 %v9848_v13  ;;  %7624 = vmatpush3.bf16.msra.mxu1 %v9849_v30  ;;  %v10023_v18 = vld [vmem:[#allocation73_spill] sm:$0xff]  ;;  %v10024_v35 = vld [vmem:[#allocation74_spill] sm:$0xff] }
 0x7ba   :  { %7598 = vmatprep.subr.bf16.mxu0 %v9850_v49  ;;  %7625 = vmatprep.subr.bf16.mxu1 %v9823_v40 }
 0x7bb   :  { %8092 = vtanh.f32 %v3480_v50 }
 0x7bc   :  { %8094 = vrcp.f32 %v3476_v59  ;;  %v10025_v59 = vld [vmem:[#allocation33_spill] sm:$0xff] }
 0x7bd   :  { %7600 = vmatpush1.bf16.msra.mxu0 %v8599_v43  ;;  %7627 = vmatpush3.bf16.msra.mxu1 %v10014_v16 }
 0x7be   :  { %7602 = vmatprep.subr.bf16.mxu0 %v10015_v63  ;;  %7628 = vmatprep.subr.bf16.mxu1 %v9823_v40 }
 0x7c1   :  { %7604 = vmatpush1.bf16.msra.mxu0 %v10016_v33  ;;  %7630 = vmatpush3.bf16.msra.mxu1 %v10017_v41 }
 0x7c2   :  { %7606 = vmatprep.subr.bf16.mxu0 %v10018_v22  ;;  %7631 = vmatprep.subr.bf16.mxu1 %v9823_v40 }
 0x7c5   :  { %v8093_v45 = vpop.eup %8092  ;;  %7608 = vmatpush1.bf16.msra.mxu0 %v10019_v54  ;;  %7633 = vmatpush3.bf16.msra.mxu1 %v10020_v37 }
 0x7c6   :  { %7610 = vmatprep.subr.bf16.mxu0 %v10021_v57  ;;  %7634 = vmatprep.subr.bf16.mxu1 %v9823_v40  ;;  %v3482_v21 = vsub.f32 %v10022_v47, %v8093_v45  ;;  %v8095_v44 = vpop.eup %8094 }
 0x7c8   :  { %v3483_v55 = vmul.f32 %v8095_v44, %v3482_v21  ;;  %v4268_v21 = vld [vmem:[#allocation5 + $0x20] sm:$0xff]  ;;  %v4269_v44 = vld [vmem:[#allocation5 + $0x28] sm:$0xff] }
 0x7c9   :  { %7612 = vmatpush1.bf16.msra.mxu0 %v10023_v18  ;;  %7636 = vmatpush3.bf16.msra.mxu1 %v10024_v35 }
 0x7ca   :  { %v9423_v50 = vadd.f32 %v8093_v45, %v3483_v55  ;;  %7638 = vmatprep.subr.bf16.mxu0 %v10025_v59  ;;  %7669 = vmatprep.subr.bf16.mxu1 %v9823_v40  ;;  %v4267_v45 = vld [vmem:[#allocation5 + $0x18] sm:$0xff]  ;;  %v10027_v55 = vld [vmem:[#allocation42_spill] sm:$0xff] }
 0x7cb   :  { %v4271_v59 = vld [vmem:[#allocation5 + $0x38] sm:$0xff] }
 0x7cc   :  { %3853 = vmatmul.mubr.f32.vlgmr.msra.gmra.mrb[28].mxu0 %v9423_v50  ;;  %6137 = vmatmul.mubr.f32.vlgmr.msra.gmra.mrb[50].mxu1 %v9423_v50 }
 0x7cd   :  { %7640 = vmatpush1.bf16.msra.mxu0 %v8470_v36  ;;  %7671 = vmatpush3.bf16.msra.mxu1 %v8472_v39 }
 0x7ce   :  { %7642 = vmatprep.subr.bf16.mxu0 %v8476_v48  ;;  %7672 = vmatprep.subr.bf16.mxu1 %v9823_v40 }
 0x7cf   :  { %4014 = vmatprep.mubr.f32.mxu0 %v9806_v1  ;;  %6171 = vmatprep.mubr.msk.f32.mxu1 %vm8214_vm0, %v9806_v1 }
 0x7d1   :  { %7644 = vmatpush1.bf16.msra.mxu0 %v8482_v60  ;;  %7674 = vmatpush3.bf16.msra.mxu1 %v8484_v3 }
 0x7d2   :  { %7646 = vmatprep.subr.bf16.mxu0 %v8488_v8  ;;  %7675 = vmatprep.subr.bf16.mxu1 %v9823_v40 }
 0x7d5   :  { %7648 = vmatpush1.bf16.msra.mxu0 %v8495_v27  ;;  %7677 = vmatpush3.bf16.msra.mxu1 %v8497_v28 }
 0x7d6   :  { %7650 = vmatprep.subr.bf16.mxu0 %v8501_v32  ;;  %7678 = vmatprep.subr.bf16.mxu1 %v9823_v40 }
 0x7d9   :  { %7652 = vmatpush1.bf16.msra.mxu0 %v8505_v29  ;;  %7680 = vmatpush3.bf16.msra.mxu1 %v8507_v58 }
 0x7da   :  { %7654 = vmatprep.subr.bf16.mxu0 %v8511_v11  ;;  %7681 = vmatprep.subr.bf16.mxu1 %v9823_v40 }
 0x7dd   :  { %7656 = vmatpush1.bf16.msra.mxu0 %v9825_v6  ;;  %7683 = vmatpush3.bf16.msra.mxu1 %v9826_v7 }
 0x7de   :  { %7658 = vmatprep.subr.bf16.mxu0 %v9863_v4  ;;  %7684 = vmatprep.subr.bf16.mxu1 %v9823_v40  ;;  %v10026_v4 = vld [vmem:[#allocation39_spill] sm:$0xff] }
 0x7e1   :  { %7660 = vmatpush1.bf16.msra.mxu0 %v9864_v53  ;;  %7686 = vmatpush3.bf16.msra.mxu1 %v9900_v10 }
 0x7e2   :  { %7662 = vmatprep.subr.bf16.mxu0 %v9901_v23  ;;  %7687 = vmatprep.subr.bf16.mxu1 %v9823_v40 }
 0x7e5   :  { %7664 = vmatpush1.bf16.msra.mxu0 %v9868_v2  ;;  %7689 = vmatpush3.bf16.msra.mxu1 %v9869_v38 }
 0x7e6   :  { %7666 = vmatprep.subr.bf16.mxu0 %v9902_v15  ;;  %7690 = vmatprep.subr.bf16.mxu1 %v9823_v40 }
 0x7e9   :  { %7668 = vmatpush1.bf16.msra.mxu0 %v9903_v34  ;;  %7692 = vmatpush3.bf16.msra.mxu1 %v9904_v61 }
 0x7ea   :  { %7694 = vmatprep.subr.bf16.mxu0 %v9905_v26  ;;  %7725 = vmatprep.subr.bf16.mxu1 %v9823_v40 }
 0x85f   :  { %v3552_v36 = vpop.f32.mrb[14].mxu0  ;;  %v3623_v39 = vpop.f32.mrb[46].mxu1 }
 0x860   :  { %v7890_v48 = vadd.f32 %v8455_v12, %v3552_v36  ;;  %v3554_v60 = vpop.f32.mrb[15].mxu0  ;;  %v6068_v3 = vpop.f32.mrb[47].mxu1  ;;  %v3624_v11 = vadd.f32 %v3623_v39, %v8466_v52  ;;  %v4272_v39 = vld [vmem:[#allocation5 + $0x40] sm:$0xff] }
 0x861   :  { %v7892_v27 = vadd.f32 %v8462_v31, %v3554_v60  ;;  %v4274_v3 = vld [vmem:[#allocation5 + $0x50] sm:$0xff] }
 0x862   :  { %v4811_v8 = vmul.f32 -1.442695, %v7890_v48  ;;  %v4273_v48 = vld [vmem:[#allocation5 + $0x48] sm:$0xff] }
 0x863   :  { %v4812_v28 = vmul.f32 -1.442695, %v7892_v27  ;;  %v7765_v60 = vpack.c.bf16 %v4273_v48, %v4272_v39 }
 0x864   :  { %8096 = vpow2.f32 %v4811_v8  ;;  %v4275_v8 = vld [vmem:[#allocation5 + $0x58] sm:$0xff] }
 0x865   :  { %8098 = vpow2.f32 %v4812_v28  ;;  %v7769_v27 = vpack.c.bf16 %v4275_v8, %v4274_v3  ;;  %v4276_v28 = vld [vmem:[#allocation5 + $0x60] sm:$0xff] }
 0x86e   :  { %v8097_v32 = vpop.eup %8096 }
 0x86f   :  { %v3631_v29 = vadd.f32 1.0, %v8097_v32  ;;  %v8099_v58 = vpop.eup %8098  ;;  %v4277_v32 = vld [vmem:[#allocation5 + $0x68] sm:$0xff] }
 0x870   :  { %v3638_v2 = vadd.f32 1.0, %v8099_v58  ;;  %v4278_v58 = vld [vmem:[#allocation5 + $0x70] sm:$0xff] }
 0x871   :  { %8100 = vrcp.f32 %v3631_v29  ;;  %v7773_v29 = vpack.c.bf16 %v4277_v32, %v4276_v28 }
 0x87b   :  { %v8101_v6 = vpop.eup %8100 }
 0x87c   :  { %v3641_v7 = vmul.f32 %v8101_v6, %v3624_v11  ;;  %v4279_v11 = vld [vmem:[#allocation5 + $0x78] sm:$0xff] }
 0x87d   :  { %v7777_v6 = vpack.c.bf16 %v4279_v11, %v4278_v58 }
 0x87e   :  { %v3642_v53 = vadd.f32 %v3641_v7, %v10026_v4  ;;  %v10028_v7 = vld [vmem:[#allocation34_spill] sm:$0xff]  ;;  %v10029_v4 = vld [vmem:[#allocation59_spill] sm:$0xff] }
 0x87f   :  { %v9468_v12 = vpop.f32.mrb[48].mxu1 }
 0x880   :  { %8102 = vtanh.f32 %v3642_v53  ;;  %v6103_v38 = vpop.f32.mrb[49].mxu1  ;;  %v10030_v53 = vld [vmem:[#allocation62_spill] sm:$0xff] }
 0x881   :  { %8104 = vrcp.f32 %v3638_v2  ;;  %v4415_v2 = vld [vmem:[#allocation5 + $0x88] sm:$0xff] }
 0x88a   :  { %v8103_v10 = vpop.eup %8102 }
 0x88b   :  { %v3644_v31 = vsub.f32 %v9343_v5, %v8103_v10  ;;  %v8105_v23 = vpop.eup %8104 }
 0x88d   :  { %v3645_v15 = vmul.f32 %v8105_v23, %v3644_v31  ;;  %v4418_v31 = vld [vmem:[#allocation5 + $0xa0] sm:$0xff] }
 0x88f   :  { %v3646_v34 = vadd.f32 %v8103_v10, %v3645_v15  ;;  %v4417_v10 = vld [vmem:[#allocation5 + $0x98] sm:$0xff]  ;;  %v4419_v15 = vld [vmem:[#allocation5 + $0xa8] sm:$0xff] }
 0x890   :  { %v7785_v23 = vpack.c.bf16 %v4418_v31, %v4417_v10 }
 0x891   :  { %4015 = vmatmul.mubr.f32.vlgmr.msra.gmra.mrb[30].mxu0 %v3646_v34  ;;  %4253 = vst [vmem:[%s9617_s5] sm:$0xff] %v3646_v34  ;;  %6172 = vmatmul.mubr.f32.vlgmr.msra.gmra.mrb[52].mxu1 %v3646_v34  ;;  %v4420_v34 = vld [vmem:[#allocation5 + $0xb0] sm:$0xff] }
 0x892   :  { %7696 = vmatpush1.bf16.msra.mxu0 %v9906_v17  ;;  %7727 = vmatpush3.bf16.msra.mxu1 %v9907_v25 }
 0x893   :  { %7698 = vmatprep.subr.bf16.mxu0 %v9938_v51  ;;  %7728 = vmatprep.subr.bf16.mxu1 %v9823_v40 }
 0x894   :  { %4155 = vmatprep.mubr.f32.mxu0 %v9806_v1  ;;  %6206 = vmatprep.mubr.msk.f32.mxu1 %vm8214_vm0, %v9806_v1 }
 0x896   :  { %7700 = vmatpush1.bf16.msra.mxu0 %v9939_v20  ;;  %7730 = vmatpush3.bf16.msra.mxu1 %v9940_v62 }
 0x897   :  { %7702 = vmatprep.subr.bf16.mxu0 %v9941_v9  ;;  %7731 = vmatprep.subr.bf16.mxu1 %v9823_v40  ;;  %v3785_v9 = vadd.f32 %v9468_v12, %v8755_v14  ;;  %v4416_v12 = vld [vmem:[#allocation5 + $0x90] sm:$0xff] }
 0x898   :  { %v7781_v38 = vpack.c.bf16 %v4416_v12, %v4415_v2  ;;  %v9553_v2 = vld [vmem:[#allocation5 + $0x80] ss:$0 sm:$0xff] }
 0x89a   :  { %7704 = vmatpush1.bf16.msra.mxu0 %v9845_v42  ;;  %7733 = vmatpush3.bf16.msra.mxu1 %v9880_v56 }
 0x89b   :  { %7706 = vmatprep.subr.bf16.mxu0 %v9881_v0  ;;  %7734 = vmatprep.subr.bf16.mxu1 %v9823_v40 }
 0x89e   :  { %7708 = vmatpush1.bf16.msra.mxu0 %v9848_v13  ;;  %7736 = vmatpush3.bf16.msra.mxu1 %v9849_v30  ;;  %v4264_v30 = vld [vmem:[#allocation5] sm:$0xff] }
 0x89f   :  { %v3854_v52 = vpop.f32.mrb[28].mxu0  ;;  %v3925_v1 = vpop.f32.mrb[50].mxu1  ;;  %7710 = vmatprep.subr.bf16.mxu0 %v9850_v49  ;;  %7737 = vmatprep.subr.bf16.mxu1 %v9823_v40  ;;  %v4265_v49 = vld [vmem:[#allocation5 + $0x8] sm:$0xff] }
 0x8a0   :  { %v7918_v61 = vadd.f32 %v9862_v46, %v3854_v52  ;;  %v3856_v26 = vpop.f32.mrb[29].mxu0  ;;  %v6138_v42 = vpop.f32.mrb[51].mxu1  ;;  %v3926_v20 = vadd.f32 %v3925_v1, %v8745_v19  ;;  %v7789_v52 = vpack.c.bf16 %v4420_v34, %v4419_v15  ;;  %v4422_v1 = vld [vmem:[#allocation5 + $0xc0] sm:$0xff] }
 0x8a1   :  { %v7920_v13 = vadd.f32 %v9867_v24, %v3856_v26  ;;  %v4424_v26 = vld [vmem:[#allocation5 + $0xd0] sm:$0xff] }
 0x8a2   :  { %v4813_v17 = vmul.f32 -1.442695, %v7918_v61  ;;  %7712 = vmatpush1.bf16.msra.mxu0 %v8599_v43  ;;  %7739 = vmatpush3.bf16.msra.mxu1 %v10014_v16  ;;  %v7749_v43 = vpack.c.bf16 %v4265_v49, %v4264_v30  ;;  %v4423_v61 = vld [vmem:[#allocation5 + $0xc8] sm:$0xff] }
 0x8a3   :  { %7714 = vmatprep.subr.bf16.mxu0 %v10015_v63  ;;  %7740 = vmatprep.subr.bf16.mxu1 %v9823_v40  ;;  %v4814_v0 = vmul.f32 -1.442695, %v7920_v13  ;;  %v7797_v42 = vpack.c.bf16 %v4424_v26, %v4423_v61  ;;  %v4426_v13 = vld [vmem:[#allocation5 + $0xe0] sm:$0xff]  ;;  %v4427_v49 = vld [vmem:[#allocation5 + $0xe8] sm:$0xff] }
 0x8a4   :  { %8106 = vpow2.f32 %v4813_v17  ;;  %v4425_v17 = vld [vmem:[#allocation5 + $0xd8] sm:$0xff] }
 0x8a5   :  { %8108 = vpow2.f32 %v4814_v0  ;;  %v7801_v30 = vpack.c.bf16 %v4426_v13, %v4425_v17 }
 0x8a6   :  { %7716 = vmatpush1.bf16.msra.mxu0 %v10016_v33  ;;  %7742 = vmatpush3.bf16.msra.mxu1 %v10017_v41 }
 0x8a7   :  { %7718 = vmatprep.subr.bf16.mxu0 %v10018_v22  ;;  %7743 = vmatprep.subr.bf16.mxu1 %v9823_v40  ;;  %v4266_v22 = vld [vmem:[#allocation5 + $0x10] sm:$0xff] }
 0x8aa   :  { %7720 = vmatpush1.bf16.msra.mxu0 %v10019_v54  ;;  %7745 = vmatpush3.bf16.msra.mxu1 %v10020_v37 }
 0x8ab   :  { %7722 = vmatprep.subr.bf16.mxu0 %v10021_v57  ;;  %7746 = vmatprep.subr.bf16.mxu1 %v9823_v40  ;;  %v7753_v57 = vpack.c.bf16 %v4267_v45, %v4266_v22  ;;  %v4572_v22 = vld [vmem:[#allocation5 + $0x140] sm:$0xff]  ;;  %v4573_v45 = vld [vmem:[#allocation5 + $0x148] sm:$0xff] }
 0x8ae   :  { %v8107_v56 = vpop.eup %8106  ;;  %7724 = vmatpush1.bf16.msra.mxu0 %v10023_v18  ;;  %7748 = vmatpush3.bf16.msra.mxu1 %v10024_v35  ;;  %v7757_v18 = vpack.c.bf16 %v4269_v44, %v4268_v21  ;;  %v4270_v35 = vld [vmem:[#allocation5 + $0x30] sm:$0xff]  ;;  %v4575_v21 = vld [vmem:[#allocation5 + $0x158] sm:$0xff] }
 0x8af   :  { %v3933_v25 = vadd.f32 1.0, %v8107_v56  ;;  %7750 = vmatprep.subr.bf16.mxu0 %v7749_v43  ;;  %v8109_v51 = vpop.eup %8108  ;;  %v7761_v36 = vpack.c.bf16 %v4271_v59, %v4270_v35  ;;  %7782 = vmatprep.subr.bf16.mxu1 %v7781_v38  ;;  %v4429_v56 = vld [vmem:[#allocation5 + $0xf8] sm:$0xff]  ;;  %v4577_v35 = vld [vmem:[#allocation5 + $0x168] sm:$0xff] }
 0x8b0   :  { %v3940_v16 = vadd.f32 1.0, %v8109_v51 }
 0x8b1   :  { %8110 = vrcp.f32 %v3933_v25  ;;  %v4430_v25 = vld [vmem:[#allocation5 + $0x100] sm:$0xff] }
 0x8b2   :  { %v7809_v51 = vpack.c.bf16 %v4430_v25, %v4429_v56 }
 0x8bb   :  { %v8111_v62 = vpop.eup %8110 }
 0x8bc   :  { %v3943_v5 = vmul.f32 %v8111_v62, %v3926_v20  ;;  %v4566_v20 = vld [vmem:[#allocation5 + $0x110] sm:$0xff]  ;;  %v4567_v62 = vld [vmem:[#allocation5 + $0x118] sm:$0xff] }
 0x8be   :  { %v3944_v40 = vadd.f32 %v3943_v5, %v3785_v9  ;;  %v4568_v9 = vld [vmem:[#allocation5 + $0x120] sm:$0xff]  ;;  %v9524_v5 = vpack.c.bf16 %v4567_v62, %v4566_v20 }
 0x8c0   :  { %8112 = vtanh.f32 %v3944_v40  ;;  %v4569_v40 = vld [vmem:[#allocation5 + $0x128] sm:$0xff] }
 0x8c1   :  { %8114 = vrcp.f32 %v3940_v16  ;;  %v9526_v16 = vpack.c.bf16 %v4569_v40, %v4568_v9  ;;  %v4579_v40 = vld [vmem:[#allocation5 + $0x178] sm:$0xff] }
 0x8ca   :  { %v8113_v63 = vpop.eup %8112 }
 0x8cb   :  { %v3946_v33 = vsub.f32 %v9423_v50, %v8113_v63  ;;  %v8115_v41 = vpop.eup %8114 }
 0x8cd   :  { %v3947_v54 = vmul.f32 %v8115_v41, %v3946_v33  ;;  %v4571_v33 = vld [vmem:[#allocation5 + $0x138] sm:$0xff] }
 0x8cf   :  { %v9513_v37 = vadd.f32 %v8113_v63, %v3947_v54  ;;  %v4570_v63 = vld [vmem:[#allocation5 + $0x130] sm:$0xff]  ;;  %v9536_v54 = vpack.c.bf16 %v4573_v45, %v4572_v22  ;;  %v9576_v22 = vld [vmem:[#allocation5 + $0x108] ss:$0 sm:$0xff] }
 0x8d0   :  { %v9532_v41 = vpack.c.bf16 %v4571_v33, %v4570_v63  ;;  %v4580_v63 = vld [vmem:[#allocation5 + $0x180] sm:$0xff]  ;;  %v4581_v33 = vld [vmem:[#allocation5 + $0x188] sm:$0xff] }
 0x8d1   :  { %4156 = vmatmul.mubr.f32.vlgmr.msra.gmra.mrb[30].mxu0 %v9513_v37  ;;  %6207 = vmatmul.mubr.f32.vlgmr.msra.gmra.mrb[54].mxu1 %v9513_v37 }
 0x8d2   :  { %7752 = vmatpush3.bf16.msra.mxu0 %v7749_v43  ;;  %6241 = vmatprep.mubr.f32.mxu0 %v10027_v55  ;;  %v4428_v43 = vld [vmem:[#allocation5 + $0xf0] sm:$0xff] }
 0x8d3   :  { %7754 = vmatprep.subr.bf16.mxu0 %v7753_v57  ;;  %7784 = vmatpush3.bf16.msra.mxu1 %v7781_v38  ;;  %v7805_v0 = vpack.c.bf16 %v4428_v43, %v4427_v49 }
 0x8d4   :  { %7786 = vmatprep.subr.bf16.mxu1 %v7785_v23 }
 0x8d6   :  { %7756 = vmatpush3.bf16.msra.mxu0 %v7753_v57  ;;  %v4574_v57 = vld [vmem:[#allocation5 + $0x150] sm:$0xff] }
 0x8d7   :  { %7758 = vmatprep.subr.bf16.mxu0 %v7757_v18  ;;  %7788 = vmatpush3.bf16.msra.mxu1 %v7785_v23  ;;  %v9540_v44 = vpack.c.bf16 %v4575_v21, %v4574_v57 }
 0x8d8   :  { %7790 = vmatprep.subr.bf16.mxu1 %v7789_v52 }
 0x8da   :  { %7760 = vmatpush3.bf16.msra.mxu0 %v7757_v18  ;;  %v4576_v18 = vld [vmem:[#allocation5 + $0x160] sm:$0xff] }
 0x8db   :  { %7762 = vmatprep.subr.bf16.mxu0 %v7761_v36  ;;  %7792 = vmatpush3.bf16.msra.mxu1 %v7789_v52 }
 0x8de   :  { %7764 = vmatpush3.bf16.msra.mxu0 %v7761_v36  ;;  %v9544_v36 = vpack.c.bf16 %v4577_v35, %v4576_v18 }
 0x8df   :  { %7766 = vmatprep.subr.bf16.mxu0 %v7765_v60 }
 0x8e2   :  { %7768 = vmatpush3.bf16.msra.mxu0 %v7765_v60 }
 0x8e3   :  { %7770 = vmatprep.subr.bf16.mxu0 %v7769_v27 }
 0x8e6   :  { %7772 = vmatpush3.bf16.msra.mxu0 %v7769_v27 }
 0x8e7   :  { %7774 = vmatprep.subr.bf16.mxu0 %v7773_v29 }
 0x8ea   :  { %7776 = vmatpush3.bf16.msra.mxu0 %v7773_v29 }
 0x8eb   :  { %7778 = vmatprep.subr.bf16.mxu0 %v7777_v6 }
 0x8ee   :  { %7780 = vmatpush3.bf16.msra.mxu0 %v7777_v6 }
 0x8ef   :  { %7814 = vmatprep.subr.bf16.mxu0 %v9524_v5 }
 0x8f1   :  { %6242 = vmatmul.mubr.f32.vlgmr.msra.gmra.mrb[32].mxu0 %v10028_v7 }
 0x8f2   :  { %6244 = vmatprep.mubr.f32.mxu0 %v10029_v4  ;;  %7816 = vmatpush3.bf16.msra.mxu0 %v9524_v5 }
 0x8f3   :  { %7818 = vmatprep.subr.bf16.mxu0 %v9526_v16 }
 0x8f5   :  { %6245 = vmatmul.mubr.f32.gmra.mrb[34].mxu0 %v10030_v53 }
 0x8f6   :  { %6247 = vmatprep.mubr.f32.mxu0 %v10022_v47  ;;  %v4421_v47 = vld [vmem:[#allocation5 + $0xb8] sm:$0xff]  ;;  %7820 = vmatpush3.bf16.msra.mxu0 %v9526_v16 }
 0x8f7   :  { %7822 = vmatprep.subr.bf16.mxu0 %v9532_v41 }
 0x8f9   :  { %6248 = vmatmul.mubr.f32.gmra.mrb[36].mxu0 %v9423_v50  ;;  %v7793_v50 = vpack.c.bf16 %v4422_v1, %v4421_v47 }
 0x8fa   :  { %6250 = vmatprep.mubr.f32.mxu0 %v9513_v37  ;;  %7824 = vmatpush3.bf16.msra.mxu0 %v9532_v41 }
 0x8fb   :  { %7794 = vmatprep.subr.bf16.mxu1 %v7793_v50  ;;  %7826 = vmatprep.subr.bf16.mxu0 %v9536_v54 }
 0x8fc   :  { %7796 = vmatpush3.bf16.msra.mxu1 %v7793_v50 }
 0x8fd   :  { %7798 = vmatprep.subr.bf16.mxu1 %v7797_v42 }
 0x8fe   :  { %7828 = vmatpush3.bf16.msra.mxu0 %v9536_v54 }
 0x8ff   :  { %7830 = vmatprep.subr.bf16.mxu0 %v9540_v44 }
 0x900   :  { %7800 = vmatpush3.bf16.msra.mxu1 %v7797_v42 }
 0x901   :  { %7802 = vmatprep.subr.bf16.mxu1 %v7801_v30 }
 0x902   :  { %7832 = vmatpush3.bf16.msra.mxu0 %v9540_v44 }
 0x903   :  { %7834 = vmatprep.subr.bf16.mxu0 %v9544_v36 }
 0x904   :  { %7804 = vmatpush3.bf16.msra.mxu1 %v7801_v30 }
 0x905   :  { %7806 = vmatprep.subr.bf16.mxu1 %v7805_v0 }
 0x906   :  { %7836 = vmatpush3.bf16.msra.mxu0 %v9544_v36 }
 0x908   :  { %7808 = vmatpush3.bf16.msra.mxu1 %v7805_v0 }
 0x909   :  { %7810 = vmatprep.subr.bf16.mxu1 %v7809_v51 }
 0x90c   :  { %7812 = vmatpush3.bf16.msra.mxu1 %v7809_v51 }
 0x90d   :  { %7845 = vmatprep.subr.bf16.mxu1 %v9524_v5 }
 0x964   :  { %v4087_v55 = vpop.f32.mrb[52].mxu1 }
 0x965   :  { %v6173_v59 = vpop.f32.mrb[53].mxu1  ;;  %v4088_v4 = vadd.f32 %v4087_v55, %v8755_v14 }
 0x9a4   :  { %v4157_v39 = vpop.f32.mrb[30].mxu0  ;;  %v4228_v48 = vpop.f32.mrb[54].mxu1 }
 0x9a5   :  { %v7922_v60 = vadd.f32 %v9862_v46, %v4157_v39  ;;  %v4159_v3 = vpop.f32.mrb[31].mxu0  ;;  %v6208_v8 = vpop.f32.mrb[55].mxu1  ;;  %v4229_v6 = vadd.f32 %v4228_v48, %v8745_v19 }
 0x9a6   :  { %v7924_v28 = vadd.f32 %v9867_v24, %v4159_v3 }
 0x9a7   :  { %v4815_v27 = vmul.f32 -1.442695, %v7922_v60 }
 0x9a8   :  { %v4816_v32 = vmul.f32 -1.442695, %v7924_v28 }
 0x9a9   :  { %8116 = vpow2.f32 %v4815_v27 }
 0x9aa   :  { %8118 = vpow2.f32 %v4816_v32 }
 0x9b3   :  { %v8117_v29 = vpop.eup %8116 }
 0x9b4   :  { %v4236_v58 = vadd.f32 1.0, %v8117_v29  ;;  %v8119_v11 = vpop.eup %8118 }
 0x9b5   :  { %v4243_v12 = vadd.f32 1.0, %v8119_v11 }
 0x9b6   :  { %8120 = vrcp.f32 %v4236_v58 }
 0x9c0   :  { %v8121_v7 = vpop.eup %8120 }
 0x9c1   :  { %v4246_v53 = vmul.f32 %v8121_v7, %v4229_v6 }
 0x9c3   :  { %v4247_v46 = vadd.f32 %v4246_v53, %v4088_v4 }
 0x9c4   :  { %v6243_v38 = vpop.f32.mrb[32].mxu0 }
 0x9c5   :  { %8122 = vtanh.f32 %v4247_v46  ;;  %v4357_v24 = vadd.f32 %v6243_v38, %v9553_v2  ;;  %v4351_v10 = vpop.f32.mrb[33].mxu0 }
 0x9c6   :  { %v4352_v31 = vadd.f32 %v9553_v2, %v4351_v10  ;;  %8124 = vrcp.f32 %v4243_v12 }
 0x9c7   :  { %v4399_v23 = vmul.f32 0.01, %v4357_v24  ;;  %vm4391_vm1 = vcmp.gt.f32.partialorder %v4357_v24, 0.0 }
 0x9c8   :  { %v4398_v15 = vmul.f32 0.01, %v4352_v31  ;;  %v6246_v19 = vpop.f32.mrb[34].mxu0  ;;  %vm4390_vm2 = vcmp.gt.f32.partialorder %v4352_v31, 0.0 }
 0x9c9   :  { %v4367_v14 = vadd.f32 %v6246_v19, %v9553_v2  ;;  %v4361_v34 = vpop.f32.mrb[35].mxu0  ;;  %v4407_v50 = vsel %vm4391_vm1, %v4357_v24, %v4399_v23 }
 0x9ca   :  { %v4362_v52 = vadd.f32 %v9553_v2, %v4361_v34  ;;  %v4406_v47 = vsel %vm4390_vm2, %v4352_v31, %v4398_v15 }
 0x9cb   :  { %v4401_v1 = vmul.f32 0.01, %v4367_v14  ;;  %6285 = vmatprep.mubr.f32.mxu1 %v4406_v47  ;;  %vm4393_vm4 = vcmp.gt.f32.partialorder %v4367_v14, 0.0 }
 0x9cc   :  { %v4400_v61 = vmul.f32 0.01, %v4362_v52  ;;  %v6249_v26 = vpop.f32.mrb[36].mxu0  ;;  %6286 = vmatmul.mubr.f32.vlgmr.msra.gmra.mrb[56].mxu1 %v4407_v50  ;;  %vm4392_vm3 = vcmp.gt.f32.partialorder %v4362_v52, 0.0 }
 0x9cd   :  { %v4377_v42 = vadd.f32 %v6249_v26, %v9553_v2  ;;  %v4371_v17 = vpop.f32.mrb[37].mxu0  ;;  %7853 = vmatpush3.bf16.msra.mxu1 %v9524_v5  ;;  %v4409_v0 = vsel %vm4393_vm4, %v4367_v14, %v4401_v1 }
 0x9ce   :  { %v4372_v13 = vadd.f32 %v9553_v2, %v4371_v17  ;;  %v4408_v30 = vsel %vm4392_vm3, %v4362_v52, %v4400_v61  ;;  %7846 = vmatprep.subr.bf16.mxu1 %v9526_v16 }
 0x9cf   :  { %v8123_v49 = vpop.eup %8122  ;;  %v4403_v43 = vmul.f32 0.01, %v4377_v42  ;;  %6288 = vmatprep.mubr.f32.mxu1 %v4408_v30  ;;  %vm4395_vm6 = vcmp.gt.f32.partialorder %v4377_v42, 0.0 }
 0x9d0   :  { %v4402_v56 = vmul.f32 0.01, %v4372_v13  ;;  %6289 = vmatmul.mubr.f32.gmra.mrb[58].mxu1 %v4409_v0  ;;  %vm4394_vm5 = vcmp.gt.f32.partialorder %v4372_v13, 0.0  ;;  %v4249_v25 = vsub.f32 %v9513_v37, %v8123_v49  ;;  %v8125_v51 = vpop.eup %8124  ;;  %v4578_v37 = vld [vmem:[#allocation5 + $0x170] sm:$0xff] }
 0x9d1   :  { %7854 = vmatpush3.bf16.msra.mxu1 %v9526_v16  ;;  %v4411_v9 = vsel %vm4395_vm6, %v4377_v42, %v4403_v43  ;;  %v7837_v16 = vpack.c.bf16 %v4579_v40, %v4578_v37 }
 0x9d2   :  { %v4410_v20 = vsel %vm4394_vm5, %v4372_v13, %v4402_v56  ;;  %v4250_v62 = vmul.f32 %v8125_v51, %v4249_v25  ;;  %7847 = vmatprep.subr.bf16.mxu1 %v9532_v41 }
 0x9d3   :  { %6291 = vmatprep.mubr.f32.mxu1 %v4410_v20  ;;  %7838 = vmatprep.subr.bf16.mxu0 %v7837_v16 }
 0x9d4   :  { %6292 = vmatmul.mubr.f32.gmra.mrb[60].mxu1 %v4411_v9  ;;  %v4251_v5 = vadd.f32 %v8123_v49, %v4250_v62  ;;  %7840 = vmatpush3.bf16.msra.mxu0 %v7837_v16 }
 0x9d5   :  { %7855 = vmatpush3.bf16.msra.mxu1 %v9532_v41  ;;  %v7841_v41 = vpack.c.bf16 %v4581_v33, %v4580_v63 }
 0x9d6   :  { %4817 = vst [vmem:[%s9617_s5 + $0x8] sm:$0xff] %v4251_v5  ;;  %6251 = vmatmul.mubr.f32.gmra.mrb[38].mxu0 %v4251_v5  ;;  %7848 = vmatprep.subr.bf16.mxu1 %v9536_v54 }
 0x9d7   :  { %7842 = vmatprep.subr.bf16.mxu0 %v7841_v41 }
 0x9d8   :  { %7844 = vmatpush3.bf16.msra.mxu0 %v7841_v41 }
 0x9d9   :  { %7856 = vmatpush3.bf16.msra.mxu1 %v9536_v54 }
 0x9da   :  { %7849 = vmatprep.subr.bf16.mxu1 %v9540_v44 }
 0x9dd   :  { %7857 = vmatpush3.bf16.msra.mxu1 %v9540_v44 }
 0x9de   :  { %7850 = vmatprep.subr.bf16.mxu1 %v9544_v36 }
 0x9e1   :  { %7858 = vmatpush3.bf16.msra.mxu1 %v9544_v36 }
 0x9e2   :  { %7851 = vmatprep.subr.bf16.mxu1 %v7837_v16 }
 0x9e5   :  { %7859 = vmatpush3.bf16.msra.mxu1 %v7837_v16 }
 0x9e6   :  { %7852 = vmatprep.subr.bf16.mxu1 %v7841_v41 }
 0x9e9   :  { %7860 = vmatpush3.bf16.msra.mxu1 %v7841_v41 }
 0xa9f   :  { %v6287_v45 = vpop.f32.mrb[56].mxu1 }
 0xaa0   :  { %v4508_v54 = vadd.f32 %v6287_v45, %v9576_v22  ;;  %v4502_v57 = vpop.f32.mrb[57].mxu1 }
 0xaa1   :  { %v4503_v21 = vadd.f32 %v9576_v22, %v4502_v57 }
 0xaa2   :  { %v4550_v44 = vmul.f32 0.01, %v4508_v54  ;;  %vm4542_vm7 = vcmp.gt.f32.partialorder %v4508_v54, 0.0 }
 0xaa3   :  { %v4549_v55 = vmul.f32 0.01, %v4503_v21  ;;  %v6290_v18 = vpop.f32.mrb[58].mxu1  ;;  %vm4541_vm8 = vcmp.gt.f32.partialorder %v4503_v21, 0.0 }
 0xaa4   :  { %v4518_v35 = vadd.f32 %v6290_v18, %v9576_v22  ;;  %v4512_v59 = vpop.f32.mrb[59].mxu1  ;;  %v4558_v48 = vsel %vm4542_vm7, %v4508_v54, %v4550_v44 }
 0xaa5   :  { %v4513_v36 = vadd.f32 %v9576_v22, %v4512_v59  ;;  %v4557_v39 = vsel %vm4541_vm8, %v4503_v21, %v4549_v55 }
 0xaa6   :  { %v4552_v60 = vmul.f32 0.01, %v4518_v35  ;;  %6329 = vmatprep.mubr.f32.mxu0 %v4557_v39  ;;  %vm4544_vm10 = vcmp.gt.f32.partialorder %v4518_v35, 0.0 }
 0xaa7   :  { %v4551_v3 = vmul.f32 0.01, %v4513_v36  ;;  %v6293_v8 = vpop.f32.mrb[60].mxu1  ;;  %6330 = vmatmul.mubr.f32.vlgmr.msra.gmra.mrb[40].mxu0 %v4558_v48  ;;  %vm4543_vm9 = vcmp.gt.f32.partialorder %v4513_v36, 0.0 }
 0xaa8   :  { %v4522_v27 = vpop.f32.mrb[61].mxu1  ;;  %v4560_v6 = vsel %vm4544_vm10, %v4518_v35, %v4552_v60  ;;  %v4528_v4 = vadd.f32 %v6293_v8, %v9576_v22 }
 0xaa9   :  { %v4523_v28 = vadd.f32 %v9576_v22, %v4522_v27  ;;  %v6252_v32 = vpop.f32.mrb[38].mxu0  ;;  %v4559_v29 = vsel %vm4543_vm9, %v4513_v36, %v4551_v3 }
 0xaaa   :  { %v4387_v58 = vadd.f32 %v6252_v32, %v9553_v2  ;;  %6332 = vmatprep.mubr.f32.mxu0 %v4559_v29  ;;  %v4381_v11 = vpop.f32.mrb[39].mxu0  ;;  %v4554_v24 = vmul.f32 0.01, %v4528_v4  ;;  %vm4546_vm14 = vcmp.gt.f32.partialorder %v4528_v4, 0.0 }
 0xaab   :  { %v4382_v7 = vadd.f32 %v9553_v2, %v4381_v11  ;;  %6333 = vmatmul.mubr.f32.gmra.mrb[42].mxu0 %v4560_v6  ;;  %v4553_v46 = vmul.f32 0.01, %v4523_v28  ;;  %vm4545_vm13 = vcmp.gt.f32.partialorder %v4523_v28, 0.0  ;;  %v4820_v2 = vld [vmem:[#allocation5 + $0x190] ss:$0 sm:$0xff] }
 0xaac   :  { %v4405_v53 = vmul.f32 0.01, %v4387_v58  ;;  %vm4397_vm12 = vcmp.gt.f32.partialorder %v4387_v58, 0.0  ;;  %v4562_v23 = vsel %vm4546_vm14, %v4528_v4, %v4554_v24 }
 0xaad   :  { %v4404_v12 = vmul.f32 0.01, %v4382_v7  ;;  %vm4396_vm11 = vcmp.gt.f32.partialorder %v4382_v7, 0.0  ;;  %v4561_v31 = vsel %vm4545_vm13, %v4523_v28, %v4553_v46 }
 0xaae   :  { %v4413_v10 = vsel %vm4397_vm12, %v4387_v58, %v4405_v53 }
 0xaaf   :  { %v4412_v38 = vsel %vm4396_vm11, %v4382_v7, %v4404_v12 }
 0xab0   :  { %6294 = vmatprep.mubr.f32.mxu1 %v4412_v38 }
 0xab1   :  { %6295 = vmatmul.mubr.f32.gmra.mrb[62].mxu1 %v4413_v10 }
 0xab2   :  { %6335 = vmatprep.mubr.f32.mxu1 %v4561_v31 }
 0xab5   :  { %6336 = vmatmul.mubr.f32.vlgmr.msra.gmra.mrb[64].mxu1 %v4562_v23 }
 0xb7a   :  { %v6331_v15 = vpop.f32.mrb[40].mxu0 }
 0xb7b   :  { %v4659_v19 = vadd.f32 %v6331_v15, %v4820_v2  ;;  %v4653_v14 = vpop.f32.mrb[41].mxu0 }
 0xb7c   :  { %v4654_v52 = vadd.f32 %v4820_v2, %v4653_v14 }
 0xb7d   :  { %4694 = vmax.xlane.f32.xlu0 %v4659_v19 }
 0xb7e   :  { %v6334_v34 = vpop.f32.mrb[42].mxu0 }
 0xb7f   :  { %v4669_v47 = vadd.f32 %v6334_v34, %v4820_v2  ;;  %v4663_v1 = vpop.f32.mrb[43].mxu0 }
 0xb80   :  { %v4664_v50 = vadd.f32 %v4820_v2, %v4663_v1 }
 0xb81   :  { %4698 = vmax.xlane.f32.xlu1 %v4669_v47  ;;  %4692 = vmax.xlane.f32.xlu0 %v4654_v52 }
 0xb84   :  { %v6296_v61 = vpop.f32.mrb[62].mxu1 }
 0xb85   :  { %4696 = vmax.xlane.f32.xlu1 %v4664_v50  ;;  %v4538_v26 = vadd.f32 %v6296_v61, %v9576_v22  ;;  %v4532_v42 = vpop.f32.mrb[63].mxu1 }
 0xb86   :  { %v4533_v17 = vadd.f32 %v9576_v22, %v4532_v42 }
 0xb87   :  { %v4556_v13 = vmul.f32 0.01, %v4538_v26  ;;  %vm4548_vm0 = vcmp.gt.f32.partialorder %v4538_v26, 0.0 }
 0xb88   :  { %v4555_v30 = vmul.f32 0.01, %v4533_v17  ;;  %v6337_v49 = vpop.f32.mrb[64].mxu1  ;;  %vm4547_vm15 = vcmp.gt.f32.partialorder %v4533_v17, 0.0 }
 0xb89   :  { %v4679_v43 = vadd.f32 %v6337_v49, %v4820_v2  ;;  %v4673_v0 = vpop.f32.mrb[65].mxu1  ;;  %v4564_v51 = vsel %vm4548_vm0, %v4538_v26, %v4556_v13 }
 0xb8a   :  { %v4674_v56 = vadd.f32 %v4820_v2, %v4673_v0  ;;  %v4563_v25 = vsel %vm4547_vm15, %v4533_v17, %v4555_v30 }
 0xb8b   :  { %4702 = vmax.xlane.f32.xlu1 %v4679_v43  ;;  %6338 = vmatprep.mubr.f32.mxu1 %v4563_v25 }
 0xb8c   :  { %4700 = vmax.xlane.f32.xlu0 %v4674_v56  ;;  %6339 = vmatmul.mubr.f32.gmra.mrb[66].mxu1 %v4564_v51 }
 0xc0a   :  { %v4695_v20 = vpop.xlane.xlu0 %4694 }
 0xc0b   :  { %v4709_v5 = vsub.f32 %v4659_v19, %v4695_v20 }
 0xc0d   :  { %v4718_v16 = vmul.f32 1.442695, %v4709_v5 }
 0xc0e   :  { %v4699_v62 = vpop.xlane.xlu1 %4698  ;;  %v4693_v9 = vpop.xlane.xlu0 %4692 }
 0xc0f   :  { %v4708_v37 = vsub.f32 %v4654_v52, %v4693_v9  ;;  %v4711_v63 = vsub.f32 %v4669_v47, %v4699_v62  ;;  %8126 = vpow2.f32 %v4718_v16 }
 0xc11   :  { %v4716_v33 = vmul.f32 1.442695, %v4708_v37  ;;  %v4722_v54 = vmul.f32 1.442695, %v4711_v63 }
 0xc12   :  { %v4697_v40 = vpop.xlane.xlu1 %4696 }
 0xc13   :  { %v4710_v41 = vsub.f32 %v4664_v50, %v4697_v40  ;;  %8128 = vpow2.f32 %v4716_v33 }
 0xc14   :  { %8130 = vpow2.f32 %v4722_v54 }
 0xc15   :  { %v4720_v21 = vmul.f32 1.442695, %v4710_v41 }
 0xc17   :  { %8132 = vpow2.f32 %v4720_v21 }
 0xc18   :  { %v4703_v22 = vpop.xlane.xlu1 %4702 }
 0xc19   :  { %v4701_v45 = vpop.xlane.xlu0 %4700  ;;  %v4713_v57 = vsub.f32 %v4679_v43, %v4703_v22  ;;  %v8127_v48 = vpop.eup %8126 }
 0xc1a   :  { %v4712_v44 = vsub.f32 %v4674_v56, %v4701_v45 }
 0xc1b   :  { %v4726_v55 = vmul.f32 1.442695, %v4713_v57 }
 0xc1c   :  { %v4724_v35 = vmul.f32 1.442695, %v4712_v44 }
 0xc1d   :  { %8134 = vpow2.f32 %v4726_v55  ;;  %v8129_v60 = vpop.eup %8128 }
 0xc1e   :  { %8136 = vpow2.f32 %v4724_v35  ;;  %v8131_v3 = vpop.eup %8130 }
 0xc21   :  { %v8133_v8 = vpop.eup %8132 }
 0xc27   :  { %v8135_v27 = vpop.eup %8134 }
 0xc28   :  { %v8137_v28 = vpop.eup %8136 }
 0xc5f   :  { %v6340_v18 = vpop.f32.mrb[66].mxu1 }
 0xc60   :  { %v4689_v59 = vadd.f32 %v6340_v18, %v4820_v2  ;;  %v4683_v36 = vpop.f32.mrb[67].mxu1 }
 0xc61   :  { %v4684_v39 = vadd.f32 %v4820_v2, %v4683_v36 }
 0xc62   :  { %4706 = vmax.xlane.f32.xlu1 %v4689_v59 }
 0xc63   :  { %4704 = vmax.xlane.f32.xlu0 %v4684_v39 }
 0xc66   :  { %4734 = vadd.xlane.f32.xlu1 %v8127_v48 }
 0xc67   :  { %4732 = vadd.xlane.f32.xlu0 %v8129_v60 }
 0xc6a   :  { %4738 = vadd.xlane.f32.xlu1 %v8131_v3 }
 0xc6b   :  { %4736 = vadd.xlane.f32.xlu0 %v8133_v8 }
 0xc6e   :  { %4742 = vadd.xlane.f32.xlu1 %v8135_v27 }
 0xc6f   :  { %4740 = vadd.xlane.f32.xlu0 %v8137_v28 }
 0xcef   :  { %v4707_v32 = vpop.xlane.xlu1 %4706 }
 0xcf0   :  { %v4715_v29 = vsub.f32 %v4689_v59, %v4707_v32  ;;  %v4705_v58 = vpop.xlane.xlu0 %4704 }
 0xcf1   :  { %v4714_v11 = vsub.f32 %v4684_v39, %v4705_v58 }
 0xcf2   :  { %v4730_v6 = vmul.f32 1.442695, %v4715_v29 }
 0xcf3   :  { %v4728_v7 = vmul.f32 1.442695, %v4714_v11  ;;  %v4735_v4 = vpop.xlane.xlu1 %4734 }
 0xcf4   :  { %8138 = vpow2.f32 %v4730_v6  ;;  %v4733_v53 = vpop.xlane.xlu0 %4732 }
 0xcf5   :  { %8140 = vpow2.f32 %v4728_v7 }
 0xcf6   :  { %8142 = vrcp.f32 %v4735_v4 }
 0xcf7   :  { %8144 = vrcp.f32 %v4733_v53  ;;  %v4739_v46 = vpop.xlane.xlu1 %4738 }
 0xcf8   :  { %8146 = vrcp.f32 %v4739_v46  ;;  %v4737_v12 = vpop.xlane.xlu0 %4736 }
 0xcf9   :  { %8148 = vrcp.f32 %v4737_v12 }
 0xcfb   :  { %v4743_v38 = vpop.xlane.xlu1 %4742 }
 0xcfc   :  { %8150 = vrcp.f32 %v4743_v38  ;;  %v4741_v24 = vpop.xlane.xlu0 %4740 }
 0xcfd   :  { %8152 = vrcp.f32 %v4741_v24 }
 0xcfe   :  { %v8139_v10 = vpop.eup %8138 }
 0xcff   :  { %v8141_v31 = vpop.eup %8140  ;;  %4746 = vadd.xlane.f32.xlu1 %v8139_v10 }
 0xd00   :  { %v8143_v23 = vpop.eup %8142  ;;  %4744 = vadd.xlane.f32.xlu0 %v8141_v31 }
 0xd01   :  { %v8145_v2 = vpop.eup %8144  ;;  %v4751_v15 = vmul.f32 %v8143_v23, %v8127_v48 }
 0xd02   :  { %v8147_v19 = vpop.eup %8146  ;;  %v4749_v14 = vmul.f32 %v8145_v2, %v8129_v60 }
 0xd03   :  { %v8149_v34 = vpop.eup %8148  ;;  %4765 = vst [vmem:[%s9616_s4 + $0x8] sm:$0xff] %v4751_v15  ;;  %v4755_v52 = vmul.f32 %v8147_v19, %v8131_v3 }
 0xd04   :  { %4764 = vst [vmem:[%s9616_s4] sm:$0xff] %v4749_v14  ;;  %v4753_v47 = vmul.f32 %v8149_v34, %v8133_v8 }
 0xd05   :  { %4767 = vst [vmem:[%s9616_s4 + $0x18] sm:$0xff] %v4755_v52 }
 0xd06   :  { %v8151_v1 = vpop.eup %8150  ;;  %4766 = vst [vmem:[%s9616_s4 + $0x10] sm:$0xff] %v4753_v47 }
 0xd07   :  { %v8153_v50 = vpop.eup %8152  ;;  %v4759_v61 = vmul.f32 %v8151_v1, %v8135_v27 }
 0xd08   :  { %v4757_v26 = vmul.f32 %v8153_v50, %v8137_v28 }
 0xd09   :  { %4769 = vst [vmem:[%s9616_s4 + $0x28] sm:$0xff] %v4759_v61 }
 0xd0a   :  { %4768 = vst [vmem:[%s9616_s4 + $0x20] sm:$0xff] %v4757_v26 }
 0xd8c   :  { %v4747_v42 = vpop.xlane.xlu1 %4746 }
 0xd8d   :  { %8154 = vrcp.f32 %v4747_v42  ;;  %v4745_v17 = vpop.xlane.xlu0 %4744 }
 0xd8e   :  { %8156 = vrcp.f32 %v4745_v17 }
 0xd97   :  { %v8155_v13 = vpop.eup %8154 }
 0xd98   :  { %v8157_v30 = vpop.eup %8156  ;;  %v4763_v49 = vmul.f32 %v8155_v13, %v8139_v10 }
 0xd99   :  { %v4761_v43 = vmul.f32 %v8157_v30, %v8141_v31 }
 0xd9a   :  { %4771 = vst [vmem:[%s9616_s4 + $0x38] sm:$0xff] %v4763_v49 }
 0xd9b   :  { %4770 = vst [vmem:[%s9616_s4 + $0x30] sm:$0xff] %v4761_v43 }
 0xd9c   :  { %4780 = vsyncpa [#allocation4], 1 }
 0xd9d   :  { %4781 = vsyncpa [#allocation6], 1 }

</bundles_post_ra>
